<compile_context>
chip_gen: v6e
topology: v6e:2x2x1
jax: 0.10.0
libtpu: 0.0.40
codegen_flags: <defaults>
</compile_context>

<pallas_src>
import functools

import jax
import jax.numpy as jnp
from jax.experimental import pallas as pl
from jax.experimental.pallas import tpu as pltpu

_BN_EPS = 1e-5
_SUBLANES = 8
_MXU_DTYPE = jnp.bfloat16      # MXU operand dtype; accumulation is always f32


def _round_up(x, m):
    return (x + m - 1) // m * m


def _pad_channels(a, c_target):
    c = a.shape[-1]
    if c == c_target:
        return a
    pads = [(0, 0)] * (a.ndim - 1) + [(0, c_target - c)]
    return jnp.pad(a, pads)


# ---------------------------------------------------------------------------
# Fused kernel: conv1(3x3,s)+bn1+relu -> conv2(3x3,1)+bn2 -> +shortcut -> relu
# One grid step processes one batch element (whole image).
# ---------------------------------------------------------------------------
def _basic_block_kernel(x_ref, w1_ref, b1_ref, w2_ref, b2_ref, *rest,
                        ksize, stride, pad, ho, wo, has_projection):
    if has_projection:
        ws_ref, bs_ref, o_ref, h1_ref = rest
    else:
        ws_ref = bs_ref = None
        o_ref, h1_ref = rest

    s = stride
    cin_p = x_ref.shape[-1]
    cout_p = o_ref.shape[-1]
    m = ho * wo

    # ---- tap gathers (all static, unit-stride slices) ----------------------
    def x_tap(dy, dx):
        # stride handled via the phase-split (space-to-batch) input layout
        p = x_ref[0, dy % s, dx % s,
                  dy // s: dy // s + ho,
                  dx // s: dx // s + wo, :]
        return p.reshape(m, cin_p)

    def h_tap(dy, dx):
        return h1_ref[dy: dy + ho, dx: dx + wo, :].reshape(m, cout_p)

    def conv3x3(tap_fn, w_ref):
        # 9 shallow per-tap MXU dots, bf16 operands, f32 accumulation.
        acc = jnp.zeros((m, w_ref.shape[-1]), jnp.float32)
        for dy in range(ksize):
            for dx in range(ksize):
                p = tap_fn(dy, dx).astype(_MXU_DTYPE)
                acc = acc + jnp.dot(p, w_ref[dy * ksize + dx],
                                    preferred_element_type=jnp.float32)
        return acc

    # ---- conv1 + bn1 + relu -------------------------------------------------
    h1 = jnp.maximum(conv3x3(x_tap, w1_ref) + b1_ref[...], 0.0)

    # Stage the conv1 output (with a 1-pixel zero halo) in VMEM for conv2;
    # no HBM round trip of the intermediate feature map.
    h1_ref[...] = jnp.zeros_like(h1_ref)
    h1_ref[1:ho + 1, 1:wo + 1, :] = h1.reshape(ho, wo, cout_p)

    # ---- conv2 + bn2 ---------------------------------------------------------
    out = conv3x3(h_tap, w2_ref) + b2_ref[...]

    # ---- shortcut ------------------------------------------------------------
    # 1x1 stride-s (pad 0) tap == padded-input pixel (r*s+pad, c*s+pad),
    # i.e. phase (pad%s, pad%s), offset pad//s in the phase-split layout.
    sc = x_ref[0, pad % s, pad % s,
               pad // s: pad // s + ho,
               pad // s: pad // s + wo, :].reshape(m, cin_p)
    if has_projection:
        out = out + jnp.dot(sc.astype(_MXU_DTYPE), ws_ref[...],
                            preferred_element_type=jnp.float32) + bs_ref[...]
    else:
        out = out + sc.astype(jnp.float32)          # identity residual, exact f32

    o_ref[0] = jnp.maximum(out, 0.0).reshape(ho, wo, cout_p).astype(o_ref.dtype)


# ---------------------------------------------------------------------------
# Parameter prep: BN folding, channel padding (to sublane multiple), bf16 cast
# ---------------------------------------------------------------------------
def _fold_bn(bn):
    scale = bn["gamma"] / jnp.sqrt(bn["var"] + _BN_EPS)
    bias = bn["beta"] - bn["mean"] * scale
    return scale, bias


def _prep_w(w_hwio, scale, cin_p, cout_p):
    kh, kw, cin, cout = w_hwio.shape
    wf = w_hwio.astype(jnp.float32) * scale.reshape(1, 1, 1, cout)
    wf = jnp.pad(wf, ((0, 0), (0, 0), (0, cin_p - cin), (0, cout_p - cout)))
    return wf.reshape(kh * kw, cin_p, cout_p).astype(_MXU_DTYPE)


def _prep_b(bias, cout_p):
    cout = bias.shape[0]
    return jnp.pad(bias.astype(jnp.float32), (0, cout_p - cout)).reshape(1, cout_p)


# ---------------------------------------------------------------------------
# BasicBlock forward (NCHW in / NCHW out, like the PyTorch module)
# ---------------------------------------------------------------------------
def basic_block_forward(params, x_nchw):
    x = jnp.transpose(x_nchw, (0, 2, 3, 1)).astype(jnp.float32)   # NCHW -> NHWC
    stride = params["stride"]
    K = params["w1"].shape[0]
    in_planes, planes = params["w1"].shape[2], params["w1"].shape[3]
    pad = (K - 1) // 2
    s = stride

    cin_p = _round_up(in_planes, _SUBLANES)
    cout_p = _round_up(planes, _SUBLANES)

    N, H, W, _ = x.shape
    x_p = _pad_channels(x, cin_p)

    s1, b1 = _fold_bn(params["bn1"])
    s2, b2 = _fold_bn(params["bn2"])
    w1m = _prep_w(params["w1"], s1, cin_p, cout_p)       # (9, cin_p, cout_p) bf16
    w2m = _prep_w(params["w2"], s2, cout_p, cout_p)
    b1m = _prep_b(b1, cout_p)
    b2m = _prep_b(b2, cout_p)

    has_projection = params["shortcut"] is not None
    if has_projection:
        ss, bs = _fold_bn(params["shortcut"]["bn"])
        wsm = _prep_w(params["shortcut"]["w"], ss, cin_p, cout_p)[0]   # (cin_p, cout_p)
        bsm = _prep_b(bs, cout_p)

    # One-time spatial 'same' pad + space-to-batch split into stride phases,
    # shared by conv1 and the projection shortcut.
    Hp, Wp = H + 2 * pad, W + 2 * pad
    Ho = (Hp - K) // s + 1
    Wo = (Wp - K) // s + 1
    Hp2, Wp2 = _round_up(Hp, s), _round_up(Wp, s)
    xp = jnp.pad(x_p, ((0, 0), (pad, pad + Hp2 - Hp), (pad, pad + Wp2 - Wp), (0, 0)))
    Hps, Wps = Hp2 // s, Wp2 // s
    xph = xp.reshape(N, Hps, s, Wps, s, cin_p).transpose(0, 2, 4, 1, 3, 5)

    in_specs = [
        pl.BlockSpec((1, s, s, Hps, Wps, cin_p), lambda n: (n, 0, 0, 0, 0, 0)),
        pl.BlockSpec((K * K, cin_p, cout_p), lambda n: (0, 0, 0)),
        pl.BlockSpec((1, cout_p), lambda n: (0, 0)),
        pl.BlockSpec((K * K, cout_p, cout_p), lambda n: (0, 0, 0)),
        pl.BlockSpec((1, cout_p), lambda n: (0, 0)),
    ]
    args = [xph, w1m, b1m, w2m, b2m]
    if has_projection:
        in_specs += [pl.BlockSpec((cin_p, cout_p), lambda n: (0, 0)),
                     pl.BlockSpec((1, cout_p), lambda n: (0, 0))]
        args += [wsm, bsm]

    kernel = functools.partial(
        _basic_block_kernel, ksize=K, stride=s, pad=pad, ho=Ho, wo=Wo,
        has_projection=has_projection)

    out = pl.pallas_call(
        kernel,
        out_shape=jax.ShapeDtypeStruct((N, Ho, Wo, cout_p), jnp.float32),
        grid=(N,),
        in_specs=in_specs,
        out_specs=pl.BlockSpec((1, Ho, Wo, cout_p), lambda n: (n, 0, 0, 0)),
        scratch_shapes=[pltpu.VMEM((Ho + 2, Wo + 2, cout_p), jnp.float32)],
        compiler_params=pltpu.CompilerParams(
            dimension_semantics=("parallel",)),
    )(*args)

    out = out[..., :planes]                              # drop channel padding
    return jnp.transpose(out, (0, 3, 1, 2))              # NHWC -> NCHW


# ---------------------------------------------------------------------------
# Parameter init (deterministic, synthetic)
# ---------------------------------------------------------------------------
def _init_bn(key, c):
    k1, k2, k3, k4 = jax.random.split(key, 4)
    return dict(
        gamma=jax.random.uniform(k1, (c,), jnp.float32, 0.5, 1.5),
        beta=jax.random.normal(k2, (c,), jnp.float32) * 0.1,
        mean=jax.random.normal(k3, (c,), jnp.float32) * 0.1,
        var=jax.random.uniform(k4, (c,), jnp.float32, 0.5, 1.5),
    )


def init_basic_block(key, in_planes, planes, stride=1):
    ks = jax.random.split(key, 6)
    params = dict(
        stride=stride,
        w1=jax.random.normal(ks[0], (3, 3, in_planes, planes), jnp.float32) * 0.1,
        bn1=_init_bn(ks[1], planes),
        w2=jax.random.normal(ks[2], (3, 3, planes, planes), jnp.float32) * 0.1,
        bn2=_init_bn(ks[3], planes),
        shortcut=None,
    )
    if stride != 1 or in_planes != planes:
        params["shortcut"] = dict(
            w=jax.random.normal(ks[4], (1, 1, in_planes, planes), jnp.float32) * 0.1,
            bn=_init_bn(ks[5], planes),
        )
    return params


# ---------------------------------------------------------------------------
# Pure-JAX f32 reference for validation
# ---------------------------------------------------------------------------
def _ref_conv(x, w, stride, pad):
    return jax.lax.conv_general_dilated(
        x, w, (stride, stride), [(pad, pad), (pad, pad)],
        dimension_numbers=("NHWC", "HWIO", "NHWC"))


def _ref_bn(x, p):
    return (x - p["mean"]) / jnp.sqrt(p["var"] + _BN_EPS) * p["gamma"] + p["beta"]


def ref_basic_block(params, x_nchw):
    x = jnp.transpose(x_nchw, (0, 2, 3, 1))
    s = params["stride"]
    out = jax.nn.relu(_ref_bn(_ref_conv(x, params["w1"], s, 1), params["bn1"]))
    out = _ref_bn(_ref_conv(out, params["w2"], 1, 1), params["bn2"])
    if params["shortcut"] is not None:
        sc = _ref_bn(_ref_conv(x, params["shortcut"]["w"], s, 0),
                     params["shortcut"]["bn"])
    else:
        sc = x
    return jnp.transpose(jax.nn.relu(out + sc), (0, 3, 1, 2))


# ---------------------------------------------------------------------------
if __name__ == "__main__":
    key = jax.random.PRNGKey(0)
    kx, kp1, kp2 = jax.random.split(key, 3)

    x = jax.random.normal(kx, (2, 4, 16, 16), jnp.float32)    # NCHW

    # Case 1: identity shortcut (stride=1, in_planes == planes)
    p_id = init_basic_block(kp1, in_planes=4, planes=4, stride=1)
    y_id = basic_block_forward(p_id, x)

    # Case 2: projection shortcut (stride=2, in_planes != planes)
    p_proj = init_basic_block(kp2, in_planes=4, planes=8, stride=2)
    y_proj = basic_block_forward(p_proj, x)

    jax.block_until_ready((y_id, y_proj))

    ref_id = ref_basic_block(p_id, x)
    ref_proj = ref_basic_block(p_proj, x)

    assert y_id.shape == (2, 4, 16, 16), y_id.shape
    assert y_proj.shape == (2, 8, 8, 8), y_proj.shape
    # bf16 MXU operands with f32 accumulation -> mixed-precision tolerance vs f32 ref.
    assert jnp.allclose(y_id, ref_id, rtol=5e-2, atol=5e-2), \
        float(jnp.max(jnp.abs(y_id - ref_id)))
    assert jnp.allclose(y_proj, ref_proj, rtol=5e-2, atol=5e-2), \
        float(jnp.max(jnp.abs(y_proj - ref_proj)))

    print("KERNEL_OK")
</pallas_src>

<mosaic_0001>
module attributes {stable_mosaic.version = 11 : i64} {
  func.func @_basic_block_kernel(%arg0: i32, %arg1: memref<1x1x1x18x18x8xf32, #tpu.memory_space<vmem>>, %arg2: memref<9x8x8xbf16, #tpu.memory_space<vmem>>, %arg3: memref<1x8xf32, #tpu.memory_space<vmem>>, %arg4: memref<9x8x8xbf16, #tpu.memory_space<vmem>>, %arg5: memref<1x8xf32, #tpu.memory_space<vmem>>, %arg6: memref<1x16x16x8xf32, #tpu.memory_space<vmem>>, %arg7: memref<18x18x8xf32, #tpu.memory_space<vmem>>) attributes {dimension_semantics = [#tpu.dimension_semantics<parallel>], iteration_bounds = array<i64: 2>, scalar_prefetch = 0 : i64, scratch_operands = 1 : i64, tpu.core_type = #tpu.core_type<tc>, window_params = [{transform_indices = @transform_0, window_bounds = array<i64: 1, 1, 1, 18, 18, 8>}, {pipeline_mode = #tpu.pipeline_mode<synchronous>, transform_indices = @transform_1, window_bounds = array<i64: 9, 8, 8>}, {pipeline_mode = #tpu.pipeline_mode<synchronous>, transform_indices = @transform_2, window_bounds = array<i64: 1, 8>}, {pipeline_mode = #tpu.pipeline_mode<synchronous>, transform_indices = @transform_3, window_bounds = array<i64: 9, 8, 8>}, {pipeline_mode = #tpu.pipeline_mode<synchronous>, transform_indices = @transform_4, window_bounds = array<i64: 1, 8>}, {transform_indices = @transform_5, window_bounds = array<i64: 1, 16, 16, 8>}]} {
    %cst = arith.constant 0.000000e+00 : f32
    %0 = vector.broadcast %cst : f32 to vector<256x8xf32>
    %c0 = arith.constant 0 : index
    %c0_0 = arith.constant 0 : index
    %c0_1 = arith.constant 0 : index
    %c0_2 = arith.constant 0 : index
    %c0_3 = arith.constant 0 : index
    %c0_4 = arith.constant 0 : index
    %1 = vector.load %arg1[%c0, %c0_0, %c0_1, %c0_2, %c0_3, %c0_4] : memref<1x1x1x18x18x8xf32, #tpu.memory_space<vmem>>, vector<1x1x1x16x16x8xf32>
    %2 = vector.shape_cast %1 : vector<1x1x1x16x16x8xf32> to vector<16x16x8xf32>
    %3 = vector.shape_cast %2 : vector<16x16x8xf32> to vector<256x8xf32>
    %4 = arith.truncf %3 : vector<256x8xf32> to vector<256x8xbf16>
    %c0_5 = arith.constant 0 : index
    %c0_6 = arith.constant 0 : index
    %c0_7 = arith.constant 0 : index
    %5 = vector.load %arg2[%c0_5, %c0_6, %c0_7] : memref<9x8x8xbf16, #tpu.memory_space<vmem>>, vector<1x8x8xbf16>
    %6 = vector.shape_cast %5 : vector<1x8x8xbf16> to vector<8x8xbf16>
    %cst_8 = arith.constant dense<0.000000e+00> : vector<256x8xf32>
    %7 = tpu.matmul %4, %6, %cst_8 {dimension_numbers = #tpu.dot_dimension_numbers<[1], [0], [0], [1], [0, 0, 1, 1], [], []>} : vector<256x8xbf16>, vector<8x8xbf16>, vector<256x8xf32> -> vector<256x8xf32>
    %8 = arith.addf %0, %7 : vector<256x8xf32>
    %c0_9 = arith.constant 0 : index
    %c0_10 = arith.constant 0 : index
    %c0_11 = arith.constant 0 : index
    %c0_12 = arith.constant 0 : index
    %c1 = arith.constant 1 : index
    %c0_13 = arith.constant 0 : index
    %9 = vector.load %arg1[%c0_9, %c0_10, %c0_11, %c0_12, %c1, %c0_13] : memref<1x1x1x18x18x8xf32, #tpu.memory_space<vmem>>, vector<1x1x1x16x16x8xf32>
    %10 = vector.shape_cast %9 : vector<1x1x1x16x16x8xf32> to vector<16x16x8xf32>
    %11 = vector.shape_cast %10 : vector<16x16x8xf32> to vector<256x8xf32>
    %12 = arith.truncf %11 : vector<256x8xf32> to vector<256x8xbf16>
    %c1_14 = arith.constant 1 : index
    %c0_15 = arith.constant 0 : index
    %c0_16 = arith.constant 0 : index
    %13 = vector.load %arg2[%c1_14, %c0_15, %c0_16] : memref<9x8x8xbf16, #tpu.memory_space<vmem>>, vector<1x8x8xbf16>
    %14 = vector.shape_cast %13 : vector<1x8x8xbf16> to vector<8x8xbf16>
    %cst_17 = arith.constant dense<0.000000e+00> : vector<256x8xf32>
    %15 = tpu.matmul %12, %14, %cst_17 {dimension_numbers = #tpu.dot_dimension_numbers<[1], [0], [0], [1], [0, 0, 1, 1], [], []>} : vector<256x8xbf16>, vector<8x8xbf16>, vector<256x8xf32> -> vector<256x8xf32>
    %16 = arith.addf %8, %15 : vector<256x8xf32>
    %c0_18 = arith.constant 0 : index
    %c0_19 = arith.constant 0 : index
    %c0_20 = arith.constant 0 : index
    %c0_21 = arith.constant 0 : index
    %c2 = arith.constant 2 : index
    %c0_22 = arith.constant 0 : index
    %17 = vector.load %arg1[%c0_18, %c0_19, %c0_20, %c0_21, %c2, %c0_22] : memref<1x1x1x18x18x8xf32, #tpu.memory_space<vmem>>, vector<1x1x1x16x16x8xf32>
    %18 = vector.shape_cast %17 : vector<1x1x1x16x16x8xf32> to vector<16x16x8xf32>
    %19 = vector.shape_cast %18 : vector<16x16x8xf32> to vector<256x8xf32>
    %20 = arith.truncf %19 : vector<256x8xf32> to vector<256x8xbf16>
    %c2_23 = arith.constant 2 : index
    %c0_24 = arith.constant 0 : index
    %c0_25 = arith.constant 0 : index
    %21 = vector.load %arg2[%c2_23, %c0_24, %c0_25] : memref<9x8x8xbf16, #tpu.memory_space<vmem>>, vector<1x8x8xbf16>
    %22 = vector.shape_cast %21 : vector<1x8x8xbf16> to vector<8x8xbf16>
    %cst_26 = arith.constant dense<0.000000e+00> : vector<256x8xf32>
    %23 = tpu.matmul %20, %22, %cst_26 {dimension_numbers = #tpu.dot_dimension_numbers<[1], [0], [0], [1], [0, 0, 1, 1], [], []>} : vector<256x8xbf16>, vector<8x8xbf16>, vector<256x8xf32> -> vector<256x8xf32>
    %24 = arith.addf %16, %23 : vector<256x8xf32>
    %c0_27 = arith.constant 0 : index
    %c0_28 = arith.constant 0 : index
    %c0_29 = arith.constant 0 : index
    %c1_30 = arith.constant 1 : index
    %c0_31 = arith.constant 0 : index
    %c0_32 = arith.constant 0 : index
    %25 = vector.load %arg1[%c0_27, %c0_28, %c0_29, %c1_30, %c0_31, %c0_32] : memref<1x1x1x18x18x8xf32, #tpu.memory_space<vmem>>, vector<1x1x1x16x16x8xf32>
    %26 = vector.shape_cast %25 : vector<1x1x1x16x16x8xf32> to vector<16x16x8xf32>
    %27 = vector.shape_cast %26 : vector<16x16x8xf32> to vector<256x8xf32>
    %28 = arith.truncf %27 : vector<256x8xf32> to vector<256x8xbf16>
    %c3 = arith.constant 3 : index
    %c0_33 = arith.constant 0 : index
    %c0_34 = arith.constant 0 : index
    %29 = vector.load %arg2[%c3, %c0_33, %c0_34] : memref<9x8x8xbf16, #tpu.memory_space<vmem>>, vector<1x8x8xbf16>
    %30 = vector.shape_cast %29 : vector<1x8x8xbf16> to vector<8x8xbf16>
    %cst_35 = arith.constant dense<0.000000e+00> : vector<256x8xf32>
    %31 = tpu.matmul %28, %30, %cst_35 {dimension_numbers = #tpu.dot_dimension_numbers<[1], [0], [0], [1], [0, 0, 1, 1], [], []>} : vector<256x8xbf16>, vector<8x8xbf16>, vector<256x8xf32> -> vector<256x8xf32>
    %32 = arith.addf %24, %31 : vector<256x8xf32>
    %c0_36 = arith.constant 0 : index
    %c0_37 = arith.constant 0 : index
    %c0_38 = arith.constant 0 : index
    %c1_39 = arith.constant 1 : index
    %c1_40 = arith.constant 1 : index
    %c0_41 = arith.constant 0 : index
    %33 = vector.load %arg1[%c0_36, %c0_37, %c0_38, %c1_39, %c1_40, %c0_41] : memref<1x1x1x18x18x8xf32, #tpu.memory_space<vmem>>, vector<1x1x1x16x16x8xf32>
    %34 = vector.shape_cast %33 : vector<1x1x1x16x16x8xf32> to vector<16x16x8xf32>
    %35 = vector.shape_cast %34 : vector<16x16x8xf32> to vector<256x8xf32>
    %36 = arith.truncf %35 : vector<256x8xf32> to vector<256x8xbf16>
    %c4 = arith.constant 4 : index
    %c0_42 = arith.constant 0 : index
    %c0_43 = arith.constant 0 : index
    %37 = vector.load %arg2[%c4, %c0_42, %c0_43] : memref<9x8x8xbf16, #tpu.memory_space<vmem>>, vector<1x8x8xbf16>
    %38 = vector.shape_cast %37 : vector<1x8x8xbf16> to vector<8x8xbf16>
    %cst_44 = arith.constant dense<0.000000e+00> : vector<256x8xf32>
    %39 = tpu.matmul %36, %38, %cst_44 {dimension_numbers = #tpu.dot_dimension_numbers<[1], [0], [0], [1], [0, 0, 1, 1], [], []>} : vector<256x8xbf16>, vector<8x8xbf16>, vector<256x8xf32> -> vector<256x8xf32>
    %40 = arith.addf %32, %39 : vector<256x8xf32>
    %c0_45 = arith.constant 0 : index
    %c0_46 = arith.constant 0 : index
    %c0_47 = arith.constant 0 : index
    %c1_48 = arith.constant 1 : index
    %c2_49 = arith.constant 2 : index
    %c0_50 = arith.constant 0 : index
    %41 = vector.load %arg1[%c0_45, %c0_46, %c0_47, %c1_48, %c2_49, %c0_50] : memref<1x1x1x18x18x8xf32, #tpu.memory_space<vmem>>, vector<1x1x1x16x16x8xf32>
    %42 = vector.shape_cast %41 : vector<1x1x1x16x16x8xf32> to vector<16x16x8xf32>
    %43 = vector.shape_cast %42 : vector<16x16x8xf32> to vector<256x8xf32>
    %44 = arith.truncf %43 : vector<256x8xf32> to vector<256x8xbf16>
    %c5 = arith.constant 5 : index
    %c0_51 = arith.constant 0 : index
    %c0_52 = arith.constant 0 : index
    %45 = vector.load %arg2[%c5, %c0_51, %c0_52] : memref<9x8x8xbf16, #tpu.memory_space<vmem>>, vector<1x8x8xbf16>
    %46 = vector.shape_cast %45 : vector<1x8x8xbf16> to vector<8x8xbf16>
    %cst_53 = arith.constant dense<0.000000e+00> : vector<256x8xf32>
    %47 = tpu.matmul %44, %46, %cst_53 {dimension_numbers = #tpu.dot_dimension_numbers<[1], [0], [0], [1], [0, 0, 1, 1], [], []>} : vector<256x8xbf16>, vector<8x8xbf16>, vector<256x8xf32> -> vector<256x8xf32>
    %48 = arith.addf %40, %47 : vector<256x8xf32>
    %c0_54 = arith.constant 0 : index
    %c0_55 = arith.constant 0 : index
    %c0_56 = arith.constant 0 : index
    %c2_57 = arith.constant 2 : index
    %c0_58 = arith.constant 0 : index
    %c0_59 = arith.constant 0 : index
    %49 = vector.load %arg1[%c0_54, %c0_55, %c0_56, %c2_57, %c0_58, %c0_59] : memref<1x1x1x18x18x8xf32, #tpu.memory_space<vmem>>, vector<1x1x1x16x16x8xf32>
    %50 = vector.shape_cast %49 : vector<1x1x1x16x16x8xf32> to vector<16x16x8xf32>
    %51 = vector.shape_cast %50 : vector<16x16x8xf32> to vector<256x8xf32>
    %52 = arith.truncf %51 : vector<256x8xf32> to vector<256x8xbf16>
    %c6 = arith.constant 6 : index
    %c0_60 = arith.constant 0 : index
    %c0_61 = arith.constant 0 : index
    %53 = vector.load %arg2[%c6, %c0_60, %c0_61] : memref<9x8x8xbf16, #tpu.memory_space<vmem>>, vector<1x8x8xbf16>
    %54 = vector.shape_cast %53 : vector<1x8x8xbf16> to vector<8x8xbf16>
    %cst_62 = arith.constant dense<0.000000e+00> : vector<256x8xf32>
    %55 = tpu.matmul %52, %54, %cst_62 {dimension_numbers = #tpu.dot_dimension_numbers<[1], [0], [0], [1], [0, 0, 1, 1], [], []>} : vector<256x8xbf16>, vector<8x8xbf16>, vector<256x8xf32> -> vector<256x8xf32>
    %56 = arith.addf %48, %55 : vector<256x8xf32>
    %c0_63 = arith.constant 0 : index
    %c0_64 = arith.constant 0 : index
    %c0_65 = arith.constant 0 : index
    %c2_66 = arith.constant 2 : index
    %c1_67 = arith.constant 1 : index
    %c0_68 = arith.constant 0 : index
    %57 = vector.load %arg1[%c0_63, %c0_64, %c0_65, %c2_66, %c1_67, %c0_68] : memref<1x1x1x18x18x8xf32, #tpu.memory_space<vmem>>, vector<1x1x1x16x16x8xf32>
    %58 = vector.shape_cast %57 : vector<1x1x1x16x16x8xf32> to vector<16x16x8xf32>
    %59 = vector.shape_cast %58 : vector<16x16x8xf32> to vector<256x8xf32>
    %60 = arith.truncf %59 : vector<256x8xf32> to vector<256x8xbf16>
    %c7 = arith.constant 7 : index
    %c0_69 = arith.constant 0 : index
    %c0_70 = arith.constant 0 : index
    %61 = vector.load %arg2[%c7, %c0_69, %c0_70] : memref<9x8x8xbf16, #tpu.memory_space<vmem>>, vector<1x8x8xbf16>
    %62 = vector.shape_cast %61 : vector<1x8x8xbf16> to vector<8x8xbf16>
    %cst_71 = arith.constant dense<0.000000e+00> : vector<256x8xf32>
    %63 = tpu.matmul %60, %62, %cst_71 {dimension_numbers = #tpu.dot_dimension_numbers<[1], [0], [0], [1], [0, 0, 1, 1], [], []>} : vector<256x8xbf16>, vector<8x8xbf16>, vector<256x8xf32> -> vector<256x8xf32>
    %64 = arith.addf %56, %63 : vector<256x8xf32>
    %c0_72 = arith.constant 0 : index
    %c0_73 = arith.constant 0 : index
    %c0_74 = arith.constant 0 : index
    %c2_75 = arith.constant 2 : index
    %c2_76 = arith.constant 2 : index
    %c0_77 = arith.constant 0 : index
    %65 = vector.load %arg1[%c0_72, %c0_73, %c0_74, %c2_75, %c2_76, %c0_77] : memref<1x1x1x18x18x8xf32, #tpu.memory_space<vmem>>, vector<1x1x1x16x16x8xf32>
    %66 = vector.shape_cast %65 : vector<1x1x1x16x16x8xf32> to vector<16x16x8xf32>
    %67 = vector.shape_cast %66 : vector<16x16x8xf32> to vector<256x8xf32>
    %68 = arith.truncf %67 : vector<256x8xf32> to vector<256x8xbf16>
    %c8 = arith.constant 8 : index
    %c0_78 = arith.constant 0 : index
    %c0_79 = arith.constant 0 : index
    %69 = vector.load %arg2[%c8, %c0_78, %c0_79] : memref<9x8x8xbf16, #tpu.memory_space<vmem>>, vector<1x8x8xbf16>
    %70 = vector.shape_cast %69 : vector<1x8x8xbf16> to vector<8x8xbf16>
    %cst_80 = arith.constant dense<0.000000e+00> : vector<256x8xf32>
    %71 = tpu.matmul %68, %70, %cst_80 {dimension_numbers = #tpu.dot_dimension_numbers<[1], [0], [0], [1], [0, 0, 1, 1], [], []>} : vector<256x8xbf16>, vector<8x8xbf16>, vector<256x8xf32> -> vector<256x8xf32>
    %72 = arith.addf %64, %71 : vector<256x8xf32>
    %c0_81 = arith.constant 0 : index
    %c0_82 = arith.constant 0 : index
    %73 = vector.load %arg3[%c0_81, %c0_82] : memref<1x8xf32, #tpu.memory_space<vmem>>, vector<1x8xf32>
    %74 = vector.broadcast %73 : vector<1x8xf32> to vector<256x8xf32>
    %75 = arith.addf %72, %74 : vector<256x8xf32>
    %cst_83 = arith.constant 0.000000e+00 : f32
    %76 = vector.broadcast %cst_83 : f32 to vector<256x8xf32>
    %77 = arith.maximumf %75, %76 : vector<256x8xf32>
    %cst_84 = arith.constant 0.000000e+00 : f32
    %78 = vector.broadcast %cst_84 : f32 to vector<18x18x8xf32>
    %c0_85 = arith.constant 0 : index
    %c0_86 = arith.constant 0 : index
    %c0_87 = arith.constant 0 : index
    %79 = vector.load %arg7[%c0_85, %c0_86, %c0_87] : memref<18x18x8xf32, #tpu.memory_space<vmem>>, vector<18x18x8xf32>
    tpu.vector_store %arg7[%c0_85, %c0_86, %c0_87], %78 {strides = array<i32>} : memref<18x18x8xf32, #tpu.memory_space<vmem>>, vector<18x18x8xf32>,
    %80 = vector.shape_cast %77 : vector<256x8xf32> to vector<16x16x8xf32>
    %c1_88 = arith.constant 1 : index
    %c1_89 = arith.constant 1 : index
    %c0_90 = arith.constant 0 : index
    %81 = vector.load %arg7[%c1_88, %c1_89, %c0_90] : memref<18x18x8xf32, #tpu.memory_space<vmem>>, vector<16x16x8xf32>
    tpu.vector_store %arg7[%c1_88, %c1_89, %c0_90], %80 {strides = array<i32>} : memref<18x18x8xf32, #tpu.memory_space<vmem>>, vector<16x16x8xf32>,
    %cst_91 = arith.constant 0.000000e+00 : f32
    %82 = vector.broadcast %cst_91 : f32 to vector<256x8xf32>
    %c0_92 = arith.constant 0 : index
    %c0_93 = arith.constant 0 : index
    %c0_94 = arith.constant 0 : index
    %83 = vector.load %arg7[%c0_92, %c0_93, %c0_94] : memref<18x18x8xf32, #tpu.memory_space<vmem>>, vector<16x16x8xf32>
    %84 = vector.shape_cast %83 : vector<16x16x8xf32> to vector<256x8xf32>
    %85 = arith.truncf %84 : vector<256x8xf32> to vector<256x8xbf16>
    %c0_95 = arith.constant 0 : index
    %c0_96 = arith.constant 0 : index
    %c0_97 = arith.constant 0 : index
    %86 = vector.load %arg4[%c0_95, %c0_96, %c0_97] : memref<9x8x8xbf16, #tpu.memory_space<vmem>>, vector<1x8x8xbf16>
    %87 = vector.shape_cast %86 : vector<1x8x8xbf16> to vector<8x8xbf16>
    %cst_98 = arith.constant dense<0.000000e+00> : vector<256x8xf32>
    %88 = tpu.matmul %85, %87, %cst_98 {dimension_numbers = #tpu.dot_dimension_numbers<[1], [0], [0], [1], [0, 0, 1, 1], [], []>} : vector<256x8xbf16>, vector<8x8xbf16>, vector<256x8xf32> -> vector<256x8xf32>
    %89 = arith.addf %82, %88 : vector<256x8xf32>
    %c0_99 = arith.constant 0 : index
    %c1_100 = arith.constant 1 : index
    %c0_101 = arith.constant 0 : index
    %90 = vector.load %arg7[%c0_99, %c1_100, %c0_101] : memref<18x18x8xf32, #tpu.memory_space<vmem>>, vector<16x16x8xf32>
    %91 = vector.shape_cast %90 : vector<16x16x8xf32> to vector<256x8xf32>
    %92 = arith.truncf %91 : vector<256x8xf32> to vector<256x8xbf16>
    %c1_102 = arith.constant 1 : index
    %c0_103 = arith.constant 0 : index
    %c0_104 = arith.constant 0 : index
    %93 = vector.load %arg4[%c1_102, %c0_103, %c0_104] : memref<9x8x8xbf16, #tpu.memory_space<vmem>>, vector<1x8x8xbf16>
    %94 = vector.shape_cast %93 : vector<1x8x8xbf16> to vector<8x8xbf16>
    %cst_105 = arith.constant dense<0.000000e+00> : vector<256x8xf32>
    %95 = tpu.matmul %92, %94, %cst_105 {dimension_numbers = #tpu.dot_dimension_numbers<[1], [0], [0], [1], [0, 0, 1, 1], [], []>} : vector<256x8xbf16>, vector<8x8xbf16>, vector<256x8xf32> -> vector<256x8xf32>
    %96 = arith.addf %89, %95 : vector<256x8xf32>
    %c0_106 = arith.constant 0 : index
    %c2_107 = arith.constant 2 : index
    %c0_108 = arith.constant 0 : index
    %97 = vector.load %arg7[%c0_106, %c2_107, %c0_108] : memref<18x18x8xf32, #tpu.memory_space<vmem>>, vector<16x16x8xf32>
    %98 = vector.shape_cast %97 : vector<16x16x8xf32> to vector<256x8xf32>
    %99 = arith.truncf %98 : vector<256x8xf32> to vector<256x8xbf16>
    %c2_109 = arith.constant 2 : index
    %c0_110 = arith.constant 0 : index
    %c0_111 = arith.constant 0 : index
    %100 = vector.load %arg4[%c2_109, %c0_110, %c0_111] : memref<9x8x8xbf16, #tpu.memory_space<vmem>>, vector<1x8x8xbf16>
    %101 = vector.shape_cast %100 : vector<1x8x8xbf16> to vector<8x8xbf16>
    %cst_112 = arith.constant dense<0.000000e+00> : vector<256x8xf32>
    %102 = tpu.matmul %99, %101, %cst_112 {dimension_numbers = #tpu.dot_dimension_numbers<[1], [0], [0], [1], [0, 0, 1, 1], [], []>} : vector<256x8xbf16>, vector<8x8xbf16>, vector<256x8xf32> -> vector<256x8xf32>
    %103 = arith.addf %96, %102 : vector<256x8xf32>
    %c1_113 = arith.constant 1 : index
    %c0_114 = arith.constant 0 : index
    %c0_115 = arith.constant 0 : index
    %104 = vector.load %arg7[%c1_113, %c0_114, %c0_115] : memref<18x18x8xf32, #tpu.memory_space<vmem>>, vector<16x16x8xf32>
    %105 = vector.shape_cast %104 : vector<16x16x8xf32> to vector<256x8xf32>
    %106 = arith.truncf %105 : vector<256x8xf32> to vector<256x8xbf16>
    %c3_116 = arith.constant 3 : index
    %c0_117 = arith.constant 0 : index
    %c0_118 = arith.constant 0 : index
    %107 = vector.load %arg4[%c3_116, %c0_117, %c0_118] : memref<9x8x8xbf16, #tpu.memory_space<vmem>>, vector<1x8x8xbf16>
    %108 = vector.shape_cast %107 : vector<1x8x8xbf16> to vector<8x8xbf16>
    %cst_119 = arith.constant dense<0.000000e+00> : vector<256x8xf32>
    %109 = tpu.matmul %106, %108, %cst_119 {dimension_numbers = #tpu.dot_dimension_numbers<[1], [0], [0], [1], [0, 0, 1, 1], [], []>} : vector<256x8xbf16>, vector<8x8xbf16>, vector<256x8xf32> -> vector<256x8xf32>
    %110 = arith.addf %103, %109 : vector<256x8xf32>
    %c1_120 = arith.constant 1 : index
    %c1_121 = arith.constant 1 : index
    %c0_122 = arith.constant 0 : index
    %111 = vector.load %arg7[%c1_120, %c1_121, %c0_122] : memref<18x18x8xf32, #tpu.memory_space<vmem>>, vector<16x16x8xf32>
    %112 = vector.shape_cast %111 : vector<16x16x8xf32> to vector<256x8xf32>
    %113 = arith.truncf %112 : vector<256x8xf32> to vector<256x8xbf16>
    %c4_123 = arith.constant 4 : index
    %c0_124 = arith.constant 0 : index
    %c0_125 = arith.constant 0 : index
    %114 = vector.load %arg4[%c4_123, %c0_124, %c0_125] : memref<9x8x8xbf16, #tpu.memory_space<vmem>>, vector<1x8x8xbf16>
    %115 = vector.shape_cast %114 : vector<1x8x8xbf16> to vector<8x8xbf16>
    %cst_126 = arith.constant dense<0.000000e+00> : vector<256x8xf32>
    %116 = tpu.matmul %113, %115, %cst_126 {dimension_numbers = #tpu.dot_dimension_numbers<[1], [0], [0], [1], [0, 0, 1, 1], [], []>} : vector<256x8xbf16>, vector<8x8xbf16>, vector<256x8xf32> -> vector<256x8xf32>
    %117 = arith.addf %110, %116 : vector<256x8xf32>
    %c1_127 = arith.constant 1 : index
    %c2_128 = arith.constant 2 : index
    %c0_129 = arith.constant 0 : index
    %118 = vector.load %arg7[%c1_127, %c2_128, %c0_129] : memref<18x18x8xf32, #tpu.memory_space<vmem>>, vector<16x16x8xf32>
    %119 = vector.shape_cast %118 : vector<16x16x8xf32> to vector<256x8xf32>
    %120 = arith.truncf %119 : vector<256x8xf32> to vector<256x8xbf16>
    %c5_130 = arith.constant 5 : index
    %c0_131 = arith.constant 0 : index
    %c0_132 = arith.constant 0 : index
    %121 = vector.load %arg4[%c5_130, %c0_131, %c0_132] : memref<9x8x8xbf16, #tpu.memory_space<vmem>>, vector<1x8x8xbf16>
    %122 = vector.shape_cast %121 : vector<1x8x8xbf16> to vector<8x8xbf16>
    %cst_133 = arith.constant dense<0.000000e+00> : vector<256x8xf32>
    %123 = tpu.matmul %120, %122, %cst_133 {dimension_numbers = #tpu.dot_dimension_numbers<[1], [0], [0], [1], [0, 0, 1, 1], [], []>} : vector<256x8xbf16>, vector<8x8xbf16>, vector<256x8xf32> -> vector<256x8xf32>
    %124 = arith.addf %117, %123 : vector<256x8xf32>
    %c2_134 = arith.constant 2 : index
    %c0_135 = arith.constant 0 : index
    %c0_136 = arith.constant 0 : index
    %125 = vector.load %arg7[%c2_134, %c0_135, %c0_136] : memref<18x18x8xf32, #tpu.memory_space<vmem>>, vector<16x16x8xf32>
    %126 = vector.shape_cast %125 : vector<16x16x8xf32> to vector<256x8xf32>
    %127 = arith.truncf %126 : vector<256x8xf32> to vector<256x8xbf16>
    %c6_137 = arith.constant 6 : index
    %c0_138 = arith.constant 0 : index
    %c0_139 = arith.constant 0 : index
    %128 = vector.load %arg4[%c6_137, %c0_138, %c0_139] : memref<9x8x8xbf16, #tpu.memory_space<vmem>>, vector<1x8x8xbf16>
    %129 = vector.shape_cast %128 : vector<1x8x8xbf16> to vector<8x8xbf16>
    %cst_140 = arith.constant dense<0.000000e+00> : vector<256x8xf32>
    %130 = tpu.matmul %127, %129, %cst_140 {dimension_numbers = #tpu.dot_dimension_numbers<[1], [0], [0], [1], [0, 0, 1, 1], [], []>} : vector<256x8xbf16>, vector<8x8xbf16>, vector<256x8xf32> -> vector<256x8xf32>
    %131 = arith.addf %124, %130 : vector<256x8xf32>
    %c2_141 = arith.constant 2 : index
    %c1_142 = arith.constant 1 : index
    %c0_143 = arith.constant 0 : index
    %132 = vector.load %arg7[%c2_141, %c1_142, %c0_143] : memref<18x18x8xf32, #tpu.memory_space<vmem>>, vector<16x16x8xf32>
    %133 = vector.shape_cast %132 : vector<16x16x8xf32> to vector<256x8xf32>
    %134 = arith.truncf %133 : vector<256x8xf32> to vector<256x8xbf16>
    %c7_144 = arith.constant 7 : index
    %c0_145 = arith.constant 0 : index
    %c0_146 = arith.constant 0 : index
    %135 = vector.load %arg4[%c7_144, %c0_145, %c0_146] : memref<9x8x8xbf16, #tpu.memory_space<vmem>>, vector<1x8x8xbf16>
    %136 = vector.shape_cast %135 : vector<1x8x8xbf16> to vector<8x8xbf16>
    %cst_147 = arith.constant dense<0.000000e+00> : vector<256x8xf32>
    %137 = tpu.matmul %134, %136, %cst_147 {dimension_numbers = #tpu.dot_dimension_numbers<[1], [0], [0], [1], [0, 0, 1, 1], [], []>} : vector<256x8xbf16>, vector<8x8xbf16>, vector<256x8xf32> -> vector<256x8xf32>
    %138 = arith.addf %131, %137 : vector<256x8xf32>
    %c2_148 = arith.constant 2 : index
    %c2_149 = arith.constant 2 : index
    %c0_150 = arith.constant 0 : index
    %139 = vector.load %arg7[%c2_148, %c2_149, %c0_150] : memref<18x18x8xf32, #tpu.memory_space<vmem>>, vector<16x16x8xf32>
    %140 = vector.shape_cast %139 : vector<16x16x8xf32> to vector<256x8xf32>
    %141 = arith.truncf %140 : vector<256x8xf32> to vector<256x8xbf16>
    %c8_151 = arith.constant 8 : index
    %c0_152 = arith.constant 0 : index
    %c0_153 = arith.constant 0 : index
    %142 = vector.load %arg4[%c8_151, %c0_152, %c0_153] : memref<9x8x8xbf16, #tpu.memory_space<vmem>>, vector<1x8x8xbf16>
    %143 = vector.shape_cast %142 : vector<1x8x8xbf16> to vector<8x8xbf16>
    %cst_154 = arith.constant dense<0.000000e+00> : vector<256x8xf32>
    %144 = tpu.matmul %141, %143, %cst_154 {dimension_numbers = #tpu.dot_dimension_numbers<[1], [0], [0], [1], [0, 0, 1, 1], [], []>} : vector<256x8xbf16>, vector<8x8xbf16>, vector<256x8xf32> -> vector<256x8xf32>
    %145 = arith.addf %138, %144 : vector<256x8xf32>
    %c0_155 = arith.constant 0 : index
    %c0_156 = arith.constant 0 : index
    %146 = vector.load %arg5[%c0_155, %c0_156] : memref<1x8xf32, #tpu.memory_space<vmem>>, vector<1x8xf32>
    %147 = vector.broadcast %146 : vector<1x8xf32> to vector<256x8xf32>
    %148 = arith.addf %145, %147 : vector<256x8xf32>
    %c0_157 = arith.constant 0 : index
    %c0_158 = arith.constant 0 : index
    %c0_159 = arith.constant 0 : index
    %c1_160 = arith.constant 1 : index
    %c1_161 = arith.constant 1 : index
    %c0_162 = arith.constant 0 : index
    %149 = vector.load %arg1[%c0_157, %c0_158, %c0_159, %c1_160, %c1_161, %c0_162] : memref<1x1x1x18x18x8xf32, #tpu.memory_space<vmem>>, vector<1x1x1x16x16x8xf32>
    %150 = vector.shape_cast %149 : vector<1x1x1x16x16x8xf32> to vector<16x16x8xf32>
    %151 = vector.shape_cast %150 : vector<16x16x8xf32> to vector<256x8xf32>
    %152 = arith.addf %148, %151 : vector<256x8xf32>
    %cst_163 = arith.constant 0.000000e+00 : f32
    %153 = vector.broadcast %cst_163 : f32 to vector<256x8xf32>
    %154 = arith.maximumf %152, %153 : vector<256x8xf32>
    %155 = vector.shape_cast %154 : vector<256x8xf32> to vector<16x16x8xf32>
    %c0_164 = arith.constant 0 : index
    %c0_165 = arith.constant 0 : index
    %c0_166 = arith.constant 0 : index
    %c0_167 = arith.constant 0 : index
    %156 = vector.load %arg6[%c0_164, %c0_165, %c0_166, %c0_167] : memref<1x16x16x8xf32, #tpu.memory_space<vmem>>, vector<1x16x16x8xf32>
    %157 = vector.shape_cast %156 : vector<1x16x16x8xf32> to vector<16x16x8xf32>
    %158 = vector.shape_cast %155 : vector<16x16x8xf32> to vector<1x16x16x8xf32>
    tpu.vector_store %arg6[%c0_164, %c0_165, %c0_166, %c0_167], %158 {strides = array<i32>} : memref<1x16x16x8xf32, #tpu.memory_space<vmem>>, vector<1x16x16x8xf32>,
    return
  }
  func.func @transform_0(%arg0: i32) -> (i32, i32, i32, i32, i32, i32) {
    %c0_i32 = arith.constant 0 : i32
    %c0_i32_0 = arith.constant 0 : i32
    %c0_i32_1 = arith.constant 0 : i32
    %c0_i32_2 = arith.constant 0 : i32
    %c0_i32_3 = arith.constant 0 : i32
    %c0_i32_4 = arith.constant 0 : i32
    return %arg0, %c0_i32, %c0_i32_0, %c0_i32_1, %c0_i32_2, %c0_i32_3 : i32, i32, i32, i32, i32, i32
  }
  func.func @transform_1(%arg0: i32) -> (i32, i32, i32) {
    %c0_i32 = arith.constant 0 : i32
    %c0_i32_0 = arith.constant 0 : i32
    %c0_i32_1 = arith.constant 0 : i32
    %c0_i32_2 = arith.constant 0 : i32
    return %c0_i32, %c0_i32_0, %c0_i32_1 : i32, i32, i32
  }
  func.func @transform_2(%arg0: i32) -> (i32, i32) {
    %c0_i32 = arith.constant 0 : i32
    %c0_i32_0 = arith.constant 0 : i32
    %c0_i32_1 = arith.constant 0 : i32
    return %c0_i32, %c0_i32_0 : i32, i32
  }
  func.func @transform_3(%arg0: i32) -> (i32, i32, i32) {
    %c0_i32 = arith.constant 0 : i32
    %c0_i32_0 = arith.constant 0 : i32
    %c0_i32_1 = arith.constant 0 : i32
    %c0_i32_2 = arith.constant 0 : i32
    return %c0_i32, %c0_i32_0, %c0_i32_1 : i32, i32, i32
  }
  func.func @transform_4(%arg0: i32) -> (i32, i32) {
    %c0_i32 = arith.constant 0 : i32
    %c0_i32_0 = arith.constant 0 : i32
    %c0_i32_1 = arith.constant 0 : i32
    return %c0_i32, %c0_i32_0 : i32, i32
  }
  func.func @transform_5(%arg0: i32) -> (i32, i32, i32, i32) {
    %c0_i32 = arith.constant 0 : i32
    %c0_i32_0 = arith.constant 0 : i32
    %c0_i32_1 = arith.constant 0 : i32
    %c0_i32_2 = arith.constant 0 : i32
    return %arg0, %c0_i32, %c0_i32_0, %c0_i32_1 : i32, i32, i32, i32
  }
}

</mosaic_0001>

<bundles_post_ra>
// kernel: tpu_custom_call.1
= control target key start
LH: loop header
LB: loop body
LE: loop exit
PB: predicated region body
PF: predicated region fallthrough
CT: control target
= control target key end

     0   :  { %s7300_s18 = smov 0   ;;  %s9673_s0 = inlined_call_operand.vmem [shape: f32[2,1,1,18,18,8], index: 0, kind: input, shape index: {}]   ;;  %s9674_s1 = inlined_call_operand.vmem [shape: bf16[9,8,8], index: 1, kind: input, shape index: {}]   ;;  %s9675_s2 = inlined_call_operand.vmem [shape: f32[1,8], index: 2, kind: input, shape index: {}]   ;;  %s9676_s3 = inlined_call_operand.vmem [shape: bf16[9,8,8], index: 3, kind: input, shape index: {}]   ;;  %s9677_s4 = inlined_call_operand.vmem [shape: f32[1,8], index: 4, kind: input, shape index: {}]   ;;  %s9678_s5 = inlined_call_operand.vmem [shape: f32[2,16,16,8], index: 5, kind: output, shape index: {}]  }
   0x1 LB: > { %s5774_s19 = sadd.s32 4294967295, %s7267_s18   ;;  %p5778_p0 = scmp.ge.s32.totalorder %s7267_s18, 1  ;;  %s7267_s18 = sphi %s7300_s18, %s15_s18  }
   0x2   : > { %p187_p1 = scmp.lt.s32.totalorder %s7267_s18, 3 }
   0x4   : > { %p188_p2 = pnand %p5778_p0, %p187_p1 }
   0x6   : > { %191 = sbr.rel (%p188_p2) target bundleno = 1013 (0x3f5), region = 40 }
   0xb   : > { %v5782_v0 = vld [vmem:[%s9674_s1 + $0x4] sm:$0xf]  ;;  %vm374_vm0 = vcmask 1043456   ;;  %v274_v1 = vld [vmem:[%s9674_s1] sm:$0xf]  ;;  %p215_p3 = scmp.lt.s32.totalorder %s5774_s19, 1 }
   0xc   : > { %7233 = vmatprep.subr.msk.bf16.mxu0 %vm374_vm0, %v5782_v0  ;;  %v376_v2 = vsel %vm374_vm0, %v5782_v0, 0  ;;  %7234 = vmatprep.subr.msk.bf16.mxu1 %vm374_vm0, %v274_v1  ;;  %v588_v3 = vsel %vm374_vm0, %v274_v1, 0  ;;  %v5815_v4 = vld [vmem:[%s9674_s1 + $0x8] sm:$0xf]  ;;  %v5864_v5 = vld [vmem:[%s9674_s1 + $0xc] sm:$0xf] }
   0xd   : > { %6622 = vmatpush3.bf16.msra.mxu0 %v376_v2  ;;  %6656 = vmatpush3.bf16.msra.mxu1 %v588_v3  ;;  %s9952_s19 = smov (!%p215_p3, %s5774_s19), 1  ;;  %vm325_vm1 = vcmask 64512   ;;  %v850_v17 = vsel %vm374_vm0, %v5815_v4, 0  ;;  %v1145_v25 = vsel %vm374_vm0, %v5864_v5, 0  ;;  %v7363_v26 = vld [vmem:[%s9674_s1 + $0x10] sm:$0xf] }
   0xe   : > { %7235 = vmatprep.subr.msk.bf16.mxu0 %vm374_vm0, %v5815_v4  ;;  %7236 = vmatprep.subr.msk.bf16.mxu1 %vm374_vm0, %v5864_v5  ;;  %s7251_s28 = smul.u32 432, %s9952_s19  ;;  %v7368_v27 = vld [vmem:[%s9674_s1 + $0x14] sm:$0xf]  ;;  %vm2884_vm2 = vcmask 58368   ;;  %s6314_s17 = sshll.u32 %s9952_s19, 8 }
   0xf   : > { %s9434_s21 = scalar_lea.vmem %s9678_s5, %s6314_s17 }
  0x10   : > { %s7332_s6 = scalar_lea.vmem %s9673_s0, %s7251_s28 }
  0x11   : > { %v275_v6 = vld [vmem:[%s7332_s6 + $0x1] sm:$0xff]  ;;  %v276_v7 = vld [vmem:[%s7332_s6 + $0x9] sm:$0xff]  ;;  %v277_v11 = vld [vmem:[%s7332_s6 + $0x19] sm:$0xff] }
  0x12   : > { %v226_v8 = vld [vmem:[%s7332_s6] sm:$0xff]  ;;  %v307_v9 = vpack.c.bf16 %v276_v7, %v275_v6  ;;  %v227_v10 = vld [vmem:[%s7332_s6 + $0x8] sm:$0xff]  ;;  %v228_v15 = vld [vmem:[%s7332_s6 + $0x18] sm:$0xff] }
  0x13   : > { %v278_v12 = vld [vmem:[%s7332_s6 + $0x21] sm:$0xff]  ;;  %v258_v13 = vpack.c.bf16 %v227_v10, %v226_v8  ;;  %v279_v18 = vld [vmem:[%s7332_s6 + $0x31] sm:$0xff]  ;;  %v280_v20 = vld [vmem:[%s7332_s6 + $0x39] sm:$0xff] }
  0x14   : > { %v7340_v14 = vpack.c.bf16 %v278_v12, %v277_v11  ;;  %v229_v16 = vld [vmem:[%s7332_s6 + $0x20] sm:$0xff]  ;;  %6623 = vmatprep.mubr.msk.bf16.mxu0 %vm325_vm1, %v307_v9  ;;  %v230_v21 = vld [vmem:[%s7332_s6 + $0x30] sm:$0xff]  ;;  %v231_v22 = vld [vmem:[%s7332_s6 + $0x38] sm:$0xff]  ;;  %v7355_v23 = vpack.c.bf16 %v280_v20, %v279_v18 }
  0x15   : > { %v7347_v19 = vpack.c.bf16 %v229_v16, %v228_v15  ;;  %6657 = vmatprep.mubr.msk.bf16.mxu1 %vm325_vm1, %v258_v13  ;;  %v7357_v24 = vpack.c.bf16 %v231_v22, %v230_v21  ;;  %v281_v28 = vld [vmem:[%s7332_s6 + $0x49] sm:$0xff]  ;;  %v282_v29 = vld [vmem:[%s7332_s6 + $0x51] sm:$0xff]  ;;  %v283_v32 = vld [vmem:[%s7332_s6 + $0x61] sm:$0xff] }
  0x16   : > { %6624 = vmatmul.mubr.msk.bf16.vlgmr.msra.gmra.mxu0 %vm325_vm1, %v7340_v14  ;;  %v232_v30 = vld [vmem:[%s7332_s6 + $0x48] sm:$0xff]  ;;  %v233_v31 = vld [vmem:[%s7332_s6 + $0x50] sm:$0xff]  ;;  %v234_v34 = vld [vmem:[%s7332_s6 + $0x60] sm:$0xff]  ;;  %v7386_v36 = vpack.c.bf16 %v282_v29, %v281_v28 }
  0x17   : > { %6658 = vmatmul.mubr.msk.bf16.vlgmr.msra.gmra.mxu1 %vm325_vm1, %v7347_v19  ;;  %6690 = vmatpush3.bf16.msra.mxu0 %v850_v17  ;;  %v284_v33 = vld [vmem:[%s7332_s6 + $0x69] sm:$0xff]  ;;  %v7390_v37 = vpack.c.bf16 %v233_v31, %v232_v30  ;;  %v285_v40 = vld [vmem:[%s7332_s6 + $0x79] sm:$0xff]  ;;  %v286_v41 = vld [vmem:[%s7332_s6 + $0x81] sm:$0xff] }
  0x18   : > { %6627 = vmatprep.mubr.msk.bf16.mxu0 %vm325_vm1, %v7355_v23  ;;  %6661 = vmatprep.mubr.msk.bf16.mxu1 %vm325_vm1, %v7357_v24  ;;  %v235_v35 = vld [vmem:[%s7332_s6 + $0x68] sm:$0xff]  ;;  %v7392_v38 = vpack.c.bf16 %v284_v33, %v283_v32  ;;  %v236_v42 = vld [vmem:[%s7332_s6 + $0x78] sm:$0xff]  ;;  %v237_v43 = vld [vmem:[%s7332_s6 + $0x80] sm:$0xff]  ;;  %v7412_v48 = vpack.c.bf16 %v286_v41, %v285_v40 }
  0x19   : > { %6724 = vmatpush3.bf16.msra.mxu1 %v1145_v25  ;;  %7237 = vmatprep.subr.msk.bf16.mxu0 %vm374_vm0, %v7363_v26  ;;  %v7394_v39 = vpack.c.bf16 %v235_v35, %v234_v34  ;;  %v287_v44 = vld [vmem:[%s7332_s6 + $0x91] sm:$0xff]  ;;  %v288_v45 = vld [vmem:[%s7332_s6 + $0x99] sm:$0xff]  ;;  %v7414_v49 = vpack.c.bf16 %v237_v43, %v236_v42  ;;  %v289_v52 = vld [vmem:[%s7332_s6 + $0xa9] sm:$0xff] }
  0x1a   : > { %7238 = vmatprep.subr.msk.bf16.mxu1 %vm374_vm0, %v7368_v27  ;;  %v238_v46 = vld [vmem:[%s7332_s6 + $0x90] sm:$0xff]  ;;  %v239_v47 = vld [vmem:[%s7332_s6 + $0x98] sm:$0xff]  ;;  %v7416_v50 = vpack.c.bf16 %v288_v45, %v287_v44  ;;  %v240_v54 = vld [vmem:[%s7332_s6 + $0xa8] sm:$0xff] }
  0x1b   : > { %v7418_v51 = vpack.c.bf16 %v239_v47, %v238_v46  ;;  %v290_v53 = vld [vmem:[%s7332_s6 + $0xb1] sm:$0xff]  ;;  %v291_v56 = vld [vmem:[%s7332_s6 + $0xc1] sm:$0xff]  ;;  %v292_v57 = vld [vmem:[%s7332_s6 + $0xc9] sm:$0xff] }
  0x1c   : > { %v241_v55 = vld [vmem:[%s7332_s6 + $0xb0] sm:$0xff]  ;;  %v242_v58 = vld [vmem:[%s7332_s6 + $0xc0] sm:$0xff]  ;;  %v243_v59 = vld [vmem:[%s7332_s6 + $0xc8] sm:$0xff]  ;;  %v7436_v60 = vpack.c.bf16 %v290_v53, %v289_v52  ;;  %v7440_v62 = vpack.c.bf16 %v292_v57, %v291_v56 }
  0x1d   : > { %v7438_v61 = vpack.c.bf16 %v241_v55, %v240_v54  ;;  %v7442_v63 = vpack.c.bf16 %v243_v59, %v242_v58  ;;  %v293_v0 = vld [vmem:[%s7332_s6 + $0xd9] sm:$0xff]  ;;  %v294_v1 = vld [vmem:[%s7332_s6 + $0xe1] sm:$0xff]  ;;  %v295_v4 = vld [vmem:[%s7332_s6 + $0xf1] sm:$0xff] }
  0x1e   : > { %6628 = vmatmul.mubr.msk.bf16.gmra.mxu0 %vm325_vm1, %v7386_v36  ;;  %v244_v2 = vld [vmem:[%s7332_s6 + $0xd8] sm:$0xff]  ;;  %v245_v3 = vld [vmem:[%s7332_s6 + $0xe0] sm:$0xff]  ;;  %v246_v6 = vld [vmem:[%s7332_s6 + $0xf0] sm:$0xff]  ;;  %v7460_v8 = vpack.c.bf16 %v294_v1, %v293_v0 }
  0x1f   : > { %6662 = vmatmul.mubr.msk.bf16.gmra.mxu1 %vm325_vm1, %v7390_v37  ;;  %6631 = vmatprep.mubr.msk.bf16.mxu0 %vm325_vm1, %v7392_v38  ;;  %v296_v5 = vld [vmem:[%s7332_s6 + $0xf9] sm:$0xff]  ;;  %v7462_v9 = vpack.c.bf16 %v245_v3, %v244_v2  ;;  %v297_v12 = vld [vmem:[%s7332_s6 + $0x109] sm:$0xff]  ;;  %v298_v13 = vld [vmem:[%s7332_s6 + $0x111] sm:$0xff] }
  0x20   : > { %6665 = vmatprep.mubr.msk.bf16.mxu1 %vm325_vm1, %v7394_v39  ;;  %v247_v7 = vld [vmem:[%s7332_s6 + $0xf8] sm:$0xff]  ;;  %v7464_v10 = vpack.c.bf16 %v296_v5, %v295_v4  ;;  %v248_v15 = vld [vmem:[%s7332_s6 + $0x108] sm:$0xff]  ;;  %v249_v16 = vld [vmem:[%s7332_s6 + $0x110] sm:$0xff]  ;;  %v7484_v22 = vpack.c.bf16 %v298_v13, %v297_v12  ;;  %v1439_v4 = vsel %vm374_vm0, %v7363_v26, 0 }
  0x21   : > { %v7466_v11 = vpack.c.bf16 %v247_v7, %v246_v6  ;;  %v299_v17 = vld [vmem:[%s7332_s6 + $0x121] sm:$0xff]  ;;  %v300_v18 = vld [vmem:[%s7332_s6 + $0x129] sm:$0xff]  ;;  %v7486_v25 = vpack.c.bf16 %v249_v16, %v248_v15  ;;  %v301_v30 = vld [vmem:[%s7332_s6 + $0x139] sm:$0xff]  ;;  %v1733_v6 = vsel %vm374_vm0, %v7368_v27, 0 }
  0x22   : > { %v250_v20 = vld [vmem:[%s7332_s6 + $0x120] sm:$0xff]  ;;  %v251_v21 = vld [vmem:[%s7332_s6 + $0x128] sm:$0xff]  ;;  %v7488_v28 = vpack.c.bf16 %v300_v18, %v299_v17  ;;  %v252_v32 = vld [vmem:[%s7332_s6 + $0x138] sm:$0xff] }
  0x23   : > { %v7490_v29 = vpack.c.bf16 %v251_v21, %v250_v20  ;;  %v302_v31 = vld [vmem:[%s7332_s6 + $0x141] sm:$0xff]  ;;  %v303_v34 = vld [vmem:[%s7332_s6 + $0x151] sm:$0xff]  ;;  %v304_v35 = vld [vmem:[%s7332_s6 + $0x159] sm:$0xff] }
  0x24   : > { %v253_v33 = vld [vmem:[%s7332_s6 + $0x140] sm:$0xff]  ;;  %v254_v40 = vld [vmem:[%s7332_s6 + $0x150] sm:$0xff]  ;;  %v255_v41 = vld [vmem:[%s7332_s6 + $0x158] sm:$0xff]  ;;  %v7508_v42 = vpack.c.bf16 %v302_v31, %v301_v30  ;;  %v7512_v44 = vpack.c.bf16 %v304_v35, %v303_v34 }
  0x25   : > { %v7510_v43 = vpack.c.bf16 %v253_v33, %v252_v32  ;;  %v7514_v45 = vpack.c.bf16 %v255_v41, %v254_v40  ;;  %v305_v46 = vld [vmem:[%s7332_s6 + $0x169] sm:$0xff]  ;;  %v306_v47 = vld [vmem:[%s7332_s6 + $0x171] sm:$0xff]  ;;  %v753_v59 = vld [vmem:[%s7332_s6 + $0x1a] sm:$0xff] }
  0x26   : > { %6632 = vmatmul.mubr.msk.bf16.gmra.mxu0 %vm325_vm1, %v7412_v48  ;;  %v256_v52 = vld [vmem:[%s7332_s6 + $0x168] sm:$0xff]  ;;  %v257_v53 = vld [vmem:[%s7332_s6 + $0x170] sm:$0xff]  ;;  %v7530_v56 = vpack.c.bf16 %v306_v47, %v305_v46  ;;  %v756_v2 = vld [vmem:[%s7332_s6 + $0x3a] sm:$0xff] }
  0x27   : > { %6666 = vmatmul.mubr.msk.bf16.gmra.mxu1 %vm325_vm1, %v7414_v49  ;;  %6635 = vmatprep.mubr.msk.bf16.mxu0 %vm325_vm1, %v7416_v50  ;;  %v751_v54 = vld [vmem:[%s7332_s6 + $0x2] sm:$0xff]  ;;  %v752_v55 = vld [vmem:[%s7332_s6 + $0xa] sm:$0xff]  ;;  %v7532_v57 = vpack.c.bf16 %v257_v53, %v256_v52  ;;  %v755_v1 = vld [vmem:[%s7332_s6 + $0x32] sm:$0xff] }
  0x28   : > { %6669 = vmatprep.mubr.msk.bf16.mxu1 %vm325_vm1, %v7418_v51  ;;  %v783_v58 = vpack.c.bf16 %v752_v55, %v751_v54  ;;  %v754_v0 = vld [vmem:[%s7332_s6 + $0x22] sm:$0xff]  ;;  %v7549_v5 = vpack.c.bf16 %v756_v2, %v755_v1  ;;  %v757_v7 = vld [vmem:[%s7332_s6 + $0x4a] sm:$0xff]  ;;  %v758_v26 = vld [vmem:[%s7332_s6 + $0x52] sm:$0xff] }
  0x29   : > { %v7545_v3 = vpack.c.bf16 %v754_v0, %v753_v59  ;;  %v7567_v12 = vld [vmem:[%s9674_s1 + $0x1c] sm:$0xf]  ;;  %v759_v27 = vld [vmem:[%s7332_s6 + $0x62] sm:$0xff]  ;;  %v760_v13 = vld [vmem:[%s7332_s6 + $0x6a] sm:$0xff]  ;;  %v7577_v15 = vpack.c.bf16 %v758_v26, %v757_v7 }
  0x2a   : > { %v7581_v16 = vpack.c.bf16 %v760_v13, %v759_v27  ;;  %v761_v17 = vld [vmem:[%s7332_s6 + $0x7a] sm:$0xff]  ;;  %v762_v18 = vld [vmem:[%s7332_s6 + $0x82] sm:$0xff]  ;;  %v763_v20 = vld [vmem:[%s7332_s6 + $0x92] sm:$0xff] }
  0x2b   : > { %v764_v21 = vld [vmem:[%s7332_s6 + $0x9a] sm:$0xff]  ;;  %v7595_v30 = vpack.c.bf16 %v762_v18, %v761_v17  ;;  %v765_v32 = vld [vmem:[%s7332_s6 + $0xaa] sm:$0xff]  ;;  %v766_v33 = vld [vmem:[%s7332_s6 + $0xb2] sm:$0xff] }
  0x2c   : > { %v7597_v31 = vpack.c.bf16 %v764_v21, %v763_v20  ;;  %v767_v34 = vld [vmem:[%s7332_s6 + $0xc2] sm:$0xff]  ;;  %v768_v35 = vld [vmem:[%s7332_s6 + $0xca] sm:$0xff]  ;;  %v7611_v40 = vpack.c.bf16 %v766_v33, %v765_v32  ;;  %v769_v46 = vld [vmem:[%s7332_s6 + $0xda] sm:$0xff] }
  0x2d   : > { %v7613_v41 = vpack.c.bf16 %v768_v35, %v767_v34  ;;  %v770_v47 = vld [vmem:[%s7332_s6 + $0xe2] sm:$0xff]  ;;  %v771_v52 = vld [vmem:[%s7332_s6 + $0xf2] sm:$0xff]  ;;  %v772_v53 = vld [vmem:[%s7332_s6 + $0xfa] sm:$0xff] }
  0x2e   : > { %6636 = vmatmul.mubr.msk.bf16.gmra.mxu0 %vm325_vm1, %v7436_v60  ;;  %v7627_v54 = vpack.c.bf16 %v770_v47, %v769_v46  ;;  %v7629_v55 = vpack.c.bf16 %v772_v53, %v771_v52  ;;  %v774_v59 = vld [vmem:[%s7332_s6 + $0x112] sm:$0xff]  ;;  %v775_v0 = vld [vmem:[%s7332_s6 + $0x122] sm:$0xff]  ;;  %v776_v1 = vld [vmem:[%s7332_s6 + $0x12a] sm:$0xff]  ;;  %v2322_v46 = vsel %vm374_vm0, %v7567_v12, 0 }
  0x2f   : > { %6670 = vmatmul.mubr.msk.bf16.gmra.mxu1 %vm325_vm1, %v7438_v61  ;;  %6639 = vmatprep.mubr.msk.bf16.mxu0 %vm325_vm1, %v7440_v62  ;;  %v778_v7 = vld [vmem:[%s7332_s6 + $0x142] sm:$0xff]  ;;  %v779_v26 = vld [vmem:[%s7332_s6 + $0x152] sm:$0xff]  ;;  %v780_v27 = vld [vmem:[%s7332_s6 + $0x15a] sm:$0xff] }
  0x30   : > { %6673 = vmatprep.mubr.msk.bf16.mxu1 %vm325_vm1, %v7442_v63  ;;  %v797_v17 = vpack.c.bf16 %v780_v27, %v779_v26  ;;  %v781_v18 = vld [vmem:[%s7332_s6 + $0x16a] sm:$0xff]  ;;  %v782_v20 = vld [vmem:[%s7332_s6 + $0x172] sm:$0xff]  ;;  %v5862_v21 = vld [vmem:[%s7332_s6 + $0x180] sm:$0xff] }
  0x31   : > { %v5863_v32 = vld [vmem:[%s7332_s6 + $0x188] sm:$0xff]  ;;  %v798_v33 = vpack.c.bf16 %v782_v20, %v781_v18  ;;  %v6109_v47 = vld [vmem:[%s9674_s1 + $0x20] sm:$0xf] }
  0x32   : > { %v7663_v34 = vpack.c.bf16 %v5863_v32, %v5862_v21 }
  0x36   : > { %6640 = vmatmul.mubr.msk.bf16.gmra.mxu0 %vm325_vm1, %v7460_v8 }
  0x37   : > { %6674 = vmatmul.mubr.msk.bf16.gmra.mxu1 %vm325_vm1, %v7462_v9  ;;  %6643 = vmatprep.mubr.msk.bf16.mxu0 %vm325_vm1, %v7464_v10 }
  0x38   : > { %6677 = vmatprep.mubr.msk.bf16.mxu1 %vm325_vm1, %v7466_v11 }
  0x3e   : > { %6644 = vmatmul.mubr.msk.bf16.gmra.mxu0 %vm325_vm1, %v7484_v22 }
  0x3f   : > { %6678 = vmatmul.mubr.msk.bf16.gmra.mxu1 %vm325_vm1, %v7486_v25  ;;  %6647 = vmatprep.mubr.msk.bf16.mxu0 %vm325_vm1, %v7488_v28 }
  0x40   : > { %6681 = vmatprep.mubr.msk.bf16.mxu1 %vm325_vm1, %v7490_v29 }
  0x46   : > { %6648 = vmatmul.mubr.msk.bf16.gmra.mxu0 %vm325_vm1, %v7508_v42 }
  0x47   : > { %6682 = vmatmul.mubr.msk.bf16.gmra.mxu1 %vm325_vm1, %v7510_v43  ;;  %6651 = vmatprep.mubr.msk.bf16.mxu0 %vm325_vm1, %v7512_v44 }
  0x48   : > { %6685 = vmatprep.mubr.msk.bf16.mxu1 %vm325_vm1, %v7514_v45 }
  0x4e   : > { %6652 = vmatmul.mubr.msk.bf16.gmra.mxu0 %vm325_vm1, %v7530_v56 }
  0x4f   : > { %6686 = vmatmul.mubr.msk.bf16.gmra.mxu1 %vm325_vm1, %v7532_v57  ;;  %6691 = vmatprep.mubr.msk.bf16.mxu0 %vm325_vm1, %v783_v58  ;;  %v773_v58 = vld [vmem:[%s7332_s6 + $0x10a] sm:$0xff] }
  0x50   : > { %6725 = vmatprep.mubr.msk.bf16.mxu1 %vm325_vm1, %v7347_v19  ;;  %v7558_v19 = vld [vmem:[%s9674_s1 + $0x18] sm:$0xf]  ;;  %v794_v2 = vpack.c.bf16 %v774_v59, %v773_v58  ;;  %v2616_v58 = vsel %vm374_vm0, %v6109_v47, 0 }
  0x51   : > { %v2028_v35 = vsel %vm374_vm0, %v7558_v19, 0 }
  0x56   : > { %6692 = vmatmul.mubr.msk.bf16.vlgmr.msra.gmra.mxu0 %vm325_vm1, %v7545_v3 }
  0x57   : > { %6758 = vmatpush3.bf16.msra.mxu0 %v1439_v4  ;;  %6726 = vmatmul.mubr.msk.bf16.vlgmr.msra.gmra.mxu1 %vm325_vm1, %v7357_v24  ;;  %v795_v4 = vpack.c.bf16 %v776_v1, %v775_v0 }
  0x58   : > { %6695 = vmatprep.mubr.msk.bf16.mxu0 %vm325_vm1, %v7549_v5  ;;  %6729 = vmatprep.mubr.msk.bf16.mxu1 %vm325_vm1, %v7390_v37 }
  0x59   : > { %6792 = vmatpush3.bf16.msra.mxu1 %v1733_v6  ;;  %7239 = vmatprep.subr.msk.bf16.mxu0 %vm374_vm0, %v7558_v19  ;;  %v777_v6 = vld [vmem:[%s7332_s6 + $0x13a] sm:$0xff]  ;;  %v5960_v19 = vld [vmem:[%s7332_s6 + $0x182] sm:$0xff] }
  0x5a   : > { %7240 = vmatprep.subr.msk.bf16.mxu1 %vm374_vm0, %v7567_v12  ;;  %v796_v13 = vpack.c.bf16 %v778_v7, %v777_v6  ;;  %v5961_v12 = vld [vmem:[%s7332_s6 + $0x18a] sm:$0xff] }
  0x5b   : > { %v7737_v53 = vpack.c.bf16 %v5961_v12, %v5960_v19 }
  0x5e   : > { %6696 = vmatmul.mubr.msk.bf16.gmra.mxu0 %vm325_vm1, %v7577_v15 }
  0x5f   : > { %6730 = vmatmul.mubr.msk.bf16.gmra.mxu1 %vm325_vm1, %v7394_v39  ;;  %6699 = vmatprep.mubr.msk.bf16.mxu0 %vm325_vm1, %v7581_v16 }
  0x60   : > { %6733 = vmatprep.mubr.msk.bf16.mxu1 %vm325_vm1, %v7414_v49 }
  0x66   : > { %6700 = vmatmul.mubr.msk.bf16.gmra.mxu0 %vm325_vm1, %v7595_v30 }
  0x67   : > { %6734 = vmatmul.mubr.msk.bf16.gmra.mxu1 %vm325_vm1, %v7418_v51  ;;  %6703 = vmatprep.mubr.msk.bf16.mxu0 %vm325_vm1, %v7597_v31 }
  0x68   : > { %6737 = vmatprep.mubr.msk.bf16.mxu1 %vm325_vm1, %v7438_v61 }
  0x6e   : > { %6704 = vmatmul.mubr.msk.bf16.gmra.mxu0 %vm325_vm1, %v7611_v40 }
  0x6f   : > { %6738 = vmatmul.mubr.msk.bf16.gmra.mxu1 %vm325_vm1, %v7442_v63  ;;  %6707 = vmatprep.mubr.msk.bf16.mxu0 %vm325_vm1, %v7613_v41 }
  0x70   : > { %6741 = vmatprep.mubr.msk.bf16.mxu1 %vm325_vm1, %v7462_v9 }
  0x76   : > { %6708 = vmatmul.mubr.msk.bf16.gmra.mxu0 %vm325_vm1, %v7627_v54 }
  0x77   : > { %6742 = vmatmul.mubr.msk.bf16.gmra.mxu1 %vm325_vm1, %v7466_v11  ;;  %6711 = vmatprep.mubr.msk.bf16.mxu0 %vm325_vm1, %v7629_v55 }
  0x78   : > { %6745 = vmatprep.mubr.msk.bf16.mxu1 %vm325_vm1, %v7486_v25 }
  0x7e   : > { %6712 = vmatmul.mubr.msk.bf16.gmra.mxu0 %vm325_vm1, %v794_v2 }
  0x7f   : > { %6746 = vmatmul.mubr.msk.bf16.gmra.mxu1 %vm325_vm1, %v7490_v29  ;;  %6715 = vmatprep.mubr.msk.bf16.mxu0 %vm325_vm1, %v795_v4 }
  0x80   : > { %6749 = vmatprep.mubr.msk.bf16.mxu1 %vm325_vm1, %v7510_v43 }
  0x86   : > { %6716 = vmatmul.mubr.msk.bf16.gmra.mxu0 %vm325_vm1, %v796_v13 }
  0x87   : > { %6750 = vmatmul.mubr.msk.bf16.gmra.mxu1 %vm325_vm1, %v7514_v45  ;;  %6719 = vmatprep.mubr.msk.bf16.mxu0 %vm325_vm1, %v797_v17 }
  0x88   : > { %6753 = vmatprep.mubr.msk.bf16.mxu1 %vm325_vm1, %v7532_v57 }
  0x8e   : > { %6720 = vmatmul.mubr.msk.bf16.gmra.mxu0 %vm325_vm1, %v798_v33 }
  0x8f   : > { %6754 = vmatmul.mubr.msk.bf16.gmra.mxu1 %vm325_vm1, %v7663_v34  ;;  %6759 = vmatprep.mubr.msk.bf16.mxu0 %vm325_vm1, %v7340_v14  ;;  %v5911_v14 = vld [vmem:[%s7332_s6 + $0x181] sm:$0xff] }
  0x90   : > { %6793 = vmatprep.mubr.msk.bf16.mxu1 %vm325_vm1, %v7545_v3  ;;  %v5912_v3 = vld [vmem:[%s7332_s6 + $0x189] sm:$0xff] }
  0x91   : > { %v7735_v52 = vpack.c.bf16 %v5912_v3, %v5911_v14 }
  0x96   : > { %6760 = vmatmul.mubr.msk.bf16.vlgmr.msra.gmra.mxu0 %vm325_vm1, %v7355_v23 }
  0x97   : > { %6826 = vmatpush3.bf16.msra.mxu0 %v2028_v35  ;;  %6794 = vmatmul.mubr.msk.bf16.vlgmr.msra.gmra.mxu1 %vm325_vm1, %v7549_v5 }
  0x98   : > { %6763 = vmatprep.mubr.msk.bf16.mxu0 %vm325_vm1, %v7386_v36  ;;  %6797 = vmatprep.mubr.msk.bf16.mxu1 %vm325_vm1, %v7577_v15 }
  0x99   : > { %6860 = vmatpush3.bf16.msra.mxu1 %v2322_v46  ;;  %7241 = vmatprep.subr.msk.bf16.mxu0 %vm374_vm0, %v6109_v47 }
  0x9e   : > { %6764 = vmatmul.mubr.msk.bf16.gmra.mxu0 %vm325_vm1, %v7392_v38 }
  0x9f   : > { %6798 = vmatmul.mubr.msk.bf16.gmra.mxu1 %vm325_vm1, %v7581_v16  ;;  %6767 = vmatprep.mubr.msk.bf16.mxu0 %vm325_vm1, %v7412_v48 }
  0xa0   : > { %6801 = vmatprep.mubr.msk.bf16.mxu1 %vm325_vm1, %v7595_v30 }
  0xa6   : > { %6768 = vmatmul.mubr.msk.bf16.gmra.mxu0 %vm325_vm1, %v7416_v50 }
  0xa7   : > { %6802 = vmatmul.mubr.msk.bf16.gmra.mxu1 %vm325_vm1, %v7597_v31  ;;  %6771 = vmatprep.mubr.msk.bf16.mxu0 %vm325_vm1, %v7436_v60 }
  0xa8   : > { %6805 = vmatprep.mubr.msk.bf16.mxu1 %vm325_vm1, %v7611_v40 }
  0xae   : > { %6772 = vmatmul.mubr.msk.bf16.gmra.mxu0 %vm325_vm1, %v7440_v62 }
  0xaf   : > { %6806 = vmatmul.mubr.msk.bf16.gmra.mxu1 %vm325_vm1, %v7613_v41  ;;  %6775 = vmatprep.mubr.msk.bf16.mxu0 %vm325_vm1, %v7460_v8 }
  0xb0   : > { %6809 = vmatprep.mubr.msk.bf16.mxu1 %vm325_vm1, %v7627_v54 }
  0xb6   : > { %6776 = vmatmul.mubr.msk.bf16.gmra.mxu0 %vm325_vm1, %v7464_v10 }
  0xb7   : > { %6810 = vmatmul.mubr.msk.bf16.gmra.mxu1 %vm325_vm1, %v7629_v55  ;;  %6779 = vmatprep.mubr.msk.bf16.mxu0 %vm325_vm1, %v7484_v22 }
  0xb8   : > { %6813 = vmatprep.mubr.msk.bf16.mxu1 %vm325_vm1, %v794_v2 }
  0xbe   : > { %6780 = vmatmul.mubr.msk.bf16.gmra.mxu0 %vm325_vm1, %v7488_v28 }
  0xbf   : > { %6814 = vmatmul.mubr.msk.bf16.gmra.mxu1 %vm325_vm1, %v795_v4  ;;  %6783 = vmatprep.mubr.msk.bf16.mxu0 %vm325_vm1, %v7508_v42 }
  0xc0   : > { %6817 = vmatprep.mubr.msk.bf16.mxu1 %vm325_vm1, %v796_v13 }
  0xc6   : > { %6784 = vmatmul.mubr.msk.bf16.gmra.mxu0 %vm325_vm1, %v7512_v44 }
  0xc7   : > { %6818 = vmatmul.mubr.msk.bf16.gmra.mxu1 %vm325_vm1, %v797_v17  ;;  %6787 = vmatprep.mubr.msk.bf16.mxu0 %vm325_vm1, %v7530_v56 }
  0xc8   : > { %6821 = vmatprep.mubr.msk.bf16.mxu1 %vm325_vm1, %v798_v33 }
  0xce   : > { %6788 = vmatmul.mubr.msk.bf16.gmra.mxu0 %vm325_vm1, %v7735_v52 }
  0xcf   : > { %6822 = vmatmul.mubr.msk.bf16.gmra.mxu1 %vm325_vm1, %v7737_v53  ;;  %6827 = vmatprep.mubr.msk.bf16.mxu0 %vm325_vm1, %v7357_v24 }
  0xd0   : > { %6861 = vmatprep.mubr.msk.bf16.mxu1 %vm325_vm1, %v7355_v23 }
  0xd6   : > { %v6625_v59 = vpop.f32.mrf.mxu0  ;;  %6828 = vmatmul.mubr.msk.bf16.vlgmr.msra.gmra.mxu0 %vm325_vm1, %v7390_v37 }
  0xd7   : > { %v6659_v0 = vpop.f32.mrf.mxu1  ;;  %6894 = vmatpush3.bf16.msra.mxu0 %v2616_v58  ;;  %6862 = vmatmul.mubr.msk.bf16.vlgmr.msra.gmra.mxu1 %vm325_vm1, %v7386_v36 }
  0xd8   : > { %v7752_v1 = vadd.f32 %v6659_v0, %v6625_v59  ;;  %v412_v2 = vpop.f32.mrf.mxu0  ;;  %6831 = vmatprep.mubr.msk.bf16.mxu0 %vm325_vm1, %v7394_v39  ;;  %6865 = vmatprep.mubr.msk.bf16.mxu1 %vm325_vm1, %v7392_v38 }
  0xd9   : > { %v624_v23 = vpop.f32.mrf.mxu1 }
  0xda   : > { %v7758_v24 = vadd.f32 %v624_v23, %v412_v2  ;;  %v6626_v4 = vpop.f32.mrf.mxu0 }
  0xdb   : > { %v6660_v6 = vpop.f32.mrf.mxu1 }
  0xdc   : > { %v7760_v37 = vadd.f32 %v6660_v6, %v6626_v4  ;;  %v415_v7 = vpop.f32.mrf.mxu0 }
  0xdd   : > { %v627_v26 = vpop.f32.mrf.mxu1 }
  0xde   : > { %v7762_v27 = vadd.f32 %v627_v26, %v415_v7  ;;  %v6629_v36 = vpop.f32.mrf.mxu0  ;;  %6832 = vmatmul.mubr.msk.bf16.gmra.mxu0 %vm325_vm1, %v7414_v49 }
  0xdf   : > { %v6663_v13 = vpop.f32.mrf.mxu1  ;;  %6866 = vmatmul.mubr.msk.bf16.gmra.mxu1 %vm325_vm1, %v7412_v48  ;;  %6835 = vmatprep.mubr.msk.bf16.mxu0 %vm325_vm1, %v7418_v51 }
  0xe0   : > { %v7770_v38 = vadd.f32 %v6663_v13, %v6629_v36  ;;  %v428_v39 = vpop.f32.mrf.mxu0  ;;  %6869 = vmatprep.mubr.msk.bf16.mxu1 %vm325_vm1, %v7416_v50 }
  0xe1   : > { %v640_v17 = vpop.f32.mrf.mxu1 }
  0xe2   : > { %v7774_v18 = vadd.f32 %v640_v17, %v428_v39  ;;  %v6630_v20 = vpop.f32.mrf.mxu0 }
  0xe3   : > { %v6664_v21 = vpop.f32.mrf.mxu1 }
  0xe4   : > { %v7776_v32 = vadd.f32 %v6664_v21, %v6630_v20  ;;  %v431_v49 = vpop.f32.mrf.mxu0 }
  0xe5   : > { %v643_v33 = vpop.f32.mrf.mxu1 }
  0xe6   : > { %v7778_v35 = vadd.f32 %v643_v33, %v431_v49  ;;  %v6633_v48 = vpop.f32.mrf.mxu0  ;;  %6836 = vmatmul.mubr.msk.bf16.gmra.mxu0 %vm325_vm1, %v7438_v61 }
  0xe7   : > { %v6667_v51 = vpop.f32.mrf.mxu1  ;;  %6870 = vmatmul.mubr.msk.bf16.gmra.mxu1 %vm325_vm1, %v7436_v60  ;;  %6839 = vmatprep.mubr.msk.bf16.mxu0 %vm325_vm1, %v7442_v63 }
  0xe8   : > { %v7786_v50 = vadd.f32 %v6667_v51, %v6633_v48  ;;  %v444_v46 = vpop.f32.mrf.mxu0  ;;  %6873 = vmatprep.mubr.msk.bf16.mxu1 %vm325_vm1, %v7440_v62 }
  0xe9   : > { %v656_v47 = vpop.f32.mrf.mxu1 }
  0xea   : > { %v7790_v14 = vadd.f32 %v656_v47, %v444_v46  ;;  %v6634_v3 = vpop.f32.mrf.mxu0 }
  0xeb   : > { %v6668_v19 = vpop.f32.mrf.mxu1 }
  0xec   : > { %v7792_v12 = vadd.f32 %v6668_v19, %v6634_v3  ;;  %v447_v61 = vpop.f32.mrf.mxu0 }
  0xed   : > { %v659_v58 = vpop.f32.mrf.mxu1 }
  0xee   : > { %v7794_v59 = vadd.f32 %v659_v58, %v447_v61  ;;  %v6637_v60 = vpop.f32.mrf.mxu0  ;;  %6840 = vmatmul.mubr.msk.bf16.gmra.mxu0 %vm325_vm1, %v7462_v9  ;;  %v6010_v58 = vld [vmem:[%s7332_s6 + $0x1a0] sm:$0xff] }
  0xef   : > { %v6671_v63 = vpop.f32.mrf.mxu1  ;;  %6874 = vmatmul.mubr.msk.bf16.gmra.mxu1 %vm325_vm1, %v7460_v8  ;;  %6843 = vmatprep.mubr.msk.bf16.mxu0 %vm325_vm1, %v7466_v11 }
  0xf0   : > { %v7802_v62 = vadd.f32 %v6671_v63, %v6637_v60  ;;  %v460_v0 = vpop.f32.mrf.mxu0  ;;  %6877 = vmatprep.mubr.msk.bf16.mxu1 %vm325_vm1, %v7464_v10 }
  0xf1   : > { %v672_v2 = vpop.f32.mrf.mxu1 }
  0xf2   : > { %v7806_v23 = vadd.f32 %v672_v2, %v460_v0  ;;  %v6638_v4 = vpop.f32.mrf.mxu0  ;;  %v6058_v0 = vld [vmem:[%s7332_s6 + $0x199] sm:$0xff]  ;;  %v6059_v2 = vld [vmem:[%s7332_s6 + $0x1a1] sm:$0xff] }
  0xf3   : > { %v6672_v6 = vpop.f32.mrf.mxu1 }
  0xf4   : > { %v7808_v7 = vadd.f32 %v6672_v6, %v6638_v4  ;;  %v463_v9 = vpop.f32.mrf.mxu0 }
  0xf5   : > { %v675_v26 = vpop.f32.mrf.mxu1 }
  0xf6   : > { %v7810_v36 = vadd.f32 %v675_v26, %v463_v9  ;;  %v6641_v8 = vpop.f32.mrf.mxu0  ;;  %6844 = vmatmul.mubr.msk.bf16.gmra.mxu0 %vm325_vm1, %v7486_v25 }
  0xf7   : > { %v6675_v11 = vpop.f32.mrf.mxu1  ;;  %6878 = vmatmul.mubr.msk.bf16.gmra.mxu1 %vm325_vm1, %v7484_v22  ;;  %6847 = vmatprep.mubr.msk.bf16.mxu0 %vm325_vm1, %v7490_v29 }
  0xf8   : > { %v7818_v10 = vadd.f32 %v6675_v11, %v6641_v8  ;;  %v476_v13 = vpop.f32.mrf.mxu0  ;;  %6881 = vmatprep.mubr.msk.bf16.mxu1 %vm325_vm1, %v7488_v28 }
  0xf9   : > { %v688_v39 = vpop.f32.mrf.mxu1 }
  0xfa   : > { %v7822_v17 = vadd.f32 %v688_v39, %v476_v13  ;;  %v6642_v20 = vpop.f32.mrf.mxu0 }
  0xfb   : > { %v6676_v21 = vpop.f32.mrf.mxu1 }
  0xfc   : > { %v7824_v49 = vadd.f32 %v6676_v21, %v6642_v20  ;;  %v7826_v25 = vpop.f32.mrf.mxu0 }
  0xfd   : > { %v7828_v33 = vpop.f32.mrf.mxu1 }
  0xfe   : > { %v6645_v22 = vpop.f32.mrf.mxu0  ;;  %6848 = vmatmul.mubr.msk.bf16.gmra.mxu0 %vm325_vm1, %v7510_v43 }
  0xff   : > { %v6679_v29 = vpop.f32.mrf.mxu1  ;;  %6882 = vmatmul.mubr.msk.bf16.gmra.mxu1 %vm325_vm1, %v7508_v42  ;;  %6851 = vmatprep.mubr.msk.bf16.mxu0 %vm325_vm1, %v7514_v45 }
 0x100   : > { %v7836_v28 = vadd.f32 %v6679_v29, %v6645_v22  ;;  %v492_v48 = vpop.f32.mrf.mxu0  ;;  %6885 = vmatprep.mubr.msk.bf16.mxu1 %vm325_vm1, %v7512_v44  ;;  %v6009_v44 = vld [vmem:[%s7332_s6 + $0x198] sm:$0xff] }
 0x101   : > { %v704_v51 = vpop.f32.mrf.mxu1  ;;  %v1976_v9 = vpack.c.bf16 %v6010_v58, %v6009_v44 }
 0x102   : > { %v7840_v46 = vadd.f32 %v704_v51, %v492_v48  ;;  %v6646_v43 = vpop.f32.mrf.mxu0 }
 0x103   : > { %v6680_v47 = vpop.f32.mrf.mxu1 }
 0x104   : > { %v7842_v3 = vadd.f32 %v6680_v47, %v6646_v43  ;;  %v7844_v42 = vpop.f32.mrf.mxu0 }
 0x105   : > { %v7846_v45 = vpop.f32.mrf.mxu1 }
 0x106   : > { %v6649_v19 = vpop.f32.mrf.mxu0  ;;  %6852 = vmatmul.mubr.msk.bf16.gmra.mxu0 %vm325_vm1, %v7532_v57 }
 0x107   : > { %v6683_v61 = vpop.f32.mrf.mxu1  ;;  %6886 = vmatmul.mubr.msk.bf16.gmra.mxu1 %vm325_vm1, %v7530_v56  ;;  %6855 = vmatprep.mubr.msk.bf16.mxu0 %vm325_vm1, %v7663_v34  ;;  %v2270_v56 = vpack.c.bf16 %v6059_v2, %v6058_v0 }
 0x108   : > { %v7856_v60 = vadd.f32 %v6683_v61, %v6649_v19  ;;  %v508_v63 = vpop.f32.mrf.mxu0  ;;  %6889 = vmatprep.mubr.msk.bf16.mxu1 %vm325_vm1, %v7735_v52 }
 0x109   : > { %v720_v4 = vpop.f32.mrf.mxu1 }
 0x10a   : > { %v7862_v6 = vadd.f32 %v720_v4, %v508_v63  ;;  %v6650_v57 = vpop.f32.mrf.mxu0 }
 0x10b   : > { %v6684_v26 = vpop.f32.mrf.mxu1 }
 0x10c   : > { %v7864_v8 = vadd.f32 %v6684_v26, %v6650_v57  ;;  %v7866_v34 = vpop.f32.mrf.mxu0 }
 0x10d   : > { %v7868_v11 = vpop.f32.mrf.mxu1 }
 0x10e   : > { %v6653_v13 = vpop.f32.mrf.mxu0  ;;  %6856 = vmatmul.mubr.msk.bf16.gmra.mxu0 %vm325_vm1, %v1976_v9 }
 0x10f   : > { %v6687_v39 = vpop.f32.mrf.mxu1  ;;  %6890 = vmatmul.mubr.msk.bf16.gmra.mxu1 %vm325_vm1, %v2270_v56  ;;  %6895 = vmatprep.mubr.msk.bf16.mxu0 %vm325_vm1, %v7549_v5 }
 0x110   : > { %v7874_v52 = vadd.f32 %v6687_v39, %v6653_v13  ;;  %v524_v20 = vpop.f32.mrf.mxu0 }
 0x111   : > { %v736_v21 = vpop.f32.mrf.mxu1 }
 0x112   : > { %v7876_v22 = vadd.f32 %v736_v21, %v524_v20  ;;  %v6654_v29 = vpop.f32.mrf.mxu0 }
 0x113   : > { %v6688_v48 = vpop.f32.mrf.mxu1 }
 0x114   : > { %v7878_v51 = vadd.f32 %v6688_v48, %v6654_v29  ;;  %v7880_v43 = vpop.f32.mrf.mxu0 }
 0x115   : > { %v7882_v47 = vpop.f32.mrf.mxu1 }
 0x116   : > { %9681 = vst [vmem:[#allocation3_spill] sm:$0xff] %v7882_v47  ;;  %v6693_v19 = vpop.f32.mrf.mxu0  ;;  %6896 = vmatmul.mubr.msk.bf16.vlgmr.msra.gmra.mxu0 %vm325_vm1, %v7577_v15 }
 0x117   : > { %v1015_v5 = vadd.f32 %v6693_v19, %v7752_v1  ;;  %v6727_v61 = vpop.f32.mrf.mxu1  ;;  %6899 = vmatprep.mubr.msk.bf16.mxu0 %vm325_vm1, %v7581_v16 }
 0x118   : > { %v886_v44 = vpop.f32.mrf.mxu0 }
 0x119   : > { %v1013_v58 = vadd.f32 %v886_v44, %v7758_v24  ;;  %v7890_v63 = vadd.f32 %v6727_v61, %v1015_v5  ;;  %v1181_v0 = vpop.f32.mrf.mxu1 }
 0x11a   : > { %v6694_v2 = vpop.f32.mrf.mxu0 }
 0x11b   : > { %v1016_v4 = vadd.f32 %v6694_v2, %v7760_v37  ;;  %v7893_v57 = vadd.f32 %v1181_v0, %v1013_v58  ;;  %v6728_v9 = vpop.f32.mrf.mxu1 }
 0x11c   : > { %v889_v26 = vpop.f32.mrf.mxu0 }
 0x11d   : > { %v7896_v15 = vadd.f32 %v889_v26, %v7762_v27  ;;  %v7898_v1 = vadd.f32 %v6728_v9, %v1016_v4  ;;  %v7900_v56 = vpop.f32.mrf.mxu1 }
 0x11e   : > { %v6697_v16 = vpop.f32.mrf.mxu0  ;;  %6900 = vmatmul.mubr.msk.bf16.gmra.mxu0 %vm325_vm1, %v7595_v30 }
 0x11f   : > { %v1019_v24 = vadd.f32 %v6697_v16, %v7770_v38  ;;  %v6731_v13 = vpop.f32.mrf.mxu1  ;;  %6903 = vmatprep.mubr.msk.bf16.mxu0 %vm325_vm1, %v7597_v31  ;;  %v6127_v16 = vld [vmem:[%s9676_s3 + $0x4] sm:$0xf] }
 0x120   : > { %v902_v37 = vpop.f32.mrf.mxu0  ;;  %7242 = vmatprep.subr.msk.bf16.mxu1 %vm374_vm0, %v6127_v16 }
 0x121   : > { %v1017_v39 = vadd.f32 %v902_v37, %v7774_v18  ;;  %v7908_v20 = vadd.f32 %v6731_v13, %v1019_v24  ;;  %v1197_v27 = vpop.f32.mrf.mxu1  ;;  %v6095_v37 = vld [vmem:[%s7332_s6 + $0x10a] sm:$0xff] }
 0x122   : > { %v6698_v21 = vpop.f32.mrf.mxu0 }
 0x123   : > { %v1020_v29 = vadd.f32 %v6698_v21, %v7776_v32  ;;  %v7911_v48 = vadd.f32 %v1197_v27, %v1017_v39  ;;  %v6732_v19 = vpop.f32.mrf.mxu1  ;;  %v6096_v39 = vld [vmem:[%s7332_s6 + $0x112] sm:$0xff]  ;;  %v6097_v21 = vld [vmem:[%s7332_s6 + $0x122] sm:$0xff] }
 0x124   : > { %v905_v5 = vpop.f32.mrf.mxu0 }
 0x125   : > { %v7914_v30 = vadd.f32 %v905_v5, %v7778_v35  ;;  %v7916_v38 = vadd.f32 %v6732_v19, %v1020_v29  ;;  %v7918_v61 = vpop.f32.mrf.mxu1  ;;  %v6098_v29 = vld [vmem:[%s7332_s6 + $0x12a] sm:$0xff] }
 0x126   : > { %v6701_v31 = vpop.f32.mrf.mxu0  ;;  %6904 = vmatmul.mubr.msk.bf16.gmra.mxu0 %vm325_vm1, %v7611_v40 }
 0x127   : > { %v1023_v18 = vadd.f32 %v6701_v31, %v7786_v50  ;;  %v6735_v44 = vpop.f32.mrf.mxu1  ;;  %6907 = vmatprep.mubr.msk.bf16.mxu0 %vm325_vm1, %v7613_v41 }
 0x128   : > { %v918_v32 = vpop.f32.mrf.mxu0 }
 0x129   : > { %v1021_v58 = vadd.f32 %v918_v32, %v7790_v14  ;;  %v7926_v0 = vadd.f32 %v6735_v44, %v1023_v18  ;;  %v1213_v35 = vpop.f32.mrf.mxu1  ;;  %v2558_v18 = vpack.c.bf16 %v6096_v39, %v6095_v37  ;;  %v2559_v32 = vpack.c.bf16 %v6098_v29, %v6097_v21 }
 0x12a   : > { %v6702_v2 = vpop.f32.mrf.mxu0 }
 0x12b   : > { %v1024_v4 = vadd.f32 %v6702_v2, %v7792_v12  ;;  %v7929_v9 = vadd.f32 %v1213_v35, %v1021_v58  ;;  %v6736_v40 = vpop.f32.mrf.mxu1  ;;  %v3118_v12 = vsel %vm374_vm0, %v6127_v16, 0  ;;  %v6100_v16 = vld [vmem:[%s7332_s6 + $0x142] sm:$0xff] }
 0x12c   : > { %v921_v26 = vpop.f32.mrf.mxu0  ;;  %6928 = vmatpush3.bf16.msra.mxu1 %v3118_v12  ;;  %v6101_v12 = vld [vmem:[%s7332_s6 + $0x152] sm:$0xff] }
 0x12d   : > { %v7932_v50 = vadd.f32 %v921_v26, %v7794_v59  ;;  %v7934_v41 = vadd.f32 %v6736_v40, %v1024_v4  ;;  %v7936_v14 = vpop.f32.mrf.mxu1  ;;  %v6099_v26 = vld [vmem:[%s7332_s6 + $0x13a] sm:$0xff] }
 0x12e   : > { %v6705_v24 = vpop.f32.mrf.mxu0  ;;  %6908 = vmatmul.mubr.msk.bf16.gmra.mxu0 %vm325_vm1, %v7627_v54 }
 0x12f   : > { %v1027_v59 = vadd.f32 %v6705_v24, %v7802_v62  ;;  %v6739_v13 = vpop.f32.mrf.mxu1  ;;  %6911 = vmatprep.mubr.msk.bf16.mxu0 %vm325_vm1, %v7629_v55 }
 0x130   : > { %v934_v27 = vpop.f32.mrf.mxu0 }
 0x131   : > { %v1025_v19 = vadd.f32 %v934_v27, %v7806_v23  ;;  %v7953_v5 = vadd.f32 %v6739_v13, %v1027_v59  ;;  %v1229_v54 = vpop.f32.mrf.mxu1  ;;  %v6102_v59 = vld [vmem:[%s7332_s6 + $0x15a] sm:$0xff]  ;;  %v2560_v27 = vpack.c.bf16 %v6100_v16, %v6099_v26 }
 0x132   : > { %v6706_v31 = vpop.f32.mrf.mxu0 }
 0x133   : > { %v1028_v62 = vadd.f32 %v6706_v31, %v7808_v7  ;;  %v7956_v44 = vadd.f32 %v1229_v54, %v1025_v19  ;;  %v6740_v55 = vpop.f32.mrf.mxu1  ;;  %v2561_v19 = vpack.c.bf16 %v6102_v59, %v6101_v12 }
 0x134   : > { %v937_v58 = vpop.f32.mrf.mxu0 }
 0x135   : > { %v7959_v35 = vadd.f32 %v937_v58, %v7810_v36  ;;  %v7961_v23 = vadd.f32 %v6740_v55, %v1028_v62  ;;  %v7963_v2 = vpop.f32.mrf.mxu1 }
 0x136   : > { %9683 = vst [vmem:[#allocation5_spill] sm:$0xff] %v7963_v2  ;;  %v6709_v4 = vpop.f32.mrf.mxu0  ;;  %6912 = vmatmul.mubr.msk.bf16.gmra.mxu0 %vm325_vm1, %v2558_v18 }
 0x137   : > { %9682 = vst [vmem:[#allocation4_spill] sm:$0xff] %v7959_v35  ;;  %v1031_v40 = vadd.f32 %v6709_v4, %v7818_v10  ;;  %v6743_v7 = vpop.f32.mrf.mxu1  ;;  %6915 = vmatprep.mubr.msk.bf16.mxu0 %vm325_vm1, %v2559_v32  ;;  %v6103_v32 = vld [vmem:[%s7332_s6 + $0x16a] sm:$0xff] }
 0x138   : > { %v950_v24 = vpop.f32.mrf.mxu0 }
 0x139   : > { %v1029_v36 = vadd.f32 %v950_v24, %v7822_v17  ;;  %v7973_v13 = vadd.f32 %v6743_v7, %v1031_v40  ;;  %v1245_v37 = vpop.f32.mrf.mxu1 }
 0x13a   : > { %v6710_v39 = vpop.f32.mrf.mxu0 }
 0x13b   : > { %v1032_v21 = vadd.f32 %v6710_v39, %v7824_v49  ;;  %v7976_v10 = vadd.f32 %v1245_v37, %v1029_v36  ;;  %v6744_v29 = vpop.f32.mrf.mxu1  ;;  %v6104_v49 = vld [vmem:[%s7332_s6 + $0x172] sm:$0xff] }
 0x13c   : > { %v7978_v54 = vpop.f32.mrf.mxu0  ;;  %v2562_v16 = vpack.c.bf16 %v6104_v49, %v6103_v32 }
 0x13d   : > { %v7980_v31 = vadd.f32 %v6744_v29, %v1032_v21  ;;  %v7982_v18 = vpop.f32.mrf.mxu1  ;;  %v6107_v21 = vld [vmem:[%s7332_s6 + $0x19a] sm:$0xff] }
 0x13e   : > { %9684 = vst [vmem:[#allocation6_spill] sm:$0xff] %v7982_v18  ;;  %v6713_v17 = vpop.f32.mrf.mxu0  ;;  %6916 = vmatmul.mubr.msk.bf16.gmra.mxu0 %vm325_vm1, %v2560_v27 }
 0x13f   : > { %v1035_v62 = vadd.f32 %v6713_v17, %v7836_v28  ;;  %v6747_v55 = vpop.f32.mrf.mxu1  ;;  %6919 = vmatprep.mubr.msk.bf16.mxu0 %vm325_vm1, %v2561_v19 }
 0x140   : > { %v966_v58 = vpop.f32.mrf.mxu0 }
 0x141   : > { %v1033_v4 = vadd.f32 %v966_v58, %v7840_v46  ;;  %v7990_v40 = vadd.f32 %v6747_v55, %v1035_v62  ;;  %v1261_v7 = vpop.f32.mrf.mxu1 }
 0x142   : > { %v6714_v26 = vpop.f32.mrf.mxu0 }
 0x143   : > { %v1036_v24 = vadd.f32 %v6714_v26, %v7842_v3  ;;  %v7993_v12 = vadd.f32 %v1261_v7, %v1033_v4  ;;  %v6748_v28 = vpop.f32.mrf.mxu1  ;;  %v6108_v3 = vld [vmem:[%s7332_s6 + $0x1a2] sm:$0xff] }
 0x144   : > { %v7995_v59 = vpop.f32.mrf.mxu0  ;;  %v2564_v32 = vpack.c.bf16 %v6108_v3, %v6107_v21 }
 0x145   : > { %9685 = vst [vmem:[#allocation7_spill] sm:$0xff] %v7995_v59  ;;  %v7997_v36 = vadd.f32 %v6748_v28, %v1036_v24  ;;  %v7999_v37 = vpop.f32.mrf.mxu1 }
 0x146   : > { %9686 = vst [vmem:[#allocation8_spill] sm:$0xff] %v7999_v37  ;;  %v6717_v39 = vpop.f32.mrf.mxu0  ;;  %6920 = vmatmul.mubr.msk.bf16.gmra.mxu0 %vm325_vm1, %v2562_v16 }
 0x147   : > { %v1039_v46 = vadd.f32 %v6717_v39, %v7856_v60  ;;  %v6751_v27 = vpop.f32.mrf.mxu1  ;;  %6923 = vmatprep.mubr.msk.bf16.mxu0 %vm325_vm1, %v7737_v53 }
 0x148   : > { %v982_v29 = vpop.f32.mrf.mxu0 }
 0x149   : > { %v1037_v19 = vadd.f32 %v982_v29, %v7862_v6  ;;  %v8008_v17 = vadd.f32 %v6751_v27, %v1039_v46  ;;  %v1277_v62 = vpop.f32.mrf.mxu1 }
 0x14a   : > { %v6718_v55 = vpop.f32.mrf.mxu0 }
 0x14b   : > { %v1040_v49 = vadd.f32 %v6718_v55, %v7864_v8  ;;  %v8011_v58 = vadd.f32 %v1277_v62, %v1037_v19  ;;  %v6752_v4 = vpop.f32.mrf.mxu1 }
 0x14c   : > { %v8013_v60 = vpop.f32.mrf.mxu0 }
 0x14d   : > { %9687 = vst [vmem:[#allocation9_spill] sm:$0xff] %v8013_v60  ;;  %v8015_v7 = vadd.f32 %v6752_v4, %v1040_v49  ;;  %v8017_v53 = vpop.f32.mrf.mxu1 }
 0x14e   : > { %9688 = vst [vmem:[#allocation10_spill] sm:$0xff] %v8017_v53  ;;  %v6721_v26 = vpop.f32.mrf.mxu0  ;;  %6924 = vmatmul.mubr.msk.bf16.gmra.mxu0 %vm325_vm1, %v2564_v32 }
 0x14f   : > { %v1043_v6 = vadd.f32 %v6721_v26, %v7874_v52  ;;  %v6755_v16 = vpop.f32.mrf.mxu1 }
 0x150   : > { %v998_v24 = vpop.f32.mrf.mxu0 }
 0x151   : > { %v1041_v28 = vadd.f32 %v998_v24, %v7876_v22  ;;  %v8022_v39 = vadd.f32 %v6755_v16, %v1043_v6  ;;  %v1293_v8 = vpop.f32.mrf.mxu1  ;;  %v7269_v24 = vmov 0.0  }
 0x152   : > { %v6722_v46 = vpop.f32.mrf.mxu0  ;;  %2889 = vst.msk [vmem:[#allocation2 + $0x30] sm:$0xff] %vm325_vm1, %v7269_v24  ;;  %2890 = vst.msk [vmem:[#allocation2 + $0x38] sm:$0xff] %vm325_vm1, %v7269_v24 }
 0x153   : > { %v1044_v27 = vadd.f32 %v6722_v46, %v7878_v51  ;;  %v8025_v21 = vadd.f32 %v1293_v8, %v1041_v28  ;;  %v6756_v3 = vpop.f32.mrf.mxu1  ;;  %2882 = vst.msk [vmem:[#allocation2] sm:$0xff] %vm325_vm1, %v7269_v24  ;;  %2883 = vst.msk [vmem:[#allocation2 + $0x8] sm:$0xff] %vm325_vm1, %v7269_v24 }
 0x154   : > { %v8027_v29 = vpop.f32.mrf.mxu0  ;;  %2886 = vst.msk [vmem:[#allocation2 + $0x18] sm:$0xff] %vm325_vm1, %v7269_v24  ;;  %2887 = vst.msk [vmem:[#allocation2 + $0x20] sm:$0xff] %vm325_vm1, %v7269_v24 }
 0x155   : > { %9689 = vst [vmem:[#allocation11_spill] sm:$0xff] %v8027_v29  ;;  %v8029_v19 = vadd.f32 %v6756_v3, %v1044_v27  ;;  %v8031_v62 = vpop.f32.mrf.mxu1  ;;  %2892 = vst.msk [vmem:[#allocation2 + $0x48] sm:$0xff] %vm325_vm1, %v7269_v24 }
 0x156   : > { %9690 = vst [vmem:[#allocation12_spill] sm:$0xff] %v8031_v62  ;;  %v6761_v52 = vpop.f32.mrf.mxu0  ;;  %2893 = vst.msk [vmem:[#allocation2 + $0x50] sm:$0xff] %vm325_vm1, %v7269_v24 }
 0x157   : > { %v8034_v55 = vadd.f32 %v6761_v52, %v7890_v63  ;;  %v8036_v22 = vpop.f32.mrf.mxu1  ;;  %2895 = vst.msk [vmem:[#allocation2 + $0x60] sm:$0xff] %vm325_vm1, %v7269_v24  ;;  %2896 = vst.msk [vmem:[#allocation2 + $0x68] sm:$0xff] %vm325_vm1, %v7269_v24 }
 0x158   : > { %v1475_v32 = vpop.f32.mrf.mxu0  ;;  %2898 = vst.msk [vmem:[#allocation2 + $0x78] sm:$0xff] %vm325_vm1, %v7269_v24  ;;  %2899 = vst.msk [vmem:[#allocation2 + $0x80] sm:$0xff] %vm325_vm1, %v7269_v24 }
 0x159   : > { %v8039_v49 = vadd.f32 %v1475_v32, %v7893_v57  ;;  %v8041_v51 = vpop.f32.mrf.mxu1  ;;  %2901 = vst.msk [vmem:[#allocation2 + $0x90] sm:$0xff] %vm325_vm1, %v7269_v24  ;;  %2902 = vst.msk [vmem:[#allocation2 + $0x98] sm:$0xff] %vm325_vm1, %v7269_v24 }
 0x15a   : > { %v6762_v4 = vpop.f32.mrf.mxu0  ;;  %2904 = vst.msk [vmem:[#allocation2 + $0xa8] sm:$0xff] %vm325_vm1, %v7269_v24  ;;  %2905 = vst.msk [vmem:[#allocation2 + $0xb0] sm:$0xff] %vm325_vm1, %v7269_v24  ;;  %v3019_v60 = vld [vmem:[#allocation2 + $0x1] sm:$0xff] }
 0x15b   : > { %v8044_v26 = vadd.f32 %v6762_v4, %v7898_v1  ;;  %v8046_v6 = vpop.f32.mrf.mxu1  ;;  %2907 = vst.msk [vmem:[#allocation2 + $0xc0] sm:$0xff] %vm325_vm1, %v7269_v24  ;;  %2908 = vst.msk [vmem:[#allocation2 + $0xc8] sm:$0xff] %vm325_vm1, %v7269_v24 }
 0x15c   : > { %v8048_v16 = vpop.f32.mrf.mxu0  ;;  %2910 = vst.msk [vmem:[#allocation2 + $0xd8] sm:$0xff] %vm325_vm1, %v7269_v24  ;;  %2911 = vst.msk [vmem:[#allocation2 + $0xe0] sm:$0xff] %vm325_vm1, %v7269_v24 }
 0x15d   : > { %2913 = vst.msk [vmem:[#allocation2 + $0xf0] sm:$0xff] %vm325_vm1, %v7269_v24  ;;  %2914 = vst.msk [vmem:[#allocation2 + $0xf8] sm:$0xff] %vm325_vm1, %v7269_v24  ;;  %v8086_v63 = vpop.f32.mrf.mxu1 }
 0x15e   : > { %2916 = vst.msk [vmem:[#allocation2 + $0x108] sm:$0xff] %vm325_vm1, %v7269_v24  ;;  %2917 = vst.msk [vmem:[#allocation2 + $0x110] sm:$0xff] %vm325_vm1, %v7269_v24  ;;  %v6765_v57 = vpop.f32.mrf.mxu0 }
 0x15f   : > { %2919 = vst.msk [vmem:[#allocation2 + $0x120] sm:$0xff] %vm325_vm1, %v7269_v24  ;;  %2920 = vst.msk [vmem:[#allocation2 + $0x128] sm:$0xff] %vm325_vm1, %v7269_v24  ;;  %v8089_v1 = vadd.f32 %v6765_v57, %v7908_v20  ;;  %v8091_v28 = vpop.f32.mrf.mxu1 }
 0x160   : > { %2922 = vst.msk [vmem:[#allocation2 + $0x138] sm:$0xff] %vm325_vm1, %v7269_v24  ;;  %2923 = vst.msk [vmem:[#allocation2 + $0x140] sm:$0xff] %vm325_vm1, %v7269_v24  ;;  %v1491_v8 = vpop.f32.mrf.mxu0 }
 0x161   : > { %2925 = vst.msk [vmem:[#allocation2 + $0x150] sm:$0xff] %vm325_vm1, %v7269_v24  ;;  %2926 = vst.msk [vmem:[#allocation2 + $0x158] sm:$0xff] %vm325_vm1, %v7269_v24  ;;  %v8112_v20 = vadd.f32 %v1491_v8, %v7911_v48  ;;  %v8114_v46 = vpop.f32.mrf.mxu1 }
 0x162   : > { %2928 = vst.msk [vmem:[#allocation2 + $0x168] sm:$0xff] %vm325_vm1, %v7269_v24  ;;  %2929 = vst.msk [vmem:[#allocation2 + $0x170] sm:$0xff] %vm325_vm1, %v7269_v24  ;;  %v6766_v27 = vpop.f32.mrf.mxu0 }
 0x163   : > { %2931 = vst.msk [vmem:[#allocation2 + $0x180] sm:$0xff] %vm325_vm1, %v7269_v24  ;;  %2932 = vst.msk [vmem:[#allocation2 + $0x188] sm:$0xff] %vm325_vm1, %v7269_v24  ;;  %v8117_v3 = vadd.f32 %v6766_v27, %v7916_v38  ;;  %v8119_v52 = vpop.f32.mrf.mxu1  ;;  %v3018_v38 = vld [vmem:[%s9676_s3] sm:$0xf] }
 0x164   : > { %2934 = vst.msk [vmem:[#allocation2 + $0x198] sm:$0xff] %vm325_vm1, %v7269_v24  ;;  %2935 = vst.msk [vmem:[#allocation2 + $0x1a0] sm:$0xff] %vm325_vm1, %v7269_v24  ;;  %v8121_v32 = vpop.f32.mrf.mxu0  ;;  %7243 = vmatprep.subr.msk.bf16.mxu0 %vm374_vm0, %v3018_v38  ;;  %v3330_v53 = vsel %vm374_vm0, %v3018_v38, 0 }
 0x165   : > { %2891 = vst.msk [vmem:[#allocation2 + $0x40] sm:$0x3] %vm2884_vm2, %v7269_v24  ;;  %2885 = vst.msk [vmem:[#allocation2 + $0x10] sm:$0x3] %vm2884_vm2, %v7269_v24  ;;  %v8123_v4 = vpop.f32.mrf.mxu1  ;;  %6962 = vmatpush3.bf16.msra.mxu0 %v3330_v53 }
 0x166   : > { %2888 = vst.msk [vmem:[#allocation2 + $0x28] sm:$0x3] %vm2884_vm2, %v7269_v24  ;;  %2894 = vst.msk [vmem:[#allocation2 + $0x58] sm:$0x3] %vm2884_vm2, %v7269_v24  ;;  %v6769_v57 = vpop.f32.mrf.mxu0 }
 0x167   : > { %2897 = vst.msk [vmem:[#allocation2 + $0x70] sm:$0x3] %vm2884_vm2, %v7269_v24  ;;  %2900 = vst.msk [vmem:[#allocation2 + $0x88] sm:$0x3] %vm2884_vm2, %v7269_v24  ;;  %v8126_v62 = vadd.f32 %v6769_v57, %v7926_v0  ;;  %v2970_v57 = vld [vmem:[#allocation2] sm:$0xff] }
 0x168   : > { %2903 = vst.msk [vmem:[#allocation2 + $0xa0] sm:$0x3] %vm2884_vm2, %v7269_v24  ;;  %2906 = vst.msk [vmem:[#allocation2 + $0xb8] sm:$0x3] %vm2884_vm2, %v7269_v24  ;;  %v1507_v48 = vpop.f32.mrf.mxu0 }
 0x169   : > { %2909 = vst.msk [vmem:[#allocation2 + $0xd0] sm:$0x3] %vm2884_vm2, %v7269_v24  ;;  %2912 = vst.msk [vmem:[#allocation2 + $0xe8] sm:$0x3] %vm2884_vm2, %v7269_v24  ;;  %v8131_v8 = vadd.f32 %v1507_v48, %v7929_v9  ;;  %v2971_v48 = vld [vmem:[#allocation2 + $0x8] sm:$0xff] }
 0x16a   : > { %2915 = vst.msk [vmem:[#allocation2 + $0x100] sm:$0x3] %vm2884_vm2, %v7269_v24  ;;  %2918 = vst.msk [vmem:[#allocation2 + $0x118] sm:$0x3] %vm2884_vm2, %v7269_v24  ;;  %v6770_v27 = vpop.f32.mrf.mxu0  ;;  %v3002_v35 = vpack.c.bf16 %v2971_v48, %v2970_v57 }
 0x16b   : > { %2921 = vst.msk [vmem:[#allocation2 + $0x130] sm:$0x3] %vm2884_vm2, %v7269_v24  ;;  %2924 = vst.msk [vmem:[#allocation2 + $0x148] sm:$0x3] %vm2884_vm2, %v7269_v24  ;;  %v8141_v37 = vadd.f32 %v6770_v27, %v7934_v41 }
 0x16c   : > { %2927 = vst.msk [vmem:[#allocation2 + $0x160] sm:$0x3] %vm2884_vm2, %v7269_v24  ;;  %2930 = vst.msk [vmem:[#allocation2 + $0x178] sm:$0x3] %vm2884_vm2, %v7269_v24  ;;  %v3020_v0 = vld [vmem:[#allocation2 + $0x9] sm:$0xff]  ;;  %v8145_v2 = vpop.f32.mrf.mxu0  ;;  %6963 = vmatprep.mubr.msk.bf16.mxu0 %vm325_vm1, %v3002_v35 }
 0x16d   : > { %2933 = vst.msk [vmem:[#allocation2 + $0x190] sm:$0x3] %vm2884_vm2, %v7269_v24  ;;  %2936 = vst.msk [vmem:[#allocation2 + $0x1a8] sm:$0x3] %vm2884_vm2, %v7269_v24  ;;  %v8128_v24 = vpop.f32.mrf.mxu1  ;;  %v3051_v9 = vpack.c.bf16 %v3020_v0, %v3019_v60  ;;  %v8169_v35 = vld [vmem:[%s9676_s3 + $0x8] sm:$0xf] }
 0x16e   : > { %v6773_v47 = vpop.f32.mrf.mxu0  ;;  %9698 = vst [vmem:[#allocation20_spill] sm:$0xff] %v8169_v35  ;;  %7244 = vmatprep.subr.msk.bf16.mxu1 %vm374_vm0, %v8169_v35 }
 0x16f   : > { %v8133_v29 = vpop.f32.mrf.mxu1  ;;  %6929 = vmatprep.mubr.msk.bf16.mxu1 %vm325_vm1, %v3051_v9  ;;  %v8152_v38 = vadd.f32 %v6773_v47, %v7953_v5 }
 0x170   : > { %v1523_v27 = vpop.f32.mrf.mxu0 }
 0x171   : > { %v8143_v18 = vpop.f32.mrf.mxu1  ;;  %9692 = vst [vmem:[#allocation14_spill] sm:$0xff] %v8152_v38  ;;  %v8157_v53 = vadd.f32 %v1523_v27, %v7956_v44 }
 0x172   : > { %v6774_v0 = vpop.f32.mrf.mxu0 }
 0x173   : > { %v8147_v59 = vpop.f32.mrf.mxu1  ;;  %9694 = vst [vmem:[#allocation16_spill] sm:$0xff] %v8157_v53  ;;  %v8162_v57 = vadd.f32 %v6774_v0, %v7961_v23 }
 0x174   : > { %9691 = vst [vmem:[#allocation13_spill] sm:$0xff] %v8147_v59  ;;  %v8171_v47 = vpop.f32.mrf.mxu0 }
 0x175   : > { %v8154_v41 = vpop.f32.mrf.mxu1  ;;  %9696 = vst [vmem:[#allocation18_spill] sm:$0xff] %v8162_v57  ;;  %9699 = vst [vmem:[#allocation21_spill] sm:$0xff] %v8171_v47 }
 0x176   : > { %9693 = vst [vmem:[#allocation15_spill] sm:$0xff] %v8154_v41  ;;  %v6777_v44 = vpop.f32.mrf.mxu0 }
 0x177   : > { %v8159_v60 = vpop.f32.mrf.mxu1  ;;  %v8178_v9 = vadd.f32 %v6777_v44, %v7973_v13 }
 0x178   : > { %9695 = vst [vmem:[#allocation17_spill] sm:$0xff] %v8159_v60  ;;  %v1539_v27 = vpop.f32.mrf.mxu0 }
 0x179   : > { %v8164_v48 = vpop.f32.mrf.mxu1  ;;  %9701 = vst [vmem:[#allocation23_spill] sm:$0xff] %v8178_v9  ;;  %v8183_v0 = vadd.f32 %v1539_v27, %v7976_v10 }
 0x17a   : > { %9697 = vst [vmem:[#allocation19_spill] sm:$0xff] %v8164_v48  ;;  %v6778_v57 = vpop.f32.mrf.mxu0 }
 0x17b   : > { %v8175_v5 = vpop.f32.mrf.mxu1  ;;  %9703 = vst [vmem:[#allocation25_spill] sm:$0xff] %v8183_v0  ;;  %v8188_v60 = vadd.f32 %v6778_v57, %v7980_v31 }
 0x17c   : > { %9700 = vst [vmem:[#allocation22_spill] sm:$0xff] %v8175_v5  ;;  %v8192_v35 = vpop.f32.mrf.mxu0 }
 0x17d   : > { %v8180_v23 = vpop.f32.mrf.mxu1  ;;  %9705 = vst [vmem:[#allocation27_spill] sm:$0xff] %v8188_v60  ;;  %9707 = vst [vmem:[#allocation29_spill] sm:$0xff] %v8192_v35 }
 0x17e   : > { %9702 = vst [vmem:[#allocation24_spill] sm:$0xff] %v8180_v23  ;;  %v6781_v13 = vpop.f32.mrf.mxu0 }
 0x17f   : > { %v8185_v48 = vpop.f32.mrf.mxu1  ;;  %v8197_v44 = vadd.f32 %v6781_v13, %v7990_v40 }
 0x180   : > { %9704 = vst [vmem:[#allocation26_spill] sm:$0xff] %v8185_v48  ;;  %v1555_v10 = vpop.f32.mrf.mxu0 }
 0x181   : > { %v8190_v53 = vpop.f32.mrf.mxu1  ;;  %9709 = vst [vmem:[#allocation31_spill] sm:$0xff] %v8197_v44  ;;  %v8202_v27 = vadd.f32 %v1555_v10, %v7993_v12 }
 0x182   : > { %9706 = vst [vmem:[#allocation28_spill] sm:$0xff] %v8190_v53  ;;  %v6782_v31 = vpop.f32.mrf.mxu0 }
 0x183   : > { %v8194_v5 = vpop.f32.mrf.mxu1  ;;  %9711 = vst [vmem:[#allocation33_spill] sm:$0xff] %v8202_v27  ;;  %v8207_v57 = vadd.f32 %v6782_v31, %v7997_v36 }
 0x184   : > { %9708 = vst [vmem:[#allocation30_spill] sm:$0xff] %v8194_v5  ;;  %v8211_v60 = vpop.f32.mrf.mxu0 }
 0x185   : > { %v8199_v23 = vpop.f32.mrf.mxu1  ;;  %9713 = vst [vmem:[#allocation35_spill] sm:$0xff] %v8207_v57  ;;  %9715 = vst [vmem:[#allocation37_spill] sm:$0xff] %v8211_v60 }
 0x186   : > { %9710 = vst [vmem:[#allocation32_spill] sm:$0xff] %v8199_v23  ;;  %v6785_v40 = vpop.f32.mrf.mxu0 }
 0x187   : > { %v8204_v48 = vpop.f32.mrf.mxu1  ;;  %v8216_v13 = vadd.f32 %v6785_v40, %v8008_v17 }
 0x188   : > { %9712 = vst [vmem:[#allocation34_spill] sm:$0xff] %v8204_v48  ;;  %v1571_v12 = vpop.f32.mrf.mxu0 }
 0x189   : > { %v8209_v53 = vpop.f32.mrf.mxu1  ;;  %9717 = vst [vmem:[#allocation39_spill] sm:$0xff] %v8216_v13  ;;  %v8221_v10 = vadd.f32 %v1571_v12, %v8011_v58 }
 0x18a   : > { %9714 = vst [vmem:[#allocation36_spill] sm:$0xff] %v8209_v53  ;;  %v6786_v36 = vpop.f32.mrf.mxu0 }
 0x18b   : > { %v8213_v5 = vpop.f32.mrf.mxu1  ;;  %9719 = vst [vmem:[#allocation41_spill] sm:$0xff] %v8221_v10  ;;  %v8226_v31 = vadd.f32 %v6786_v36, %v8015_v7 }
 0x18c   : > { %9716 = vst [vmem:[#allocation38_spill] sm:$0xff] %v8213_v5  ;;  %v8230_v57 = vpop.f32.mrf.mxu0 }
 0x18d   : > { %v8218_v23 = vpop.f32.mrf.mxu1  ;;  %9721 = vst [vmem:[#allocation43_spill] sm:$0xff] %v8226_v31  ;;  %9723 = vst [vmem:[#allocation45_spill] sm:$0xff] %v8230_v57  ;;  %v8276_v57 = vld [vmem:[%s9676_s3 + $0xc] sm:$0xf] }
 0x18e   : > { %9718 = vst [vmem:[#allocation40_spill] sm:$0xff] %v8218_v23  ;;  %v6789_v17 = vpop.f32.mrf.mxu0  ;;  %9733 = vst [vmem:[#allocation55_spill] sm:$0xff] %v8276_v57  ;;  %7245 = vmatprep.subr.msk.bf16.mxu0 %vm374_vm0, %v8276_v57 }
 0x18f   : > { %v8223_v48 = vpop.f32.mrf.mxu1  ;;  %v8235_v40 = vadd.f32 %v6789_v17, %v8022_v39 }
 0x190   : > { %9720 = vst [vmem:[#allocation42_spill] sm:$0xff] %v8223_v48  ;;  %v1587_v58 = vpop.f32.mrf.mxu0 }
 0x191   : > { %v8228_v53 = vpop.f32.mrf.mxu1  ;;  %9725 = vst [vmem:[#allocation47_spill] sm:$0xff] %v8235_v40  ;;  %v8240_v12 = vadd.f32 %v1587_v58, %v8025_v21 }
 0x192   : > { %9722 = vst [vmem:[#allocation44_spill] sm:$0xff] %v8228_v53  ;;  %v6790_v7 = vpop.f32.mrf.mxu0 }
 0x193   : > { %v8232_v5 = vpop.f32.mrf.mxu1  ;;  %9727 = vst [vmem:[#allocation49_spill] sm:$0xff] %v8240_v12  ;;  %v8245_v36 = vadd.f32 %v6790_v7, %v8029_v19 }
 0x194   : > { %9724 = vst [vmem:[#allocation46_spill] sm:$0xff] %v8232_v5  ;;  %v8249_v31 = vpop.f32.mrf.mxu0 }
 0x195   : > { %v8237_v23 = vpop.f32.mrf.mxu1  ;;  %9729 = vst [vmem:[#allocation51_spill] sm:$0xff] %v8245_v36  ;;  %9731 = vst [vmem:[#allocation53_spill] sm:$0xff] %v8249_v31 }
 0x196   : > { %9726 = vst [vmem:[#allocation48_spill] sm:$0xff] %v8237_v23  ;;  %v6829_v39 = vpop.f32.mrf.mxu0 }
 0x197   : > { %v8242_v48 = vpop.f32.mrf.mxu1 }
 0x198   : > { %9728 = vst [vmem:[#allocation50_spill] sm:$0xff] %v8242_v48  ;;  %v2064_v40 = vpop.f32.mrf.mxu0 }
 0x199   : > { %v8247_v53 = vpop.f32.mrf.mxu1 }
 0x19a   : > { %9730 = vst [vmem:[#allocation52_spill] sm:$0xff] %v8247_v53  ;;  %v6830_v10 = vpop.f32.mrf.mxu0 }
 0x19b   : > { %v8251_v5 = vpop.f32.mrf.mxu1 }
 0x19c   : > { %9732 = vst [vmem:[#allocation54_spill] sm:$0xff] %v8251_v5  ;;  %v2067_v58 = vpop.f32.mrf.mxu0 }
 0x19d   : > { %v6863_v17 = vpop.f32.mrf.mxu1 }
 0x19e   : > { %v8257_v48 = vpop.f32.mrf.mxu0 }
 0x19f   : > { %v8253_v23 = vpop.f32.mrf.mxu1 }
 0x1a0   : > { %v8261_v19 = vpop.f32.mrf.mxu0 }
 0x1a1   : > { %v8255_v21 = vpop.f32.mrf.mxu1 }
 0x1a2   : > { %v8263_v7 = vpop.f32.mrf.mxu0 }
 0x1a3   : > { %v8259_v12 = vpop.f32.mrf.mxu1 }
 0x1a4   : > { %v8267_v5 = vpop.f32.mrf.mxu0 }
 0x1a5   : > { %v8265_v53 = vpop.f32.mrf.mxu1 }
 0x1a6   : > { %v8269_v36 = vpop.f32.mrf.mxu0 }
 0x1a7   : > { %v8271_v31 = vpop.f32.mrf.mxu1 }
 0x1a8   : > { %v8278_v13 = vpop.f32.mrf.mxu0 }
 0x1a9   : > { %9734 = vst [vmem:[#allocation56_spill] sm:$0xff] %v8278_v13  ;;  %v8284_v60 = vpop.f32.mrf.mxu1 }
 0x1aa   : > { %v8282_v27 = vpop.f32.mrf.mxu0 }
 0x1ab   : > { %9735 = vst [vmem:[#allocation57_spill] sm:$0xff] %v8282_v27  ;;  %v8290_v35 = vpop.f32.mrf.mxu1 }
 0x1ac   : > { %v8286_v44 = vpop.f32.mrf.mxu0  ;;  %9738 = vst [vmem:[#allocation60_spill] sm:$0xff] %v8290_v35 }
 0x1ad   : > { %9736 = vst [vmem:[#allocation58_spill] sm:$0xff] %v8286_v44  ;;  %v8296_v41 = vpop.f32.mrf.mxu1 }
 0x1ae   : > { %v8288_v0 = vpop.f32.mrf.mxu0  ;;  %9741 = vst [vmem:[#allocation63_spill] sm:$0xff] %v8296_v41 }
 0x1af   : > { %9737 = vst [vmem:[#allocation59_spill] sm:$0xff] %v8288_v0  ;;  %v8302_v57 = vpop.f32.mrf.mxu1 }
 0x1b0   : > { %v8292_v9 = vpop.f32.mrf.mxu0  ;;  %9744 = vst [vmem:[#allocation66_spill] sm:$0xff] %v8302_v57 }
 0x1b1   : > { %9739 = vst [vmem:[#allocation61_spill] sm:$0xff] %v8292_v9  ;;  %v8308_v44 = vpop.f32.mrf.mxu1 }
 0x1b2   : > { %v8294_v47 = vpop.f32.mrf.mxu0  ;;  %9747 = vst [vmem:[#allocation69_spill] sm:$0xff] %v8308_v44 }
 0x1b3   : > { %9740 = vst [vmem:[#allocation62_spill] sm:$0xff] %v8294_v47  ;;  %v8314_v9 = vpop.f32.mrf.mxu1 }
 0x1b4   : > { %v8298_v38 = vpop.f32.mrf.mxu0 }
 0x1b5   : > { %9742 = vst [vmem:[#allocation64_spill] sm:$0xff] %v8298_v38  ;;  %v8320_v38 = vpop.f32.mrf.mxu1 }
 0x1b6   : > { %v8300_v59 = vpop.f32.mrf.mxu0  ;;  %9752 = vst [vmem:[#allocation74_spill] sm:$0xff] %v8320_v38 }
 0x1b7   : > { %9743 = vst [vmem:[#allocation65_spill] sm:$0xff] %v8300_v59 }
 0x1b8   : > { %v8304_v27 = vpop.f32.mrf.mxu0 }
 0x1b9   : > { %9745 = vst [vmem:[#allocation67_spill] sm:$0xff] %v8304_v27  ;;  %v8326_v27 = vpop.f32.mrf.mxu1 }
 0x1ba   : > { %v8306_v13 = vpop.f32.mrf.mxu0  ;;  %9755 = vst [vmem:[#allocation77_spill] sm:$0xff] %v8326_v27 }
 0x1bb   : > { %9746 = vst [vmem:[#allocation68_spill] sm:$0xff] %v8306_v13 }
 0x1bc   : > { %v8310_v0 = vpop.f32.mrf.mxu0 }
 0x1bd   : > { %9748 = vst [vmem:[#allocation70_spill] sm:$0xff] %v8310_v0  ;;  %v8332_v0 = vpop.f32.mrf.mxu1 }
 0x1be   : > { %v8312_v35 = vpop.f32.mrf.mxu0  ;;  %9758 = vst [vmem:[#allocation80_spill] sm:$0xff] %v8332_v0 }
 0x1bf   : > { %9749 = vst [vmem:[#allocation71_spill] sm:$0xff] %v8312_v35  ;;  %v8342_v38 = vpop.f32.mrf.mxu1 }
 0x1c0   : > { %v8316_v47 = vpop.f32.mrf.mxu0 }
 0x1c1   : > { %9750 = vst [vmem:[#allocation72_spill] sm:$0xff] %v8316_v47  ;;  %v1309_v47 = vadd.f32 %v7900_v56, %v7896_v15  ;;  %v1899_v15 = vadd.f32 %v8046_v6, %v8044_v26  ;;  %v8365_v26 = vld [vmem:[%s9675_s2] ss:$0 sm:$0xff] }
 0x1c2   : > { %v8318_v41 = vpop.f32.mrf.mxu0 }
 0x1c3   : > { %9751 = vst [vmem:[#allocation73_spill] sm:$0xff] %v8318_v41 }
 0x1c4   : > { %v8322_v59 = vpop.f32.mrf.mxu0 }
 0x1c5   : > { %9753 = vst [vmem:[#allocation75_spill] sm:$0xff] %v8322_v59  ;;  %v1898_v59 = vadd.f32 %v8036_v22, %v8034_v55 }
 0x1c6   : > { %v8324_v57 = vpop.f32.mrf.mxu0 }
 0x1c7   : > { %9754 = vst [vmem:[#allocation76_spill] sm:$0xff] %v8324_v57  ;;  %v1603_v57 = vadd.f32 %v8048_v16, %v1309_v47  ;;  %v2194_v16 = vadd.f32 %v6830_v10, %v1899_v15  ;;  %v1313_v47 = vadd.f32 %v7918_v61, %v7914_v30  ;;  %v1900_v61 = vadd.f32 %v8114_v46, %v8112_v20 }
 0x1c8   : > { %v8328_v13 = vpop.f32.mrf.mxu0  ;;  %v692_v20 = vadd.f32 %v7828_v33, %v7826_v25  ;;  %v708_v46 = vadd.f32 %v7846_v45, %v7844_v42  ;;  %v1317_v25 = vadd.f32 %v7936_v14, %v7932_v50  ;;  %v1906_v33 = vadd.f32 %v8128_v24, %v8126_v62 }
 0x1c9   : > { %9756 = vst [vmem:[#allocation78_spill] sm:$0xff] %v8328_v13  ;;  %v2193_v13 = vadd.f32 %v6829_v39, %v1898_v59  ;;  %v1897_v55 = vadd.f32 %v8086_v63, %v1603_v57  ;;  %v1902_v59 = vadd.f32 %v8091_v28, %v8089_v1  ;;  %v1607_v57 = vadd.f32 %v8121_v32, %v1313_v47 }
 0x1ca   : > { %v8330_v44 = vpop.f32.mrf.mxu0  ;;  %v2488_v1 = vadd.f32 %v8255_v21, %v2194_v16  ;;  %v1904_v50 = vadd.f32 %v8133_v29, %v8131_v8  ;;  %v1611_v14 = vadd.f32 %v8145_v2, %v1317_v25  ;;  %v2201_v62 = vadd.f32 %v8269_v36, %v1906_v33  ;;  %v9763_v29 = vld [vmem:[#allocation60_spill] sm:$0xff]  ;;  %v9775_v25 = vld [vmem:[#allocation58_spill] sm:$0xff] }
 0x1cb   : > { %9757 = vst [vmem:[#allocation79_spill] sm:$0xff] %v8330_v44  ;;  %v1896_v44 = vadd.f32 %v8041_v51, %v8039_v49  ;;  %v2192_v49 = vadd.f32 %v2067_v58, %v1897_v55  ;;  %v1901_v21 = vadd.f32 %v8123_v4, %v1607_v57  ;;  %v8394_v55 = vadd.f32 %v7868_v11, %v7866_v34 }
 0x1cc   : > { %v8334_v35 = vpop.f32.mrf.mxu0  ;;  %v1030_v11 = vadd.f32 %v7978_v54, %v692_v20  ;;  %v9762_v54 = vld [vmem:[#allocation7_spill] sm:$0xff]  ;;  %v1907_v2 = vadd.f32 %v8143_v18, %v8141_v37 }
 0x1cd   : > { %9759 = vst [vmem:[#allocation81_spill] sm:$0xff] %v8334_v35  ;;  %v2191_v56 = vadd.f32 %v2064_v40, %v1896_v44  ;;  %v2487_v35 = vadd.f32 %v6863_v17, %v2193_v13  ;;  %v2197_v13 = vadd.f32 %v8257_v48, %v1902_v59  ;;  %v1903_v40 = vadd.f32 %v8119_v52, %v8117_v3  ;;  %v9769_v37 = vld [vmem:[#allocation63_spill] sm:$0xff] }
 0x1ce   : > { %v8338_v41 = vpop.f32.mrf.mxu0  ;;  %v2196_v42 = vadd.f32 %v8267_v5, %v1901_v21  ;;  %v9771_v21 = vld [vmem:[#allocation8_spill] sm:$0xff] }
 0x1cf   : > { %9760 = vst [vmem:[#allocation82_spill] sm:$0xff] %v8338_v41  ;;  %v8353_v41 = vpop.f32.mrf.mxu1  ;;  %v2485_v6 = vadd.f32 %v8253_v23, %v2191_v56  ;;  %v2486_v23 = vadd.f32 %v8259_v12, %v2192_v49  ;;  %v2491_v3 = vadd.f32 %v8265_v53, %v2197_v13  ;;  %v2198_v12 = vadd.f32 %v8263_v7, %v1903_v40  ;;  %v9761_v49 = vld [vmem:[#allocation3_spill] sm:$0xff] }
 0x1d0   : > { %v8345_v27 = vpop.f32.mrf.mxu0  ;;  %v2490_v8 = vadd.f32 %v9763_v29, %v2196_v42 }
 0x1d1   : > { %v8368_v63 = vpop.f32.mrf.mxu1  ;;  %v2492_v5 = vadd.f32 %v8284_v60, %v2198_v12  ;;  %v9773_v12 = vld [vmem:[#allocation15_spill] sm:$0xff] }
 0x1d2   : > { %v8349_v0 = vpop.f32.mrf.mxu0 }
 0x1d3   : > { %v8380_v32 = vpop.f32.mrf.mxu1 }
 0x1d4   : > { %v8356_v22 = vpop.f32.mrf.mxu0 }
 0x1d5   : > { %v8402_v53 = vpop.f32.mrf.mxu1 }
 0x1d6   : > { %v6897_v51 = vpop.f32.mrf.mxu0 }
 0x1d7   : > { %v2781_v44 = vadd.f32 %v6897_v51, %v2487_v35  ;;  %v2195_v35 = vadd.f32 %v8261_v19, %v1900_v61  ;;  %v8416_v51 = vadd.f32 %v9761_v49, %v7880_v43  ;;  %v8423_v57 = vpop.f32.mrf.mxu1  ;;  %v9765_v43 = vld [vmem:[#allocation4_spill] sm:$0xff] }
 0x1d8   : > { %v2652_v30 = vpop.f32.mrf.mxu0 }
 0x1d9   : > { %v2820_v28 = vadd.f32 %v8365_v26, %v2781_v44  ;;  %v2779_v10 = vadd.f32 %v2652_v30, %v2485_v6  ;;  %v2489_v4 = vadd.f32 %v8271_v31, %v2195_v35  ;;  %v1034_v6 = vadd.f32 %v9762_v54, %v708_v46  ;;  %v9764_v44 = vld [vmem:[#allocation56_spill] sm:$0xff] }
 0x1da   : > { %v6898_v39 = vpop.f32.mrf.mxu0  ;;  %v2199_v60 = vadd.f32 %v9764_v44, %v1904_v50  ;;  %v9777_v50 = vld [vmem:[#allocation16_spill] sm:$0xff] }
 0x1db   : > { %v2852_v48 = vmax.f32 %v2820_v28, 0.0  ;;  %v2818_v17 = vadd.f32 %v8365_v26, %v2779_v10  ;;  %v2782_v58 = vadd.f32 %v6898_v39, %v2488_v1  ;;  %v9766_v1 = vld [vmem:[#allocation5_spill] sm:$0xff]  ;;  %v9767_v10 = vld [vmem:[#allocation6_spill] sm:$0xff]  ;;  %v2495_v39 = vadd.f32 %v9769_v37, %v2201_v62  ;;  %v9782_v54 = vld [vmem:[#allocation20_spill] sm:$0xff] }
 0x1dc   : > { %v2655_v52 = vpop.f32.mrf.mxu0  ;;  %v1321_v28 = vadd.f32 %v9766_v1, %v9765_v43  ;;  %v1325_v40 = vadd.f32 %v9767_v10, %v1030_v11  ;;  %v9785_v1 = vld [vmem:[#allocation61_spill] sm:$0xff] }
 0x1dd   : > { %2940 = vst.msk [vmem:[#allocation2 + $0x31] sm:$0xff] %vm325_vm1, %v2852_v48  ;;  %v2850_v19 = vmax.f32 %v2818_v17, 0.0  ;;  %v2821_v15 = vadd.f32 %v8365_v26, %v2782_v58  ;;  %v2780_v56 = vadd.f32 %v2655_v52, %v2486_v23  ;;  %v9768_v23 = vld [vmem:[#allocation13_spill] sm:$0xff]  ;;  %v9772_v52 = vld [vmem:[#allocation14_spill] sm:$0xff] }
 0x1de   : > { %v6901_v45 = vpop.f32.mrf.mxu0  ;;  %v1905_v18 = vadd.f32 %v9768_v23, %v1611_v14  ;;  %v9770_v48 = vld [vmem:[#allocation57_spill] sm:$0xff] }
 0x1df   : > { %2938 = vst.msk [vmem:[#allocation2 + $0x19] sm:$0xff] %vm325_vm1, %v2850_v19  ;;  %v2853_v7 = vmax.f32 %v2821_v15, 0.0  ;;  %v2819_v16 = vadd.f32 %v8365_v26, %v2780_v56  ;;  %v2785_v34 = vadd.f32 %v6901_v45, %v2491_v3  ;;  %v2202_v17 = vadd.f32 %v9770_v48, %v1907_v2  ;;  %v9774_v15 = vld [vmem:[#allocation21_spill] sm:$0xff]  ;;  %v9776_v45 = vld [vmem:[#allocation66_spill] sm:$0xff] }
 0x1e0   : > { %v2668_v24 = vpop.f32.mrf.mxu0  ;;  %v8436_v3 = vadd.f32 %v9771_v21, %v1034_v6  ;;  %v1910_v19 = vadd.f32 %v9773_v12, %v9772_v52  ;;  %v1615_v56 = vadd.f32 %v9774_v15, %v1321_v28  ;;  %v2200_v33 = vadd.f32 %v9775_v25, %v1905_v18  ;;  %v9778_v14 = vld [vmem:[#allocation17_spill] sm:$0xff]  ;;  %v9787_v52 = vld [vmem:[#allocation74_spill] sm:$0xff] }
 0x1e1   : > { %2941 = vst.msk [vmem:[#allocation2 + $0x39] sm:$0xff] %vm325_vm1, %v2853_v7  ;;  %v2851_v31 = vmax.f32 %v2819_v16, 0.0  ;;  %v2824_v47 = vadd.f32 %v8365_v26, %v2785_v34  ;;  %v2783_v59 = vadd.f32 %v2668_v24, %v2489_v4  ;;  %v2493_v4 = vadd.f32 %v9776_v45, %v2199_v60  ;;  %v8443_v7 = vpop.f32.mrf.mxu1  ;;  %v9779_v24 = vld [vmem:[#allocation18_spill] sm:$0xff]  ;;  %v9783_v2 = vld [vmem:[#allocation69_spill] sm:$0xff] }
 0x1e2   : > { %v6902_v36 = vpop.f32.mrf.mxu0  ;;  %v1908_v62 = vadd.f32 %v9778_v14, %v9777_v50  ;;  %v3592_v6 = vsel %vm374_vm0, %v9782_v54, 0  ;;  %v2496_v29 = vadd.f32 %v9783_v2, %v2202_v17  ;;  %v2494_v43 = vadd.f32 %v8314_v9, %v2200_v33  ;;  %v9789_v50 = vld [vmem:[#allocation23_spill] sm:$0xff]  ;;  %v9790_v14 = vld [vmem:[#allocation24_spill] sm:$0xff]  ;;  %v9793_v54 = vld [vmem:[#allocation77_spill] sm:$0xff] }
 0x1e3   : > { %2939 = vst.msk [vmem:[#allocation2 + $0x21] sm:$0xff] %vm325_vm1, %v2851_v31  ;;  %v2856_v13 = vmax.f32 %v2824_v47, 0.0  ;;  %v2822_v30 = vadd.f32 %v8365_v26, %v2783_v59  ;;  %v2786_v61 = vadd.f32 %v6902_v36, %v2492_v5  ;;  %v9780_v5 = vld [vmem:[#allocation19_spill] sm:$0xff]  ;;  %v8462_v48 = vpop.f32.mrf.mxu1 }
 0x1e4   : > { %v2671_v35 = vpop.f32.mrf.mxu0  ;;  %v1911_v31 = vadd.f32 %v9780_v5, %v9779_v24  ;;  %v9781_v47 = vld [vmem:[#allocation59_spill] sm:$0xff]  ;;  %v2203_v28 = vadd.f32 %v9785_v1, %v1908_v62  ;;  %v1914_v62 = vadd.f32 %v9790_v14, %v9789_v50  ;;  %v9791_v24 = vld [vmem:[#allocation29_spill] sm:$0xff] }
 0x1e5   : > { %2944 = vst.msk [vmem:[#allocation2 + $0x61] sm:$0xff] %vm325_vm1, %v2856_v13  ;;  %v2854_v58 = vmax.f32 %v2822_v30, 0.0  ;;  %v2825_v20 = vadd.f32 %v8365_v26, %v2786_v61  ;;  %v2784_v46 = vadd.f32 %v2671_v35, %v2490_v8  ;;  %v2205_v59 = vadd.f32 %v9781_v47, %v1910_v19  ;;  %v9784_v30 = vld [vmem:[#allocation22_spill] sm:$0xff]  ;;  %v3023_v21 = vld [vmem:[#allocation2 + $0x31] sm:$0xff] }
 0x1e6   : > { %v6905_v42 = vpop.f32.mrf.mxu0  ;;  %v3021_v60 = vld [vmem:[#allocation2 + $0x19] sm:$0xff]  ;;  %v1909_v61 = vadd.f32 %v9784_v30, %v1615_v56  ;;  %v9788_v19 = vld [vmem:[#allocation62_spill] sm:$0xff]  ;;  %v1619_v5 = vadd.f32 %v9791_v24, %v1325_v40  ;;  %v2497_v2 = vadd.f32 %v9793_v54, %v2203_v28 }
 0x1e7   : > { %2942 = vst.msk [vmem:[#allocation2 + $0x49] sm:$0xff] %vm325_vm1, %v2854_v58  ;;  %v2857_v16 = vmax.f32 %v2825_v20, 0.0  ;;  %v2823_v34 = vadd.f32 %v8365_v26, %v2784_v46  ;;  %v2789_v11 = vadd.f32 %v6905_v42, %v2495_v39  ;;  %v9786_v39 = vld [vmem:[#allocation55_spill] sm:$0xff]  ;;  %v2972_v9 = vld [vmem:[#allocation2 + $0x18] sm:$0xff]  ;;  %v2499_v12 = vadd.f32 %v9787_v52, %v2205_v59 }
 0x1e8   : > { %v2684_v49 = vpop.f32.mrf.mxu0  ;;  %v3024_v13 = vld [vmem:[#allocation2 + $0x39] sm:$0xff]  ;;  %v3886_v35 = vsel %vm374_vm0, %v9786_v39, 0  ;;  %v2206_v15 = vadd.f32 %v9788_v19, %v1911_v31  ;;  %v2974_v42 = vld [vmem:[#allocation2 + $0x30] sm:$0xff] }
 0x1e9   : > { %2945 = vst.msk [vmem:[#allocation2 + $0x69] sm:$0xff] %vm325_vm1, %v2857_v16  ;;  %v2855_v8 = vmax.f32 %v2823_v34, 0.0  ;;  %v2828_v36 = vadd.f32 %v8365_v26, %v2789_v11  ;;  %v2787_v44 = vadd.f32 %v2684_v49, %v2493_v4  ;;  %v2975_v37 = vld [vmem:[#allocation2 + $0x38] sm:$0xff]  ;;  %v8472_v33 = vpack.c.bf16 %v3024_v13, %v3023_v21  ;;  %v8483_v11 = vld [vmem:[%s9676_s3 + $0x10] sm:$0xf]  ;;  %v9796_v13 = vld [vmem:[#allocation26_spill] sm:$0xff] }
 0x1ea   : > { %v6906_v10 = vpop.f32.mrf.mxu0  ;;  %v3022_v23 = vld [vmem:[#allocation2 + $0x21] sm:$0xff]  ;;  %v8478_v34 = vpack.c.bf16 %v2975_v37, %v2974_v42  ;;  %v9792_v31 = vld [vmem:[#allocation64_spill] sm:$0xff]  ;;  %v8494_v49 = vld [vmem:[%s9676_s3 + $0x14] sm:$0xf] }
 0x1eb   : > { %v2973_v18 = vld [vmem:[#allocation2 + $0x20] sm:$0xff]  ;;  %2943 = vst.msk [vmem:[#allocation2 + $0x51] sm:$0xff] %vm325_vm1, %v2855_v8  ;;  %v2860_v17 = vmax.f32 %v2828_v36, 0.0  ;;  %v2826_v58 = vadd.f32 %v8365_v26, %v2787_v44  ;;  %v2790_v20 = vadd.f32 %v6906_v10, %v2496_v29  ;;  %v8466_v46 = vpack.c.bf16 %v3022_v23, %v3021_v60  ;;  %v8497_v29 = vpop.f32.mrf.mxu1  ;;  %v9798_v28 = vld [vmem:[#allocation80_spill] sm:$0xff]  ;;  %v9802_v52 = vld [vmem:[#allocation67_spill] sm:$0xff] }
 0x1ec   : > { %v2687_v56 = vpop.f32.mrf.mxu0  ;;  %v8470_v25 = vpack.c.bf16 %v2973_v18, %v2972_v9  ;;  %v2204_v47 = vadd.f32 %v9792_v31, %v1909_v61  ;;  %v9795_v60 = vld [vmem:[#allocation25_spill] sm:$0xff]  ;;  %v2500_v10 = vadd.f32 %v9798_v28, %v2206_v15 }
 0x1ed   : > { %2948 = vst.msk [vmem:[#allocation2 + $0x91] sm:$0xff] %vm325_vm1, %v2860_v17  ;;  %v2858_v45 = vmax.f32 %v2826_v58, 0.0  ;;  %v2829_v4 = vadd.f32 %v8365_v26, %v2790_v20  ;;  %v2788_v16 = vadd.f32 %v2687_v56, %v2494_v43  ;;  %6930 = vmatmul.mubr.msk.bf16.vlgmr.msra.gmra.mxu1 %vm325_vm1, %v8466_v46  ;;  %v1912_v30 = vadd.f32 %v9796_v13, %v9795_v60  ;;  %v9797_v61 = vld [vmem:[#allocation65_spill] sm:$0xff]  ;;  %v9799_v17 = vld [vmem:[#allocation27_spill] sm:$0xff]  ;;  %v9800_v58 = vld [vmem:[#allocation28_spill] sm:$0xff] }
 0x1ee   : > { %6964 = vmatmul.mubr.msk.bf16.vlgmr.msra.gmra.mxu0 %vm325_vm1, %v8470_v25  ;;  %6996 = vmatpush3.bf16.msra.mxu1 %v3592_v6  ;;  %v6909_v59 = vpop.f32.mrf.mxu0  ;;  %v9794_v6 = vld [vmem:[#allocation9_spill] sm:$0xff]  ;;  %v2209_v43 = vadd.f32 %v9797_v61, %v1914_v62  ;;  %v3025_v39 = vld [vmem:[#allocation2 + $0x49] sm:$0xff]  ;;  %v1915_v20 = vadd.f32 %v9800_v58, %v9799_v17  ;;  %v2498_v21 = vadd.f32 %v8342_v38, %v2204_v47  ;;  %v9805_v60 = vld [vmem:[#allocation32_spill] sm:$0xff] }
 0x1ef   : > { %2946 = vst.msk [vmem:[#allocation2 + $0x79] sm:$0xff] %vm325_vm1, %v2858_v45  ;;  %v2861_v8 = vmax.f32 %v2829_v4, 0.0  ;;  %v2827_v40 = vadd.f32 %v8365_v26, %v2788_v16  ;;  %v2793_v36 = vadd.f32 %v6909_v59, %v2499_v12  ;;  %6933 = vmatprep.mubr.msk.bf16.mxu1 %vm325_vm1, %v8472_v33  ;;  %6967 = vmatprep.mubr.msk.bf16.mxu0 %vm325_vm1, %v8478_v34  ;;  %v8522_v45 = vpop.f32.mrf.mxu1  ;;  %v2976_v62 = vld [vmem:[#allocation2 + $0x48] sm:$0xff]  ;;  %v9809_v17 = vld [vmem:[#allocation11_spill] sm:$0xff] }
 0x1f0   : > { %v1038_v44 = vadd.f32 %v9794_v6, %v8394_v55  ;;  %v2700_v1 = vpop.f32.mrf.mxu0  ;;  %7030 = vmatpush3.bf16.msra.mxu0 %v3886_v35  ;;  %7246 = vmatprep.subr.msk.bf16.mxu1 %vm374_vm0, %v8483_v11  ;;  %v3028_v55 = vld [vmem:[#allocation2 + $0x69] sm:$0xff]  ;;  %v2207_v12 = vadd.f32 %v9802_v52, %v1912_v30  ;;  %v3027_v24 = vld [vmem:[#allocation2 + $0x61] sm:$0xff]  ;;  %v2503_v38 = vadd.f32 %v8353_v41, %v2209_v43 }
 0x1f1   : > { %2949 = vst.msk [vmem:[#allocation2 + $0x99] sm:$0xff] %vm325_vm1, %v2861_v8  ;;  %v2859_v23 = vmax.f32 %v2827_v40, 0.0  ;;  %v2832_v18 = vadd.f32 %v8365_v26, %v2793_v36  ;;  %v2791_v37 = vadd.f32 %v2700_v1, %v2497_v2  ;;  %7247 = vmatprep.subr.msk.bf16.mxu0 %vm374_vm0, %v8494_v49  ;;  %v9801_v35 = vld [vmem:[#allocation30_spill] sm:$0xff]  ;;  %v8532_v54 = vpack.c.bf16 %v3028_v55, %v3027_v24  ;;  %v2978_v2 = vld [vmem:[#allocation2 + $0x60] sm:$0xff]  ;;  %v9804_v41 = vld [vmem:[#allocation31_spill] sm:$0xff] }
 0x1f2   : > { %v1913_v9 = vadd.f32 %v9801_v35, %v1619_v5  ;;  %v6910_v19 = vpop.f32.mrf.mxu0  ;;  %v3026_v15 = vld [vmem:[#allocation2 + $0x51] sm:$0xff]  ;;  %v2979_v42 = vld [vmem:[#allocation2 + $0x68] sm:$0xff]  ;;  %v1918_v13 = vadd.f32 %v9805_v60, %v9804_v41  ;;  %v9806_v30 = vld [vmem:[#allocation37_spill] sm:$0xff]  ;;  %v1042_v58 = vadd.f32 %v9809_v17, %v8416_v51 }
 0x1f3   : > { %v2977_v56 = vld [vmem:[#allocation2 + $0x50] sm:$0xff]  ;;  %2947 = vst.msk [vmem:[#allocation2 + $0x81] sm:$0xff] %vm325_vm1, %v2859_v23  ;;  %v2864_v4 = vmax.f32 %v2832_v18, 0.0  ;;  %v2830_v16 = vadd.f32 %v8365_v26, %v2791_v37  ;;  %v2794_v50 = vadd.f32 %v6910_v19, %v2500_v10  ;;  %v8526_v14 = vpack.c.bf16 %v3026_v15, %v3025_v39  ;;  %v9803_v5 = vld [vmem:[#allocation68_spill] sm:$0xff]  ;;  %v9807_v43 = vld [vmem:[#allocation70_spill] sm:$0xff]  ;;  %v8550_v23 = vpop.f32.mrf.mxu1 }
 0x1f4   : > { %v2210_v31 = vadd.f32 %v9803_v5, %v1915_v20  ;;  %v2703_v47 = vpop.f32.mrf.mxu0  ;;  %v8530_v59 = vpack.c.bf16 %v2977_v56, %v2976_v62  ;;  %v8538_v6 = vpack.c.bf16 %v2979_v42, %v2978_v2  ;;  %v1623_v61 = vadd.f32 %v9806_v30, %v8436_v3  ;;  %v9808_v3 = vld [vmem:[#allocation10_spill] sm:$0xff]  ;;  %v9810_v20 = vld [vmem:[#allocation33_spill] sm:$0xff]  ;;  %v3031_v30 = vld [vmem:[#allocation2 + $0x91] sm:$0xff] }
 0x1f5   : > { %2952 = vst.msk [vmem:[#allocation2 + $0xc1] sm:$0xff] %vm325_vm1, %v2864_v4  ;;  %v2862_v8 = vmax.f32 %v2830_v16, 0.0  ;;  %v2833_v40 = vadd.f32 %v8365_v26, %v2794_v50  ;;  %v2792_v36 = vadd.f32 %v2703_v47, %v2498_v21  ;;  %6934 = vmatmul.mubr.msk.bf16.gmra.mxu1 %vm325_vm1, %v8526_v14  ;;  %v2208_v1 = vadd.f32 %v9807_v43, %v1913_v9  ;;  %v9811_v35 = vld [vmem:[#allocation34_spill] sm:$0xff]  ;;  %v9814_v16 = vld [vmem:[#allocation36_spill] sm:$0xff] }
 0x1f6   : > { %6968 = vmatmul.mubr.msk.bf16.gmra.mxu0 %vm325_vm1, %v8530_v59  ;;  %v6913_v28 = vpop.f32.mrf.mxu0  ;;  %6937 = vmatprep.mubr.msk.bf16.mxu1 %vm325_vm1, %v8532_v54  ;;  %v2501_v10 = vadd.f32 %v8368_v63, %v2207_v12  ;;  %v1333_v55 = vadd.f32 %v9808_v3, %v1038_v44  ;;  %v1916_v9 = vadd.f32 %v9811_v35, %v9810_v20  ;;  %v9812_v63 = vld [vmem:[#allocation71_spill] sm:$0xff]  ;;  %v3029_v42 = vld [vmem:[#allocation2 + $0x79] sm:$0xff]  ;;  %v9815_v51 = vld [vmem:[#allocation38_spill] sm:$0xff] }
 0x1f7   : > { %2950 = vst.msk [vmem:[#allocation2 + $0xa9] sm:$0xff] %vm325_vm1, %v2862_v8  ;;  %v2865_v18 = vmax.f32 %v2833_v40, 0.0  ;;  %v2831_v37 = vadd.f32 %v8365_v26, %v2792_v36  ;;  %v2797_v39 = vadd.f32 %v6913_v28, %v2503_v38  ;;  %6971 = vmatprep.mubr.msk.bf16.mxu0 %vm325_vm1, %v8538_v6  ;;  %v2213_v21 = vadd.f32 %v9812_v63, %v1918_v13  ;;  %v9813_v44 = vld [vmem:[#allocation35_spill] sm:$0xff]  ;;  %v9816_v38 = vld [vmem:[#allocation72_spill] sm:$0xff]  ;;  %v8570_v8 = vpop.f32.mrf.mxu1 }
 0x1f8   : > { %v2716_v52 = vpop.f32.mrf.mxu0  ;;  %v2504_v12 = vadd.f32 %v8380_v32, %v2210_v31  ;;  %v3032_v4 = vld [vmem:[#allocation2 + $0x99] sm:$0xff]  ;;  %v1919_v50 = vadd.f32 %v9814_v16, %v9813_v44  ;;  %v1917_v62 = vadd.f32 %v9815_v51, %v1623_v61  ;;  %v2502_v24 = vadd.f32 %v8402_v53, %v2208_v1 }
 0x1f9   : > { %2953 = vst.msk [vmem:[#allocation2 + $0xc9] sm:$0xff] %vm325_vm1, %v2865_v18  ;;  %v2863_v19 = vmax.f32 %v2831_v37, 0.0  ;;  %v2836_v15 = vadd.f32 %v8365_v26, %v2797_v39  ;;  %v2795_v56 = vadd.f32 %v2716_v52, %v2501_v10  ;;  %v2211_v5 = vadd.f32 %v9816_v38, %v1916_v9  ;;  %v2983_v31 = vld [vmem:[#allocation2 + $0x98] sm:$0xff]  ;;  %v9817_v61 = vld [vmem:[#allocation73_spill] sm:$0xff]  ;;  %v2982_v18 = vld [vmem:[#allocation2 + $0x90] sm:$0xff] }
 0x1fa   : > { %v6914_v47 = vpop.f32.mrf.mxu0  ;;  %v3030_v2 = vld [vmem:[#allocation2 + $0x81] sm:$0xff]  ;;  %v2980_v13 = vld [vmem:[#allocation2 + $0x78] sm:$0xff]  ;;  %v2507_v53 = vadd.f32 %v8423_v57, %v2213_v21  ;;  %v2214_v43 = vadd.f32 %v9817_v61, %v1919_v50  ;;  %v8580_v10 = vpack.c.bf16 %v3032_v4, %v3031_v30  ;;  %v8586_v17 = vpack.c.bf16 %v2983_v31, %v2982_v18  ;;  %v9818_v57 = vld [vmem:[#allocation39_spill] sm:$0xff] }
 0x1fb   : > { %v2981_v32 = vld [vmem:[#allocation2 + $0x80] sm:$0xff]  ;;  %2951 = vst.msk [vmem:[#allocation2 + $0xb1] sm:$0xff] %vm325_vm1, %v2863_v19  ;;  %v2868_v40 = vmax.f32 %v2836_v15, 0.0  ;;  %v2834_v36 = vadd.f32 %v8365_v26, %v2795_v56  ;;  %v2798_v41 = vadd.f32 %v6914_v47, %v2504_v12  ;;  %v8574_v60 = vpack.c.bf16 %v3030_v2, %v3029_v42  ;;  %v9819_v20 = vld [vmem:[#allocation40_spill] sm:$0xff]  ;;  %v9821_v21 = vld [vmem:[#allocation75_spill] sm:$0xff]  ;;  %v8597_v15 = vpop.f32.mrf.mxu1 }
 0x1fc   : > { %v2719_v1 = vpop.f32.mrf.mxu0  ;;  %v8578_v28 = vpack.c.bf16 %v2981_v32, %v2980_v13  ;;  %v1922_v35 = vadd.f32 %v9819_v20, %v9818_v57  ;;  %v9820_v9 = vld [vmem:[#allocation45_spill] sm:$0xff]  ;;  %v2212_v52 = vadd.f32 %v9821_v21, %v1917_v62  ;;  %v2505_v19 = vadd.f32 %v8443_v7, %v2211_v5  ;;  %v9824_v50 = vld [vmem:[#allocation42_spill] sm:$0xff]  ;;  %v9825_v62 = vld [vmem:[#allocation76_spill] sm:$0xff] }
 0x1fd   : > { %2956 = vst.msk [vmem:[#allocation2 + $0xf1] sm:$0xff] %vm325_vm1, %v2868_v40  ;;  %v2866_v37 = vmax.f32 %v2834_v36, 0.0  ;;  %v2837_v39 = vadd.f32 %v8365_v26, %v2798_v41  ;;  %v2796_v3 = vadd.f32 %v2719_v1, %v2502_v24  ;;  %6938 = vmatmul.mubr.msk.bf16.gmra.mxu1 %vm325_vm1, %v8574_v60  ;;  %v1627_v63 = vadd.f32 %v9820_v9, %v1333_v55  ;;  %v9822_v55 = vld [vmem:[#allocation12_spill] sm:$0xff]  ;;  %v9823_v16 = vld [vmem:[#allocation41_spill] sm:$0xff]  ;;  %v9826_v40 = vld [vmem:[#allocation43_spill] sm:$0xff] }
 0x1fe   : > { %6972 = vmatmul.mubr.msk.bf16.gmra.mxu0 %vm325_vm1, %v8578_v28  ;;  %v6917_v12 = vpop.f32.mrf.mxu0  ;;  %6941 = vmatprep.mubr.msk.bf16.mxu1 %vm325_vm1, %v8580_v10  ;;  %v1337_v44 = vadd.f32 %v9822_v55, %v1042_v58  ;;  %v1920_v51 = vadd.f32 %v9824_v50, %v9823_v16  ;;  %v2217_v24 = vadd.f32 %v9825_v62, %v1922_v35  ;;  %v3033_v32 = vld [vmem:[#allocation2 + $0xa9] sm:$0xff]  ;;  %v9827_v36 = vld [vmem:[#allocation44_spill] sm:$0xff]  ;;  %v3035_v9 = vld [vmem:[#allocation2 + $0xc1] sm:$0xff] }
 0x1ff   : > { %2954 = vst.msk [vmem:[#allocation2 + $0xd9] sm:$0xff] %vm325_vm1, %v2866_v37  ;;  %v2869_v56 = vmax.f32 %v2837_v39, 0.0  ;;  %v2835_v42 = vadd.f32 %v8365_v26, %v2796_v3  ;;  %v2801_v4 = vadd.f32 %v6917_v12, %v2507_v53  ;;  %6975 = vmatprep.mubr.msk.bf16.mxu0 %vm325_vm1, %v8586_v17  ;;  %v2508_v7 = vadd.f32 %v8462_v48, %v2214_v43  ;;  %v9828_v58 = vld [vmem:[#allocation46_spill] sm:$0xff]  ;;  %v6891_v37 = vpop.f32.mrf.mxu1  ;;  %v9832_v50 = vld [vmem:[#allocation48_spill] sm:$0xff]  ;;  %v9833_v62 = vld [vmem:[#allocation53_spill] sm:$0xff] }
 0x200   : > { %v2732_v38 = vpop.f32.mrf.mxu0  ;;  %v3036_v31 = vld [vmem:[#allocation2 + $0xc9] sm:$0xff]  ;;  %v1923_v41 = vadd.f32 %v9827_v36, %v9826_v40  ;;  %v1921_v13 = vadd.f32 %v9828_v58, %v1627_v63  ;;  %v2506_v30 = vadd.f32 %v8497_v29, %v2212_v52  ;;  %v2511_v63 = vadd.f32 %v8522_v45, %v2217_v24 }
 0x201   : > { %2957 = vst.msk [vmem:[#allocation2 + $0xf9] sm:$0xff] %vm325_vm1, %v2869_v56  ;;  %v2867_v5 = vmax.f32 %v2835_v42, 0.0  ;;  %v2840_v47 = vadd.f32 %v8365_v26, %v2801_v4  ;;  %v2799_v2 = vadd.f32 %v2732_v38, %v2505_v19  ;;  %v9829_v53 = vld [vmem:[#allocation78_spill] sm:$0xff]  ;;  %v9830_v29 = vld [vmem:[#allocation79_spill] sm:$0xff]  ;;  %v8623_v19 = vpack.c.bf16 %v3036_v31, %v3035_v9  ;;  %v2986_v56 = vld [vmem:[#allocation2 + $0xc0] sm:$0xff] }
 0x202   : > { %v2215_v61 = vadd.f32 %v9829_v53, %v1920_v51  ;;  %v6918_v1 = vpop.f32.mrf.mxu0  ;;  %v3034_v18 = vld [vmem:[#allocation2 + $0xb1] sm:$0xff]  ;;  %v2987_v43 = vld [vmem:[#allocation2 + $0xc8] sm:$0xff]  ;;  %v2218_v21 = vadd.f32 %v9830_v29, %v1923_v41  ;;  %v1631_v24 = vadd.f32 %v9833_v62, %v1337_v44  ;;  %v9834_v38 = vld [vmem:[#allocation81_spill] sm:$0xff] }
 0x203   : > { %v2985_v48 = vld [vmem:[#allocation2 + $0xb0] sm:$0xff]  ;;  %2955 = vst.msk [vmem:[#allocation2 + $0xe1] sm:$0xff] %vm325_vm1, %v2867_v5  ;;  %v2872_v39 = vmax.f32 %v2840_v47, 0.0  ;;  %v2838_v3 = vadd.f32 %v8365_v26, %v2799_v2  ;;  %v2802_v57 = vadd.f32 %v6918_v1, %v2508_v7  ;;  %v8617_v20 = vpack.c.bf16 %v3034_v18, %v3033_v32  ;;  %v2984_v35 = vld [vmem:[#allocation2 + $0xa8] sm:$0xff]  ;;  %v2470_v2 = vpop.f32.mrf.mxu1  ;;  %v9835_v44 = vld [vmem:[#allocation49_spill] sm:$0xff] }
 0x204   : > { %v2735_v52 = vpop.f32.mrf.mxu0  ;;  %v8621_v12 = vpack.c.bf16 %v2985_v48, %v2984_v35  ;;  %v8629_v16 = vpack.c.bf16 %v2987_v43, %v2986_v56  ;;  %v9831_v45 = vld [vmem:[#allocation47_spill] sm:$0xff]  ;;  %v2216_v7 = vadd.f32 %v9834_v38, %v1921_v13  ;;  %v2509_v47 = vadd.f32 %v8550_v23, %v2215_v61  ;;  %v9836_v36 = vld [vmem:[#allocation50_spill] sm:$0xff] }
 0x205   : > { %2960 = vst.msk [vmem:[#allocation2 + $0x121] sm:$0xff] %vm325_vm1, %v2872_v39  ;;  %v2870_v42 = vmax.f32 %v2838_v3, 0.0  ;;  %v2841_v4 = vadd.f32 %v8365_v26, %v2802_v57  ;;  %v2800_v55 = vadd.f32 %v2735_v52, %v2506_v30  ;;  %6942 = vmatmul.mubr.msk.bf16.gmra.mxu1 %vm325_vm1, %v8617_v20  ;;  %v1926_v51 = vadd.f32 %v9832_v50, %v9831_v45  ;;  %v9837_v58 = vld [vmem:[#allocation82_spill] sm:$0xff]  ;;  %v9838_v43 = vld [vmem:[#allocation51_spill] sm:$0xff]  ;;  %v9839_v39 = vld [vmem:[#allocation52_spill] sm:$0xff]  ;;  %v6892_v56 = vpop.f32.mrf.mxu1 }
 0x206   : > { %6976 = vmatmul.mubr.msk.bf16.gmra.mxu0 %vm325_vm1, %v8621_v12  ;;  %v6921_v5 = vpop.f32.mrf.mxu0  ;;  %6945 = vmatprep.mubr.msk.bf16.mxu1 %vm325_vm1, %v8623_v19  ;;  %v1924_v41 = vadd.f32 %v9836_v36, %v9835_v44  ;;  %v2512_v53 = vadd.f32 %v8570_v8, %v2218_v21  ;;  %v3037_v18 = vld [vmem:[#allocation2 + $0xd9] sm:$0xff]  ;;  %v1927_v3 = vadd.f32 %v9839_v39, %v9838_v43  ;;  %v9840_v57 = vld [vmem:[#allocation54_spill] sm:$0xff] }
 0x207   : > { %2958 = vst.msk [vmem:[#allocation2 + $0x109] sm:$0xff] %vm325_vm1, %v2870_v42  ;;  %v2873_v32 = vmax.f32 %v2841_v4, 0.0  ;;  %v2839_v31 = vadd.f32 %v8365_v26, %v2800_v55  ;;  %v2805_v40 = vadd.f32 %v6921_v5, %v2511_v63  ;;  %6979 = vmatprep.mubr.msk.bf16.mxu0 %vm325_vm1, %v8629_v16  ;;  %v2221_v13 = vadd.f32 %v9837_v58, %v1926_v51  ;;  %v2988_v50 = vld [vmem:[#allocation2 + $0xd8] sm:$0xff]  ;;  %v2473_v44 = vpop.f32.mrf.mxu1 }
 0x208   : > { %v2748_v30 = vpop.f32.mrf.mxu0  ;;  %v3040_v48 = vld [vmem:[#allocation2 + $0xf9] sm:$0xff]  ;;  %v1925_v35 = vadd.f32 %v9840_v57, %v1631_v24  ;;  %v2510_v9 = vadd.f32 %v8597_v15, %v2216_v7  ;;  %v2219_v63 = vadd.f32 %v8345_v27, %v1924_v41  ;;  %v3039_v51 = vld [vmem:[#allocation2 + $0xf1] sm:$0xff]  ;;  %v2222_v15 = vadd.f32 %v8349_v0, %v1927_v3 }
 0x209   : > { %2961 = vst.msk [vmem:[#allocation2 + $0x129] sm:$0xff] %vm325_vm1, %v2873_v32  ;;  %v2871_v23 = vmax.f32 %v2839_v31, 0.0  ;;  %v2844_v61 = vadd.f32 %v8365_v26, %v2805_v40  ;;  %v2803_v1 = vadd.f32 %v2748_v30, %v2509_v47  ;;  %v2991_v21 = vld [vmem:[#allocation2 + $0xf8] sm:$0xff]  ;;  %v2515_v62 = vadd.f32 %v6891_v37, %v2221_v13  ;;  %v2990_v7 = vld [vmem:[#allocation2 + $0xf0] sm:$0xff] }
 0x20a   : > { %v6922_v29 = vpop.f32.mrf.mxu0  ;;  %v3038_v52 = vld [vmem:[#allocation2 + $0xe1] sm:$0xff]  ;;  %v8662_v38 = vpack.c.bf16 %v3040_v48, %v3039_v51  ;;  %v8668_v31 = vpack.c.bf16 %v2991_v21, %v2990_v7  ;;  %v2220_v37 = vadd.f32 %v8356_v22, %v1925_v35  ;;  %v2513_v40 = vadd.f32 %v2470_v2, %v2219_v63 }
 0x20b   : > { %v2989_v8 = vld [vmem:[#allocation2 + $0xe0] sm:$0xff]  ;;  %2959 = vst.msk [vmem:[#allocation2 + $0x111] sm:$0xff] %vm325_vm1, %v2871_v23  ;;  %v2876_v42 = vmax.f32 %v2844_v61, 0.0  ;;  %v2842_v4 = vadd.f32 %v8365_v26, %v2803_v1  ;;  %v2806_v55 = vadd.f32 %v6922_v29, %v2512_v53  ;;  %v8657_v45 = vpack.c.bf16 %v3038_v52, %v3037_v18 }
 0x20c   : > { %v2751_v24 = vpop.f32.mrf.mxu0  ;;  %v8660_v27 = vpack.c.bf16 %v2989_v8, %v2988_v50  ;;  %v2516_v22 = vadd.f32 %v6892_v56, %v2222_v15  ;;  %v2514_v1 = vadd.f32 %v2473_v44, %v2220_v37  ;;  %v3043_v29 = vld [vmem:[#allocation2 + $0x121] sm:$0xff] }
 0x20d   : > { %2964 = vst.msk [vmem:[#allocation2 + $0x151] sm:$0xff] %vm325_vm1, %v2876_v42  ;;  %v2874_v5 = vmax.f32 %v2842_v4, 0.0  ;;  %v2845_v47 = vadd.f32 %v8365_v26, %v2806_v55  ;;  %v2804_v32 = vadd.f32 %v2751_v24, %v2510_v9  ;;  %6946 = vmatmul.mubr.msk.bf16.gmra.mxu1 %vm325_vm1, %v8657_v45  ;;  %v2994_v56 = vld [vmem:[#allocation2 + $0x120] sm:$0xff] }
 0x20e   : > { %6980 = vmatmul.mubr.msk.bf16.gmra.mxu0 %vm325_vm1, %v8660_v27  ;;  %v6925_v0 = vpop.f32.mrf.mxu0  ;;  %6949 = vmatprep.mubr.msk.bf16.mxu1 %vm325_vm1, %v8662_v38  ;;  %v3041_v61 = vld [vmem:[#allocation2 + $0x109] sm:$0xff] }
 0x20f   : > { %2962 = vst.msk [vmem:[#allocation2 + $0x139] sm:$0xff] %vm325_vm1, %v2874_v5  ;;  %v2877_v36 = vmax.f32 %v2845_v47, 0.0  ;;  %v2843_v41 = vadd.f32 %v8365_v26, %v2804_v32  ;;  %v2809_v58 = vadd.f32 %v6925_v0, %v2515_v62  ;;  %6983 = vmatprep.mubr.msk.bf16.mxu0 %vm325_vm1, %v8668_v31  ;;  %v2992_v63 = vld [vmem:[#allocation2 + $0x108] sm:$0xff] }
 0x210   : > { %v2764_v13 = vpop.f32.mrf.mxu0  ;;  %v3044_v2 = vld [vmem:[#allocation2 + $0x129] sm:$0xff] }
 0x211   : > { %2965 = vst.msk [vmem:[#allocation2 + $0x159] sm:$0xff] %vm325_vm1, %v2877_v36  ;;  %v2875_v30 = vmax.f32 %v2843_v41, 0.0  ;;  %v2848_v53 = vadd.f32 %v8365_v26, %v2809_v58  ;;  %v2807_v23 = vadd.f32 %v2764_v13, %v2513_v40  ;;  %v2995_v39 = vld [vmem:[#allocation2 + $0x128] sm:$0xff]  ;;  %v8687_v21 = vpack.c.bf16 %v3044_v2, %v3043_v29  ;;  %v3500_v29 = vld [vmem:[#allocation2 + $0x52] sm:$0xff] }
 0x212   : > { %v6926_v18 = vpop.f32.mrf.mxu0  ;;  %v3042_v48 = vld [vmem:[#allocation2 + $0x111] sm:$0xff]  ;;  %v8693_v50 = vpack.c.bf16 %v2995_v39, %v2994_v56  ;;  %v3493_v58 = vld [vmem:[#allocation2 + $0x2] sm:$0xff]  ;;  %v3498_v39 = vld [vmem:[#allocation2 + $0x3a] sm:$0xff] }
 0x213   : > { %v2993_v43 = vld [vmem:[#allocation2 + $0x110] sm:$0xff]  ;;  %2963 = vst.msk [vmem:[#allocation2 + $0x141] sm:$0xff] %vm325_vm1, %v2875_v30  ;;  %v2880_v3 = vmax.f32 %v2848_v53, 0.0  ;;  %v2846_v57 = vadd.f32 %v8365_v26, %v2807_v23  ;;  %v2810_v35 = vadd.f32 %v6926_v18, %v2516_v22  ;;  %v8683_v9 = vpack.c.bf16 %v3042_v48, %v3041_v61  ;;  %v3495_v18 = vld [vmem:[#allocation2 + $0x1a] sm:$0xff]  ;;  %v3496_v48 = vld [vmem:[#allocation2 + $0x22] sm:$0xff] }
 0x214   : > { %v2767_v52 = vpop.f32.mrf.mxu0  ;;  %v8685_v8 = vpack.c.bf16 %v2993_v43, %v2992_v63  ;;  %v3047_v44 = vld [vmem:[#allocation2 + $0x151] sm:$0xff]  ;;  %v4474_v63 = vsel %vm374_vm0, %v8494_v49, 0 }
 0x215   : > { %2968 = vst.msk [vmem:[#allocation2 + $0x181] sm:$0xff] %vm325_vm1, %v2880_v3  ;;  %v2878_v42 = vmax.f32 %v2846_v57, 0.0  ;;  %v2849_v4 = vadd.f32 %v8365_v26, %v2810_v35  ;;  %v2808_v55 = vadd.f32 %v2767_v52, %v2514_v1  ;;  %6950 = vmatmul.mubr.msk.bf16.gmra.mxu1 %vm325_vm1, %v8683_v9  ;;  %v2998_v36 = vld [vmem:[#allocation2 + $0x150] sm:$0xff]  ;;  %v8732_v3 = vpack.c.bf16 %v3496_v48, %v3495_v18  ;;  %v3501_v52 = vld [vmem:[#allocation2 + $0x62] sm:$0xff] }
 0x216   : > { %6984 = vmatmul.mubr.msk.bf16.gmra.mxu0 %vm325_vm1, %v8685_v8  ;;  %6953 = vmatprep.mubr.msk.bf16.mxu1 %vm325_vm1, %v8687_v21  ;;  %v3045_v24 = vld [vmem:[#allocation2 + $0x139] sm:$0xff]  ;;  %v3494_v13 = vld [vmem:[#allocation2 + $0xa] sm:$0xff]  ;;  %v4180_v57 = vsel %vm374_vm0, %v8483_v11, 0  ;;  %v3517_v48 = vld [vmem:[#allocation2 + $0x122] sm:$0xff] }
 0x217   : > { %2966 = vst.msk [vmem:[#allocation2 + $0x169] sm:$0xff] %vm325_vm1, %v2878_v42  ;;  %v2881_v51 = vmax.f32 %v2849_v4, 0.0  ;;  %v2847_v62 = vadd.f32 %v8365_v26, %v2808_v55  ;;  %6987 = vmatprep.mubr.msk.bf16.mxu0 %vm325_vm1, %v8693_v50  ;;  %v2996_v7 = vld [vmem:[#allocation2 + $0x138] sm:$0xff]  ;;  %v3525_v61 = vpack.c.bf16 %v3494_v13, %v3493_v58  ;;  %v3499_v49 = vld [vmem:[#allocation2 + $0x4a] sm:$0xff]  ;;  %v3512_v13 = vld [vmem:[#allocation2 + $0xe2] sm:$0xff] }
 0x218   : > { %v3048_v5 = vld [vmem:[#allocation2 + $0x159] sm:$0xff]  ;;  %v3502_v56 = vld [vmem:[#allocation2 + $0x6a] sm:$0xff]  ;;  %v8762_v42 = vpack.c.bf16 %v3500_v29, %v3499_v49 }
 0x219   : > { %2969 = vst.msk [vmem:[#allocation2 + $0x189] sm:$0xff] %vm325_vm1, %v2881_v51  ;;  %v2879_v15 = vmax.f32 %v2847_v62, 0.0  ;;  %v2999_v37 = vld [vmem:[#allocation2 + $0x158] sm:$0xff]  ;;  %v8709_v26 = vpack.c.bf16 %v3048_v5, %v3047_v44  ;;  %v8764_v4 = vpack.c.bf16 %v3502_v56, %v3501_v52  ;;  %v3504_v51 = vld [vmem:[#allocation2 + $0x82] sm:$0xff]  ;;  %v3507_v5 = vld [vmem:[#allocation2 + $0xaa] sm:$0xff] }
 0x21a   : > { %v3046_v47 = vld [vmem:[#allocation2 + $0x141] sm:$0xff]  ;;  %v8713_v41 = vpack.c.bf16 %v2999_v37, %v2998_v36  ;;  %v3497_v43 = vld [vmem:[#allocation2 + $0x32] sm:$0xff]  ;;  %v8752_v11 = vld [vmem:[%s9676_s3 + $0x1c] sm:$0xf] }
 0x21b   : > { %v2997_v32 = vld [vmem:[#allocation2 + $0x140] sm:$0xff]  ;;  %2967 = vst.msk [vmem:[#allocation2 + $0x171] sm:$0xff] %vm325_vm1, %v2879_v15  ;;  %v8705_v0 = vpack.c.bf16 %v3046_v47, %v3045_v24  ;;  %v8738_v35 = vpack.c.bf16 %v3498_v39, %v3497_v43  ;;  %v3505_v62 = vld [vmem:[#allocation2 + $0x92] sm:$0xff]  ;;  %v3510_v37 = vld [vmem:[#allocation2 + $0xca] sm:$0xff] }
 0x21c   : > { %v8707_v40 = vpack.c.bf16 %v2997_v32, %v2996_v7  ;;  %v3503_v55 = vld [vmem:[#allocation2 + $0x7a] sm:$0xff]  ;;  %v3508_v47 = vld [vmem:[#allocation2 + $0xb2] sm:$0xff]  ;;  %v3509_v32 = vld [vmem:[#allocation2 + $0xc2] sm:$0xff] }
 0x21d   : > { %6954 = vmatmul.mubr.msk.bf16.gmra.mxu1 %vm325_vm1, %v8705_v0  ;;  %v3506_v15 = vld [vmem:[#allocation2 + $0x9a] sm:$0xff]  ;;  %v8774_v24 = vpack.c.bf16 %v3504_v51, %v3503_v55  ;;  %v8786_v44 = vpack.c.bf16 %v3508_v47, %v3507_v5  ;;  %v8788_v36 = vpack.c.bf16 %v3510_v37, %v3509_v32  ;;  %v3516_v18 = vld [vmem:[#allocation2 + $0x112] sm:$0xff]  ;;  %v3518_v43 = vld [vmem:[#allocation2 + $0x12a] sm:$0xff] }
 0x21e   : > { %6988 = vmatmul.mubr.msk.bf16.gmra.mxu0 %vm325_vm1, %v8707_v40  ;;  %6957 = vmatprep.mubr.msk.bf16.mxu1 %vm325_vm1, %v8709_v26  ;;  %v3049_v22 = vld [vmem:[#allocation2 + $0x169] sm:$0xff]  ;;  %v8776_v7 = vpack.c.bf16 %v3506_v15, %v3505_v62  ;;  %v3511_v58 = vld [vmem:[#allocation2 + $0xda] sm:$0xff]  ;;  %v3521_v29 = vld [vmem:[#allocation2 + $0x152] sm:$0xff] }
 0x21f   : > { %6991 = vmatprep.mubr.msk.bf16.mxu0 %vm325_vm1, %v8713_v41  ;;  %v3000_v53 = vld [vmem:[#allocation2 + $0x168] sm:$0xff]  ;;  %v3522_v52 = vld [vmem:[#allocation2 + $0x15a] sm:$0xff] }
 0x220   : > { %v3520_v49 = vld [vmem:[#allocation2 + $0x142] sm:$0xff]  ;;  %v3539_v55 = vpack.c.bf16 %v3522_v52, %v3521_v29 }
 0x221   : > { %v3818_v15 = vld [vmem:[#allocation2 + $0x188] sm:$0xff]  ;;  %v3817_v47 = vld [vmem:[#allocation2 + $0x180] sm:$0xff] }
 0x222   : > { %v3050_v30 = vld [vmem:[#allocation2 + $0x171] sm:$0xff]  ;;  %v8828_v32 = vpack.c.bf16 %v3818_v15, %v3817_v47 }
 0x223   : > { %v3001_v23 = vld [vmem:[#allocation2 + $0x170] sm:$0xff]  ;;  %v8721_v2 = vpack.c.bf16 %v3050_v30, %v3049_v22  ;;  %v3514_v30 = vld [vmem:[#allocation2 + $0xfa] sm:$0xff] }
 0x224   : > { %v8723_v1 = vpack.c.bf16 %v3001_v23, %v3000_v53  ;;  %v3513_v22 = vld [vmem:[#allocation2 + $0xf2] sm:$0xff]  ;;  %v8798_v53 = vpack.c.bf16 %v3512_v13, %v3511_v58  ;;  %v3523_v51 = vld [vmem:[#allocation2 + $0x16a] sm:$0xff]  ;;  %v5063_v58 = vsel %vm374_vm0, %v8752_v11, 0  ;;  %v6262_v13 = vld [vmem:[%s9676_s3 + $0x20] sm:$0xf] }
 0x225   : > { %6958 = vmatmul.mubr.msk.bf16.gmra.mxu1 %vm325_vm1, %v8721_v2  ;;  %v8800_v23 = vpack.c.bf16 %v3514_v30, %v3513_v22  ;;  %v3524_v62 = vld [vmem:[#allocation2 + $0x172] sm:$0xff] }
 0x226   : > { %6992 = vmatmul.mubr.msk.bf16.gmra.mxu0 %vm325_vm1, %v8723_v1  ;;  %6997 = vmatprep.mubr.msk.bf16.mxu1 %vm325_vm1, %v3525_v61  ;;  %v3515_v61 = vld [vmem:[#allocation2 + $0x10a] sm:$0xff]  ;;  %v3540_v5 = vpack.c.bf16 %v3524_v62, %v3523_v51 }
 0x227   : > { %7031 = vmatprep.mubr.msk.bf16.mxu0 %vm325_vm1, %v8470_v25  ;;  %v8745_v25 = vld [vmem:[%s9676_s3 + $0x18] sm:$0xf]  ;;  %v8810_v39 = vpack.c.bf16 %v3516_v18, %v3515_v61  ;;  %v5357_v61 = vsel %vm374_vm0, %v6262_v13, 0 }
 0x228   : > { %v4769_v37 = vsel %vm374_vm0, %v8745_v25, 0 }
 0x22d   : > { %6998 = vmatmul.mubr.msk.bf16.vlgmr.msra.gmra.mxu1 %vm325_vm1, %v8732_v3 }
 0x22e   : > { %7032 = vmatmul.mubr.msk.bf16.vlgmr.msra.gmra.mxu0 %vm325_vm1, %v8478_v34  ;;  %7064 = vmatpush3.bf16.msra.mxu1 %v4180_v57  ;;  %v8812_v57 = vpack.c.bf16 %v3518_v43, %v3517_v48 }
 0x22f   : > { %7001 = vmatprep.mubr.msk.bf16.mxu1 %vm325_vm1, %v8738_v35  ;;  %7035 = vmatprep.mubr.msk.bf16.mxu0 %vm325_vm1, %v8530_v59 }
 0x230   : > { %7098 = vmatpush3.bf16.msra.mxu0 %v4474_v63  ;;  %7248 = vmatprep.subr.msk.bf16.mxu1 %vm374_vm0, %v8745_v25  ;;  %v3519_v63 = vld [vmem:[#allocation2 + $0x13a] sm:$0xff]  ;;  %v4406_v25 = vld [vmem:[#allocation2 + $0x18a] sm:$0xff] }
 0x231   : > { %7249 = vmatprep.subr.msk.bf16.mxu0 %vm374_vm0, %v8752_v11  ;;  %v3538_v56 = vpack.c.bf16 %v3520_v49, %v3519_v63  ;;  %v4111_v11 = vld [vmem:[#allocation2 + $0x181] sm:$0xff] }
 0x235   : > { %7002 = vmatmul.mubr.msk.bf16.gmra.mxu1 %vm325_vm1, %v8762_v42 }
 0x236   : > { %7036 = vmatmul.mubr.msk.bf16.gmra.mxu0 %vm325_vm1, %v8538_v6  ;;  %7005 = vmatprep.mubr.msk.bf16.mxu1 %vm325_vm1, %v8764_v4 }
 0x237   : > { %7039 = vmatprep.mubr.msk.bf16.mxu0 %vm325_vm1, %v8578_v28 }
 0x23d   : > { %7006 = vmatmul.mubr.msk.bf16.gmra.mxu1 %vm325_vm1, %v8774_v24 }
 0x23e   : > { %7040 = vmatmul.mubr.msk.bf16.gmra.mxu0 %vm325_vm1, %v8586_v17  ;;  %7009 = vmatprep.mubr.msk.bf16.mxu1 %vm325_vm1, %v8776_v7 }
 0x23f   : > { %7043 = vmatprep.mubr.msk.bf16.mxu0 %vm325_vm1, %v8621_v12 }
 0x245   : > { %7010 = vmatmul.mubr.msk.bf16.gmra.mxu1 %vm325_vm1, %v8786_v44 }
 0x246   : > { %7044 = vmatmul.mubr.msk.bf16.gmra.mxu0 %vm325_vm1, %v8629_v16  ;;  %7013 = vmatprep.mubr.msk.bf16.mxu1 %vm325_vm1, %v8788_v36 }
 0x247   : > { %7047 = vmatprep.mubr.msk.bf16.mxu0 %vm325_vm1, %v8660_v27 }
 0x24d   : > { %7014 = vmatmul.mubr.msk.bf16.gmra.mxu1 %vm325_vm1, %v8798_v53 }
 0x24e   : > { %7048 = vmatmul.mubr.msk.bf16.gmra.mxu0 %vm325_vm1, %v8668_v31  ;;  %7017 = vmatprep.mubr.msk.bf16.mxu1 %vm325_vm1, %v8800_v23 }
 0x24f   : > { %7051 = vmatprep.mubr.msk.bf16.mxu0 %vm325_vm1, %v8685_v8 }
 0x255   : > { %7018 = vmatmul.mubr.msk.bf16.gmra.mxu1 %vm325_vm1, %v8810_v39 }
 0x256   : > { %7052 = vmatmul.mubr.msk.bf16.gmra.mxu0 %vm325_vm1, %v8693_v50  ;;  %7021 = vmatprep.mubr.msk.bf16.mxu1 %vm325_vm1, %v8812_v57 }
 0x257   : > { %7055 = vmatprep.mubr.msk.bf16.mxu0 %vm325_vm1, %v8707_v40 }
 0x25d   : > { %7022 = vmatmul.mubr.msk.bf16.gmra.mxu1 %vm325_vm1, %v3538_v56 }
 0x25e   : > { %7056 = vmatmul.mubr.msk.bf16.gmra.mxu0 %vm325_vm1, %v8713_v41  ;;  %7025 = vmatprep.mubr.msk.bf16.mxu1 %vm325_vm1, %v3539_v55 }
 0x25f   : > { %7059 = vmatprep.mubr.msk.bf16.mxu0 %vm325_vm1, %v8723_v1 }
 0x265   : > { %7026 = vmatmul.mubr.msk.bf16.gmra.mxu1 %vm325_vm1, %v3540_v5 }
 0x266   : > { %7060 = vmatmul.mubr.msk.bf16.gmra.mxu0 %vm325_vm1, %v8828_v32  ;;  %7065 = vmatprep.mubr.msk.bf16.mxu1 %vm325_vm1, %v8466_v46  ;;  %v4112_v46 = vld [vmem:[#allocation2 + $0x189] sm:$0xff] }
 0x267   : > { %7099 = vmatprep.mubr.msk.bf16.mxu0 %vm325_vm1, %v8732_v3  ;;  %v4405_v3 = vld [vmem:[#allocation2 + $0x182] sm:$0xff]  ;;  %v8898_v22 = vpack.c.bf16 %v4112_v46, %v4111_v11 }
 0x268   : > { %v8900_v30 = vpack.c.bf16 %v4406_v25, %v4405_v3 }
 0x26d   : > { %7066 = vmatmul.mubr.msk.bf16.vlgmr.msra.gmra.mxu1 %vm325_vm1, %v8472_v33 }
 0x26e   : > { %7100 = vmatmul.mubr.msk.bf16.vlgmr.msra.gmra.mxu0 %vm325_vm1, %v8738_v35  ;;  %7132 = vmatpush3.bf16.msra.mxu1 %v4769_v37 }
 0x26f   : > { %7069 = vmatprep.mubr.msk.bf16.mxu1 %vm325_vm1, %v8526_v14  ;;  %7103 = vmatprep.mubr.msk.bf16.mxu0 %vm325_vm1, %v8762_v42 }
 0x270   : > { %7166 = vmatpush3.bf16.msra.mxu0 %v5063_v58  ;;  %7250 = vmatprep.subr.msk.bf16.mxu1 %vm374_vm0, %v6262_v13 }
 0x275   : > { %7070 = vmatmul.mubr.msk.bf16.gmra.mxu1 %vm325_vm1, %v8532_v54 }
 0x276   : > { %7104 = vmatmul.mubr.msk.bf16.gmra.mxu0 %vm325_vm1, %v8764_v4  ;;  %7073 = vmatprep.mubr.msk.bf16.mxu1 %vm325_vm1, %v8574_v60 }
 0x277   : > { %7107 = vmatprep.mubr.msk.bf16.mxu0 %vm325_vm1, %v8774_v24 }
 0x27d   : > { %7074 = vmatmul.mubr.msk.bf16.gmra.mxu1 %vm325_vm1, %v8580_v10 }
 0x27e   : > { %7108 = vmatmul.mubr.msk.bf16.gmra.mxu0 %vm325_vm1, %v8776_v7  ;;  %7077 = vmatprep.mubr.msk.bf16.mxu1 %vm325_vm1, %v8617_v20 }
 0x27f   : > { %7111 = vmatprep.mubr.msk.bf16.mxu0 %vm325_vm1, %v8786_v44 }
 0x285   : > { %7078 = vmatmul.mubr.msk.bf16.gmra.mxu1 %vm325_vm1, %v8623_v19 }
 0x286   : > { %7112 = vmatmul.mubr.msk.bf16.gmra.mxu0 %vm325_vm1, %v8788_v36  ;;  %7081 = vmatprep.mubr.msk.bf16.mxu1 %vm325_vm1, %v8657_v45 }
 0x287   : > { %7115 = vmatprep.mubr.msk.bf16.mxu0 %vm325_vm1, %v8798_v53 }
 0x28d   : > { %7082 = vmatmul.mubr.msk.bf16.gmra.mxu1 %vm325_vm1, %v8662_v38 }
 0x28e   : > { %7116 = vmatmul.mubr.msk.bf16.gmra.mxu0 %vm325_vm1, %v8800_v23  ;;  %7085 = vmatprep.mubr.msk.bf16.mxu1 %vm325_vm1, %v8683_v9 }
 0x28f   : > { %7119 = vmatprep.mubr.msk.bf16.mxu0 %vm325_vm1, %v8810_v39 }
 0x295   : > { %7086 = vmatmul.mubr.msk.bf16.gmra.mxu1 %vm325_vm1, %v8687_v21 }
 0x296   : > { %7120 = vmatmul.mubr.msk.bf16.gmra.mxu0 %vm325_vm1, %v8812_v57  ;;  %7089 = vmatprep.mubr.msk.bf16.mxu1 %vm325_vm1, %v8705_v0 }
 0x297   : > { %7123 = vmatprep.mubr.msk.bf16.mxu0 %vm325_vm1, %v3538_v56 }
 0x29d   : > { %7090 = vmatmul.mubr.msk.bf16.gmra.mxu1 %vm325_vm1, %v8709_v26 }
 0x29e   : > { %7124 = vmatmul.mubr.msk.bf16.gmra.mxu0 %vm325_vm1, %v3539_v55  ;;  %7093 = vmatprep.mubr.msk.bf16.mxu1 %vm325_vm1, %v8721_v2 }
 0x29f   : > { %7127 = vmatprep.mubr.msk.bf16.mxu0 %vm325_vm1, %v3540_v5 }
 0x2a5   : > { %7094 = vmatmul.mubr.msk.bf16.gmra.mxu1 %vm325_vm1, %v8898_v22 }
 0x2a6   : > { %7128 = vmatmul.mubr.msk.bf16.gmra.mxu0 %vm325_vm1, %v8900_v30  ;;  %7133 = vmatprep.mubr.msk.bf16.mxu1 %vm325_vm1, %v8478_v34 }
 0x2a7   : > { %7167 = vmatprep.mubr.msk.bf16.mxu0 %vm325_vm1, %v8472_v33 }
 0x2ad   : > { %v6931_v18 = vpop.f32.mrf.mxu1  ;;  %7134 = vmatmul.mubr.msk.bf16.vlgmr.msra.gmra.mxu1 %vm325_vm1, %v8530_v59 }
 0x2ae   : > { %v6965_v48 = vpop.f32.mrf.mxu0  ;;  %7168 = vmatmul.mubr.msk.bf16.vlgmr.msra.gmra.mxu0 %vm325_vm1, %v8526_v14  ;;  %7200 = vmatpush3.bf16.msra.mxu1 %v5357_v61 }
 0x2af   : > { %v8915_v43 = vadd.f32 %v6965_v48, %v6931_v18  ;;  %7137 = vmatprep.mubr.msk.bf16.mxu1 %vm325_vm1, %v8538_v6  ;;  %7171 = vmatprep.mubr.msk.bf16.mxu0 %vm325_vm1, %v8532_v54  ;;  %v3154_v33 = vpop.f32.mrf.mxu1 }
 0x2b0   : > { %v3366_v34 = vpop.f32.mrf.mxu0 }
 0x2b1   : > { %v8921_v63 = vadd.f32 %v3366_v34, %v3154_v33  ;;  %v6932_v49 = vpop.f32.mrf.mxu1 }
 0x2b2   : > { %v6966_v29 = vpop.f32.mrf.mxu0 }
 0x2b3   : > { %v8923_v59 = vadd.f32 %v6966_v29, %v6932_v49  ;;  %v3157_v52 = vpop.f32.mrf.mxu1 }
 0x2b4   : > { %v3369_v56 = vpop.f32.mrf.mxu0 }
 0x2b5   : > { %v8925_v14 = vadd.f32 %v3369_v56, %v3157_v52  ;;  %v6935_v55 = vpop.f32.mrf.mxu1  ;;  %7138 = vmatmul.mubr.msk.bf16.gmra.mxu1 %vm325_vm1, %v8578_v28 }
 0x2b6   : > { %v6969_v6 = vpop.f32.mrf.mxu0  ;;  %7172 = vmatmul.mubr.msk.bf16.gmra.mxu0 %vm325_vm1, %v8574_v60  ;;  %7141 = vmatprep.mubr.msk.bf16.mxu1 %vm325_vm1, %v8586_v17 }
 0x2b7   : > { %v8933_v54 = vadd.f32 %v6969_v6, %v6935_v55  ;;  %7175 = vmatprep.mubr.msk.bf16.mxu0 %vm325_vm1, %v8580_v10  ;;  %v3170_v51 = vpop.f32.mrf.mxu1 }
 0x2b8   : > { %v3382_v62 = vpop.f32.mrf.mxu0 }
 0x2b9   : > { %v8937_v15 = vadd.f32 %v3382_v62, %v3170_v51  ;;  %v6936_v5 = vpop.f32.mrf.mxu1 }
 0x2ba   : > { %v6970_v47 = vpop.f32.mrf.mxu0 }
 0x2bb   : > { %v8939_v37 = vadd.f32 %v6970_v47, %v6936_v5  ;;  %v3173_v28 = vpop.f32.mrf.mxu1 }
 0x2bc   : > { %v3385_v58 = vpop.f32.mrf.mxu0 }
 0x2bd   : > { %v8941_v13 = vadd.f32 %v3385_v58, %v3173_v28  ;;  %v6939_v60 = vpop.f32.mrf.mxu1  ;;  %7142 = vmatmul.mubr.msk.bf16.gmra.mxu1 %vm325_vm1, %v8621_v12 }
 0x2be   : > { %v6973_v17 = vpop.f32.mrf.mxu0  ;;  %7176 = vmatmul.mubr.msk.bf16.gmra.mxu0 %vm325_vm1, %v8617_v20  ;;  %7145 = vmatprep.mubr.msk.bf16.mxu1 %vm325_vm1, %v8629_v16 }
 0x2bf   : > { %v8949_v10 = vadd.f32 %v6973_v17, %v6939_v60  ;;  %7179 = vmatprep.mubr.msk.bf16.mxu0 %vm325_vm1, %v8623_v19  ;;  %v3186_v46 = vpop.f32.mrf.mxu1 }
 0x2c0   : > { %v3398_v3 = vpop.f32.mrf.mxu0 }
 0x2c1   : > { %v8953_v25 = vadd.f32 %v3398_v3, %v3186_v46  ;;  %v6940_v11 = vpop.f32.mrf.mxu1 }
 0x2c2   : > { %v6974_v61 = vpop.f32.mrf.mxu0 }
 0x2c3   : > { %v8955_v18 = vadd.f32 %v6974_v61, %v6940_v11  ;;  %v3189_v12 = vpop.f32.mrf.mxu1 }
 0x2c4   : > { %v3401_v48 = vpop.f32.mrf.mxu0 }
 0x2c5   : > { %v8957_v33 = vadd.f32 %v3401_v48, %v3189_v12  ;;  %v6943_v20 = vpop.f32.mrf.mxu1  ;;  %7146 = vmatmul.mubr.msk.bf16.gmra.mxu1 %vm325_vm1, %v8660_v27 }
 0x2c6   : > { %v6977_v16 = vpop.f32.mrf.mxu0  ;;  %7180 = vmatmul.mubr.msk.bf16.gmra.mxu0 %vm325_vm1, %v8657_v45  ;;  %7149 = vmatprep.mubr.msk.bf16.mxu1 %vm325_vm1, %v8668_v31 }
 0x2c7   : > { %v8965_v19 = vadd.f32 %v6977_v16, %v6943_v20  ;;  %7183 = vmatprep.mubr.msk.bf16.mxu0 %vm325_vm1, %v8662_v38  ;;  %v3202_v34 = vpop.f32.mrf.mxu1 }
 0x2c8   : > { %v3414_v49 = vpop.f32.mrf.mxu0 }
 0x2c9   : > { %v8969_v29 = vadd.f32 %v3414_v49, %v3202_v34  ;;  %v6944_v52 = vpop.f32.mrf.mxu1  ;;  %v4701_v49 = vld [vmem:[#allocation2 + $0x1a0] sm:$0xff] }
 0x2ca   : > { %v6978_v56 = vpop.f32.mrf.mxu0 }
 0x2cb   : > { %v8971_v55 = vadd.f32 %v6978_v56, %v6944_v52  ;;  %v3205_v27 = vpop.f32.mrf.mxu1 }
 0x2cc   : > { %v3417_v6 = vpop.f32.mrf.mxu0 }
 0x2cd   : > { %v8973_v51 = vadd.f32 %v3417_v6, %v3205_v27  ;;  %v6947_v45 = vpop.f32.mrf.mxu1  ;;  %7150 = vmatmul.mubr.msk.bf16.gmra.mxu1 %vm325_vm1, %v8685_v8  ;;  %v4994_v27 = vld [vmem:[#allocation2 + $0x199] sm:$0xff]  ;;  %v4995_v6 = vld [vmem:[#allocation2 + $0x1a1] sm:$0xff] }
 0x2ce   : > { %v6981_v31 = vpop.f32.mrf.mxu0  ;;  %7184 = vmatmul.mubr.msk.bf16.gmra.mxu0 %vm325_vm1, %v8683_v9  ;;  %7153 = vmatprep.mubr.msk.bf16.mxu1 %vm325_vm1, %v8693_v50 }
 0x2cf   : > { %v8981_v38 = vadd.f32 %v6981_v31, %v6947_v45  ;;  %7187 = vmatprep.mubr.msk.bf16.mxu0 %vm325_vm1, %v8687_v21  ;;  %v3218_v62 = vpop.f32.mrf.mxu1 }
 0x2d0   : > { %v3430_v5 = vpop.f32.mrf.mxu0 }
 0x2d1   : > { %v8985_v47 = vadd.f32 %v3430_v5, %v3218_v62  ;;  %v6948_v28 = vpop.f32.mrf.mxu1 }
 0x2d2   : > { %v6982_v58 = vpop.f32.mrf.mxu0 }
 0x2d3   : > { %v8987_v60 = vadd.f32 %v6982_v58, %v6948_v28  ;;  %v3221_v8 = vpop.f32.mrf.mxu1 }
 0x2d4   : > { %v3433_v17 = vpop.f32.mrf.mxu0 }
 0x2d5   : > { %v8989_v46 = vadd.f32 %v3433_v17, %v3221_v8  ;;  %v6951_v9 = vpop.f32.mrf.mxu1  ;;  %7154 = vmatmul.mubr.msk.bf16.gmra.mxu1 %vm325_vm1, %v8707_v40 }
 0x2d6   : > { %v6985_v50 = vpop.f32.mrf.mxu0  ;;  %7188 = vmatmul.mubr.msk.bf16.gmra.mxu0 %vm325_vm1, %v8705_v0  ;;  %7157 = vmatprep.mubr.msk.bf16.mxu1 %vm325_vm1, %v8713_v41 }
 0x2d7   : > { %v8997_v21 = vadd.f32 %v6985_v50, %v6951_v9  ;;  %7191 = vmatprep.mubr.msk.bf16.mxu0 %vm325_vm1, %v8709_v26  ;;  %v3234_v3 = vpop.f32.mrf.mxu1  ;;  %v4700_v26 = vld [vmem:[#allocation2 + $0x198] sm:$0xff] }
 0x2d8   : > { %v3446_v11 = vpop.f32.mrf.mxu0  ;;  %v4717_v62 = vpack.c.bf16 %v4701_v49, %v4700_v26 }
 0x2d9   : > { %v9001_v61 = vadd.f32 %v3446_v11, %v3234_v3  ;;  %v6952_v12 = vpop.f32.mrf.mxu1 }
 0x2da   : > { %v6986_v48 = vpop.f32.mrf.mxu0 }
 0x2db   : > { %v9003_v20 = vadd.f32 %v6986_v48, %v6952_v12  ;;  %v3237_v40 = vpop.f32.mrf.mxu1 }
 0x2dc   : > { %v3449_v16 = vpop.f32.mrf.mxu0 }
 0x2dd   : > { %v9005_v34 = vadd.f32 %v3449_v16, %v3237_v40  ;;  %v6955_v0 = vpop.f32.mrf.mxu1  ;;  %7158 = vmatmul.mubr.msk.bf16.gmra.mxu1 %vm325_vm1, %v8723_v1 }
 0x2de   : > { %v6989_v41 = vpop.f32.mrf.mxu0  ;;  %7192 = vmatmul.mubr.msk.bf16.gmra.mxu0 %vm325_vm1, %v8721_v2  ;;  %7161 = vmatprep.mubr.msk.bf16.mxu1 %vm325_vm1, %v8828_v32  ;;  %v5011_v2 = vpack.c.bf16 %v4995_v6, %v4994_v27 }
 0x2df   : > { %v9013_v52 = vadd.f32 %v6989_v41, %v6955_v0  ;;  %7195 = vmatprep.mubr.msk.bf16.mxu0 %vm325_vm1, %v8898_v22  ;;  %v3250_v56 = vpop.f32.mrf.mxu1 }
 0x2e0   : > { %v3462_v45 = vpop.f32.mrf.mxu0 }
 0x2e1   : > { %v9017_v31 = vadd.f32 %v3462_v45, %v3250_v56  ;;  %v6956_v1 = vpop.f32.mrf.mxu1 }
 0x2e2   : > { %v6990_v5 = vpop.f32.mrf.mxu0 }
 0x2e3   : > { %v9019_v28 = vadd.f32 %v6990_v5, %v6956_v1  ;;  %v3253_v32 = vpop.f32.mrf.mxu1 }
 0x2e4   : > { %v3465_v58 = vpop.f32.mrf.mxu0 }
 0x2e5   : > { %v9021_v8 = vadd.f32 %v3465_v58, %v3253_v32  ;;  %v6959_v17 = vpop.f32.mrf.mxu1  ;;  %7162 = vmatmul.mubr.msk.bf16.gmra.mxu1 %vm325_vm1, %v4717_v62 }
 0x2e6   : > { %v6993_v22 = vpop.f32.mrf.mxu0  ;;  %7201 = vmatprep.mubr.msk.bf16.mxu1 %vm325_vm1, %v8738_v35  ;;  %7196 = vmatmul.mubr.msk.bf16.gmra.mxu0 %vm325_vm1, %v5011_v2 }
 0x2e7   : > { %v9027_v9 = vadd.f32 %v6993_v22, %v6959_v17  ;;  %v3266_v50 = vpop.f32.mrf.mxu1 }
 0x2e8   : > { %v3478_v3 = vpop.f32.mrf.mxu0 }
 0x2e9   : > { %v9029_v11 = vadd.f32 %v3478_v3, %v3266_v50  ;;  %v6960_v12 = vpop.f32.mrf.mxu1 }
 0x2ea   : > { %v6994_v48 = vpop.f32.mrf.mxu0 }
 0x2eb   : > { %v9031_v40 = vadd.f32 %v6994_v48, %v6960_v12  ;;  %v3269_v16 = vpop.f32.mrf.mxu1 }
 0x2ec   : > { %v3481_v0 = vpop.f32.mrf.mxu0 }
 0x2ed   : > { %v9033_v41 = vadd.f32 %v3481_v0, %v3269_v16  ;;  %v6999_v26 = vpop.f32.mrf.mxu1  ;;  %7202 = vmatmul.mubr.msk.bf16.vlgmr.msra.gmra.mxu1 %vm325_vm1, %v8762_v42 }
 0x2ee   : > { %v3757_v35 = vadd.f32 %v6999_v26, %v8915_v43  ;;  %v7033_v49 = vpop.f32.mrf.mxu0  ;;  %7205 = vmatprep.mubr.msk.bf16.mxu1 %vm325_vm1, %v8764_v4 }
 0x2ef   : > { %v3628_v56 = vpop.f32.mrf.mxu1 }
 0x2f0   : > { %v9040_v27 = vadd.f32 %v7033_v49, %v3757_v35  ;;  %v3755_v6 = vadd.f32 %v3628_v56, %v8921_v63  ;;  %v3922_v45 = vpop.f32.mrf.mxu0 }
 0x2f1   : > { %v7000_v1 = vpop.f32.mrf.mxu1 }
 0x2f2   : > { %v9043_v62 = vadd.f32 %v3922_v45, %v3755_v6  ;;  %v3758_v5 = vadd.f32 %v7000_v1, %v8923_v59  ;;  %v7034_v2 = vpop.f32.mrf.mxu0 }
 0x2f3   : > { %v3631_v32 = vpop.f32.mrf.mxu1 }
 0x2f4   : > { %v9046_v42 = vadd.f32 %v7034_v2, %v3758_v5  ;;  %v3756_v43 = vadd.f32 %v3631_v32, %v8925_v14  ;;  %v3925_v58 = vpop.f32.mrf.mxu0 }
 0x2f5   : > { %v7003_v17 = vpop.f32.mrf.mxu1  ;;  %7206 = vmatmul.mubr.msk.bf16.gmra.mxu1 %vm325_vm1, %v8774_v24 }
 0x2f6   : > { %v9051_v4 = vadd.f32 %v3925_v58, %v3756_v43  ;;  %v3761_v63 = vadd.f32 %v7003_v17, %v8933_v54  ;;  %v7037_v22 = vpop.f32.mrf.mxu0  ;;  %7209 = vmatprep.mubr.msk.bf16.mxu1 %vm325_vm1, %v8776_v7 }
 0x2f7   : > { %v3644_v59 = vpop.f32.mrf.mxu1 }
 0x2f8   : > { %v9056_v50 = vadd.f32 %v7037_v22, %v3761_v63  ;;  %v3759_v3 = vadd.f32 %v3644_v59, %v8937_v15  ;;  %v3938_v12 = vpop.f32.mrf.mxu0 }
 0x2f9   : > { %v7004_v14 = vpop.f32.mrf.mxu1 }
 0x2fa   : > { %v9059_v48 = vadd.f32 %v3938_v12, %v3759_v3  ;;  %v3762_v16 = vadd.f32 %v7004_v14, %v8939_v37  ;;  %v7038_v24 = vpop.f32.mrf.mxu0 }
 0x2fb   : > { %v3647_v0 = vpop.f32.mrf.mxu1 }
 0x2fc   : > { %v9062_v26 = vadd.f32 %v7038_v24, %v3762_v16  ;;  %v3760_v54 = vadd.f32 %v3647_v0, %v8941_v13  ;;  %v3941_v35 = vpop.f32.mrf.mxu0 }
 0x2fd   : > { %v7007_v49 = vpop.f32.mrf.mxu1  ;;  %7210 = vmatmul.mubr.msk.bf16.gmra.mxu1 %vm325_vm1, %v8786_v44 }
 0x2fe   : > { %v9067_v7 = vadd.f32 %v3941_v35, %v3760_v54  ;;  %v3765_v15 = vadd.f32 %v7007_v49, %v8949_v10  ;;  %v7041_v56 = vpop.f32.mrf.mxu0  ;;  %7213 = vmatprep.mubr.msk.bf16.mxu1 %vm325_vm1, %v8788_v36 }
 0x2ff   : > { %v3660_v37 = vpop.f32.mrf.mxu1 }
 0x300   : > { %v9072_v6 = vadd.f32 %v7041_v56, %v3765_v15  ;;  %v3763_v45 = vadd.f32 %v3660_v37, %v8953_v25  ;;  %v3954_v1 = vpop.f32.mrf.mxu0  ;;  %v5281_v37 = vld [vmem:[#allocation2 + $0x142] sm:$0xff] }
 0x301   : > { %v7008_v13 = vpop.f32.mrf.mxu1 }
 0x302   : > { %v9075_v5 = vadd.f32 %v3954_v1, %v3763_v45  ;;  %v3766_v2 = vadd.f32 %v7008_v13, %v8955_v18  ;;  %v7042_v44 = vpop.f32.mrf.mxu0  ;;  %v5282_v1 = vld [vmem:[#allocation2 + $0x152] sm:$0xff]  ;;  %v5283_v13 = vld [vmem:[#allocation2 + $0x15a] sm:$0xff] }
 0x303   : > { %v3663_v32 = vpop.f32.mrf.mxu1 }
 0x304   : > { %v9078_v43 = vadd.f32 %v7042_v44, %v3766_v2  ;;  %v3764_v10 = vadd.f32 %v3663_v32, %v8957_v33  ;;  %v3957_v58 = vpop.f32.mrf.mxu0 }
 0x305   : > { %v7011_v17 = vpop.f32.mrf.mxu1  ;;  %7214 = vmatmul.mubr.msk.bf16.gmra.mxu1 %vm325_vm1, %v8798_v53 }
 0x306   : > { %v9083_v36 = vadd.f32 %v3957_v58, %v3764_v10  ;;  %v3769_v25 = vadd.f32 %v7011_v17, %v8965_v19  ;;  %v7045_v63 = vpop.f32.mrf.mxu0  ;;  %7217 = vmatprep.mubr.msk.bf16.mxu1 %vm325_vm1, %v8800_v23  ;;  %v5302_v17 = vpack.c.bf16 %v5283_v13, %v5282_v1 }
 0x307   : > { %v3676_v18 = vpop.f32.mrf.mxu1 }
 0x308   : > { %v9088_v22 = vadd.f32 %v7045_v63, %v3769_v25  ;;  %v3767_v59 = vadd.f32 %v3676_v18, %v8969_v29  ;;  %v3970_v3 = vpop.f32.mrf.mxu0 }
 0x309   : > { %v7012_v33 = vpop.f32.mrf.mxu1 }
 0x30a   : > { %v9091_v12 = vadd.f32 %v3970_v3, %v3767_v59  ;;  %v3770_v14 = vadd.f32 %v7012_v33, %v8971_v55  ;;  %v7046_v53 = vpop.f32.mrf.mxu0 }
 0x30b   : > { %v3679_v16 = vpop.f32.mrf.mxu1 }
 0x30c   : > { %v9094_v24 = vadd.f32 %v7046_v53, %v3770_v14  ;;  %v3768_v19 = vadd.f32 %v3679_v16, %v8973_v51  ;;  %v3973_v0 = vpop.f32.mrf.mxu0  ;;  %v5280_v51 = vld [vmem:[#allocation2 + $0x13a] sm:$0xff]  ;;  %v5284_v14 = vld [vmem:[#allocation2 + $0x16a] sm:$0xff] }
 0x30d   : > { %v7015_v54 = vpop.f32.mrf.mxu1  ;;  %7218 = vmatmul.mubr.msk.bf16.gmra.mxu1 %vm325_vm1, %v8810_v39  ;;  %v5301_v32 = vpack.c.bf16 %v5281_v37, %v5280_v51  ;;  %v5289_v37 = vld [vmem:[#allocation2 + $0x1a2] sm:$0xff] }
 0x30e   : > { %v9099_v23 = vadd.f32 %v3973_v0, %v3768_v19  ;;  %v3773_v29 = vadd.f32 %v7015_v54, %v8981_v38  ;;  %v7049_v35 = vpop.f32.mrf.mxu0  ;;  %7221 = vmatprep.mubr.msk.bf16.mxu1 %vm325_vm1, %v8812_v57 }
 0x30f   : > { %v3692_v55 = vpop.f32.mrf.mxu1 }
 0x310   : > { %v9104_v49 = vadd.f32 %v7049_v35, %v3773_v29  ;;  %v3771_v15 = vadd.f32 %v3692_v55, %v8985_v47  ;;  %v3986_v56 = vpop.f32.mrf.mxu0 }
 0x311   : > { %v7016_v45 = vpop.f32.mrf.mxu1 }
 0x312   : > { %v9107_v39 = vadd.f32 %v3986_v56, %v3771_v15  ;;  %v3774_v2 = vadd.f32 %v7016_v45, %v8987_v60  ;;  %v7050_v38 = vpop.f32.mrf.mxu0 }
 0x313   : > { %v3695_v44 = vpop.f32.mrf.mxu1 }
 0x314   : > { %v9110_v10 = vadd.f32 %v7050_v38, %v3774_v2  ;;  %v3772_v57 = vadd.f32 %v3695_v44, %v8989_v46  ;;  %v3989_v58 = vpop.f32.mrf.mxu0  ;;  %v5285_v46 = vld [vmem:[#allocation2 + $0x172] sm:$0xff] }
 0x315   : > { %v7019_v47 = vpop.f32.mrf.mxu1  ;;  %7222 = vmatmul.mubr.msk.bf16.gmra.mxu1 %vm325_vm1, %v5301_v32  ;;  %v5303_v29 = vpack.c.bf16 %v5285_v46, %v5284_v14 }
 0x316   : > { %v9114_v25 = vadd.f32 %v3989_v58, %v3772_v57  ;;  %v3777_v63 = vadd.f32 %v7019_v47, %v8997_v21  ;;  %v7053_v18 = vpop.f32.mrf.mxu0  ;;  %7225 = vmatprep.mubr.msk.bf16.mxu1 %vm325_vm1, %v5302_v17 }
 0x317   : > { %v3708_v60 = vpop.f32.mrf.mxu1 }
 0x318   : > { %v9118_v59 = vadd.f32 %v7053_v18, %v3777_v63  ;;  %v3775_v3 = vadd.f32 %v3708_v60, %v9001_v61  ;;  %v4002_v33 = vpop.f32.mrf.mxu0 }
 0x319   : > { %v7020_v53 = vpop.f32.mrf.mxu1 }
 0x31a   : > { %v9121_v16 = vadd.f32 %v4002_v33, %v3775_v3  ;;  %v3778_v19 = vadd.f32 %v7020_v53, %v9003_v20  ;;  %v7054_v0 = vpop.f32.mrf.mxu0  ;;  %v5288_v20 = vld [vmem:[#allocation2 + $0x19a] sm:$0xff] }
 0x31b   : > { %v3711_v54 = vpop.f32.mrf.mxu1  ;;  %v5305_v38 = vpack.c.bf16 %v5289_v37, %v5288_v20 }
 0x31c   : > { %v9124_v21 = vadd.f32 %v7054_v0, %v3778_v19  ;;  %v3776_v35 = vadd.f32 %v3711_v54, %v9005_v34  ;;  %v4005_v55 = vpop.f32.mrf.mxu0 }
 0x31d   : > { %v7023_v15 = vpop.f32.mrf.mxu1  ;;  %7226 = vmatmul.mubr.msk.bf16.gmra.mxu1 %vm325_vm1, %v5303_v29 }
 0x31e   : > { %v9128_v61 = vadd.f32 %v4005_v55, %v3776_v35  ;;  %v3781_v56 = vadd.f32 %v7023_v15, %v9013_v52  ;;  %v7057_v51 = vpop.f32.mrf.mxu0  ;;  %7229 = vmatprep.mubr.msk.bf16.mxu1 %vm325_vm1, %v8900_v30 }
 0x31f   : > { %v3724_v45 = vpop.f32.mrf.mxu1 }
 0x320   : > { %v9133_v1 = vadd.f32 %v7057_v51, %v3781_v56  ;;  %v3779_v13 = vadd.f32 %v3724_v45, %v9017_v31  ;;  %v4018_v34 = vpop.f32.mrf.mxu0 }
 0x321   : > { %v7024_v2 = vpop.f32.mrf.mxu1 }
 0x322   : > { %v9136_v44 = vadd.f32 %v4018_v34, %v3779_v13  ;;  %v3782_v32 = vadd.f32 %v7024_v2, %v9019_v28  ;;  %v7058_v57 = vpop.f32.mrf.mxu0 }
 0x323   : > { %v3727_v52 = vpop.f32.mrf.mxu1 }
 0x324   : > { %v9139_v58 = vadd.f32 %v7058_v57, %v3782_v32  ;;  %v3780_v30 = vadd.f32 %v3727_v52, %v9021_v8  ;;  %v4021_v17 = vpop.f32.mrf.mxu0 }
 0x325   : > { %v7027_v47 = vpop.f32.mrf.mxu1  ;;  %7230 = vmatmul.mubr.msk.bf16.gmra.mxu1 %vm325_vm1, %v5305_v38 }
 0x326   : > { %v9143_v63 = vadd.f32 %v4021_v17, %v3780_v30  ;;  %v3785_v31 = vadd.f32 %v7027_v47, %v9027_v9  ;;  %v7061_v18 = vpop.f32.mrf.mxu0 }
 0x327   : > { %v3740_v60 = vpop.f32.mrf.mxu1 }
 0x328   : > { %v9146_v3 = vadd.f32 %v7061_v18, %v3785_v31  ;;  %v3783_v28 = vadd.f32 %v3740_v60, %v9029_v11  ;;  %v4034_v33 = vpop.f32.mrf.mxu0 }
 0x329   : > { %v7028_v14 = vpop.f32.mrf.mxu1 }
 0x32a   : > { %v9149_v46 = vadd.f32 %v4034_v33, %v3783_v28  ;;  %v3786_v8 = vadd.f32 %v7028_v14, %v9031_v40  ;;  %v7062_v53 = vpop.f32.mrf.mxu0 }
 0x32b   : > { %v3743_v19 = vpop.f32.mrf.mxu1 }
 0x32c   : > { %v9152_v0 = vadd.f32 %v7062_v53, %v3786_v8  ;;  %v3784_v54 = vadd.f32 %v3743_v19, %v9033_v41  ;;  %v4037_v29 = vpop.f32.mrf.mxu0 }
 0x32d   : > { %v7067_v9 = vpop.f32.mrf.mxu1 }
 0x32e   : > { %v9155_v35 = vadd.f32 %v4037_v29, %v3784_v54  ;;  %v9158_v55 = vadd.f32 %v7067_v9, %v9040_v27  ;;  %v9160_v11 = vpop.f32.mrf.mxu0 }
 0x32f   : > { %v4216_v15 = vpop.f32.mrf.mxu1 }
 0x330   : > { %v9163_v56 = vadd.f32 %v4216_v15, %v9043_v62  ;;  %v9165_v40 = vpop.f32.mrf.mxu0 }
 0x331   : > { %v7068_v51 = vpop.f32.mrf.mxu1 }
 0x332   : > { %v9168_v20 = vadd.f32 %v7068_v51, %v9046_v42  ;;  %v9170_v41 = vpop.f32.mrf.mxu0 }
 0x333   : > { %v4219_v37 = vpop.f32.mrf.mxu1 }
 0x334   : > { %v9173_v45 = vadd.f32 %v4219_v37, %v9051_v4  ;;  %v9175_v27 = vpop.f32.mrf.mxu0 }
 0x335   : > { %v7071_v13 = vpop.f32.mrf.mxu1 }
 0x336   : > { %v9178_v34 = vadd.f32 %v7071_v13, %v9056_v50  ;;  %v9180_v62 = vpop.f32.mrf.mxu0 }
 0x337   : > { %v4232_v2 = vpop.f32.mrf.mxu1 }
 0x338   : > { %v9183_v38 = vadd.f32 %v4232_v2, %v9059_v48  ;;  %v9185_v42 = vpop.f32.mrf.mxu0 }
 0x339   : > { %v7072_v32 = vpop.f32.mrf.mxu1 }
 0x33a   : > { %v9188_v57 = vadd.f32 %v7072_v32, %v9062_v26  ;;  %v9190_v4 = vpop.f32.mrf.mxu0 }
 0x33b   : > { %v4235_v52 = vpop.f32.mrf.mxu1 }
 0x33c   : > { %v9193_v30 = vadd.f32 %v4235_v52, %v9067_v7  ;;  %v9195_v50 = vpop.f32.mrf.mxu0 }
 0x33d   : > { %v7075_v17 = vpop.f32.mrf.mxu1 }
 0x33e   : > { %v9198_v47 = vadd.f32 %v7075_v17, %v9072_v6  ;;  %v9200_v48 = vpop.f32.mrf.mxu0 }
 0x33f   : > { %v4248_v31 = vpop.f32.mrf.mxu1 }
 0x340   : > { %v9203_v18 = vadd.f32 %v4248_v31, %v9075_v5  ;;  %v9205_v26 = vpop.f32.mrf.mxu0 }
 0x341   : > { %v7076_v60 = vpop.f32.mrf.mxu1 }
 0x342   : > { %v9208_v28 = vadd.f32 %v7076_v60, %v9078_v43  ;;  %v9210_v7 = vpop.f32.mrf.mxu0 }
 0x343   : > { %v4251_v33 = vpop.f32.mrf.mxu1 }
 0x344   : > { %v9213_v14 = vadd.f32 %v4251_v33, %v9083_v36  ;;  %v9215_v6 = vpop.f32.mrf.mxu0 }
 0x345   : > { %v7079_v8 = vpop.f32.mrf.mxu1 }
 0x346   : > { %v9218_v53 = vadd.f32 %v7079_v8, %v9088_v22  ;;  %v9220_v5 = vpop.f32.mrf.mxu0 }
 0x347   : > { %v4264_v19 = vpop.f32.mrf.mxu1 }
 0x348   : > { %v9223_v54 = vadd.f32 %v4264_v19, %v9091_v12  ;;  %v9225_v43 = vpop.f32.mrf.mxu0 }
 0x349   : > { %v7080_v29 = vpop.f32.mrf.mxu1 }
 0x34a   : > { %v9228_v9 = vadd.f32 %v7080_v29, %v9094_v24  ;;  %v9230_v36 = vpop.f32.mrf.mxu0 }
 0x34b   : > { %9841 = vst [vmem:[#allocation3_spill] sm:$0xff] %v9230_v36  ;;  %v4267_v15 = vpop.f32.mrf.mxu1 }
 0x34c   : > { %v9233_v51 = vadd.f32 %v4267_v15, %v9099_v23  ;;  %v9235_v22 = vpop.f32.mrf.mxu0 }
 0x34d   : > { %9843 = vst [vmem:[#allocation60_spill] sm:$0xff] %v9235_v22  ;;  %v7083_v37 = vpop.f32.mrf.mxu1 }
 0x34e   : > { %9842 = vst [vmem:[#allocation7_spill] sm:$0xff] %v9233_v51  ;;  %v9238_v13 = vadd.f32 %v7083_v37, %v9104_v49  ;;  %v9240_v12 = vpop.f32.mrf.mxu0 }
 0x34f   : > { %9845 = vst [vmem:[#allocation4_spill] sm:$0xff] %v9240_v12  ;;  %v4280_v2 = vpop.f32.mrf.mxu1 }
 0x350   : > { %9844 = vst [vmem:[#allocation56_spill] sm:$0xff] %v9238_v13  ;;  %v9243_v32 = vadd.f32 %v4280_v2, %v9107_v39  ;;  %v9245_v24 = vpop.f32.mrf.mxu0 }
 0x351   : > { %9847 = vst [vmem:[#allocation6_spill] sm:$0xff] %v9245_v24  ;;  %v7084_v52 = vpop.f32.mrf.mxu1 }
 0x352   : > { %9846 = vst [vmem:[#allocation5_spill] sm:$0xff] %v9243_v32  ;;  %v9248_v17 = vadd.f32 %v7084_v52, %v9110_v10  ;;  %v9250_v23 = vpop.f32.mrf.mxu0 }
 0x353   : > { %9849 = vst [vmem:[#allocation63_spill] sm:$0xff] %v9250_v23  ;;  %v4283_v31 = vpop.f32.mrf.mxu1 }
 0x354   : > { %9848 = vst [vmem:[#allocation13_spill] sm:$0xff] %v9248_v17  ;;  %v9253_v60 = vadd.f32 %v4283_v31, %v9114_v25  ;;  %v9255_v49 = vpop.f32.mrf.mxu0 }
 0x355   : > { %9851 = vst [vmem:[#allocation8_spill] sm:$0xff] %v9255_v49  ;;  %v7087_v33 = vpop.f32.mrf.mxu1 }
 0x356   : > { %9850 = vst [vmem:[#allocation57_spill] sm:$0xff] %v9253_v60  ;;  %v9258_v8 = vadd.f32 %v7087_v33, %v9118_v59  ;;  %v9260_v39 = vpop.f32.mrf.mxu0 }
 0x357   : > { %9853 = vst [vmem:[#allocation15_spill] sm:$0xff] %v9260_v39  ;;  %v4296_v19 = vpop.f32.mrf.mxu1 }
 0x358   : > { %9852 = vst [vmem:[#allocation14_spill] sm:$0xff] %v9258_v8  ;;  %v9263_v29 = vadd.f32 %v4296_v19, %v9121_v16  ;;  %v9265_v10 = vpop.f32.mrf.mxu0 }
 0x359   : > { %9855 = vst [vmem:[#allocation58_spill] sm:$0xff] %v9265_v10  ;;  %v7088_v15 = vpop.f32.mrf.mxu1 }
 0x35a   : > { %9854 = vst [vmem:[#allocation21_spill] sm:$0xff] %v9263_v29  ;;  %v9268_v37 = vadd.f32 %v7088_v15, %v9124_v21  ;;  %v9270_v25 = vpop.f32.mrf.mxu0 }
 0x35b   : > { %9857 = vst [vmem:[#allocation16_spill] sm:$0xff] %v9270_v25  ;;  %v4299_v2 = vpop.f32.mrf.mxu1 }
 0x35c   : > { %9856 = vst [vmem:[#allocation66_spill] sm:$0xff] %v9268_v37  ;;  %v9273_v52 = vadd.f32 %v4299_v2, %v9128_v61  ;;  %v9275_v59 = vpop.f32.mrf.mxu0 }
 0x35d   : > { %9859 = vst [vmem:[#allocation18_spill] sm:$0xff] %v9275_v59  ;;  %v7091_v31 = vpop.f32.mrf.mxu1 }
 0x35e   : > { %9858 = vst [vmem:[#allocation17_spill] sm:$0xff] %v9273_v52  ;;  %v9278_v33 = vadd.f32 %v7091_v31, %v9133_v1  ;;  %v9280_v16 = vpop.f32.mrf.mxu0 }
 0x35f   : > { %9861 = vst [vmem:[#allocation59_spill] sm:$0xff] %v9280_v16  ;;  %v4312_v19 = vpop.f32.mrf.mxu1 }
 0x360   : > { %9860 = vst [vmem:[#allocation19_spill] sm:$0xff] %v9278_v33  ;;  %v9283_v10 = vadd.f32 %v4312_v19, %v9136_v44  ;;  %v9285_v21 = vpop.f32.mrf.mxu0 }
 0x361   : > { %9863 = vst [vmem:[#allocation69_spill] sm:$0xff] %v9285_v21  ;;  %v7092_v15 = vpop.f32.mrf.mxu1 }
 0x362   : > { %9862 = vst [vmem:[#allocation20_spill] sm:$0xff] %v9283_v10  ;;  %v9288_v25 = vadd.f32 %v7092_v15, %v9139_v58  ;;  %v9290_v61 = vpop.f32.mrf.mxu0 }
 0x363   : > { %9865 = vst [vmem:[#allocation61_spill] sm:$0xff] %v9290_v61  ;;  %v4315_v2 = vpop.f32.mrf.mxu1 }
 0x364   : > { %9864 = vst [vmem:[#allocation22_spill] sm:$0xff] %v9288_v25  ;;  %v9293_v59 = vadd.f32 %v4315_v2, %v9143_v63  ;;  %v9295_v1 = vpop.f32.mrf.mxu0 }
 0x365   : > { %9867 = vst [vmem:[#allocation74_spill] sm:$0xff] %v9295_v1  ;;  %v7095_v31 = vpop.f32.mrf.mxu1 }
 0x366   : > { %9866 = vst [vmem:[#allocation55_spill] sm:$0xff] %v9293_v59  ;;  %v9298_v16 = vadd.f32 %v7095_v31, %v9146_v3  ;;  %v9300_v44 = vpop.f32.mrf.mxu0 }
 0x367   : > { %9869 = vst [vmem:[#allocation23_spill] sm:$0xff] %v9300_v44  ;;  %v4328_v19 = vpop.f32.mrf.mxu1 }
 0x368   : > { %9868 = vst [vmem:[#allocation62_spill] sm:$0xff] %v9298_v16  ;;  %v9303_v21 = vadd.f32 %v4328_v19, %v9149_v46  ;;  %v9305_v58 = vpop.f32.mrf.mxu0 }
 0x369   : > { %9871 = vst [vmem:[#allocation29_spill] sm:$0xff] %v9305_v58  ;;  %v7096_v15 = vpop.f32.mrf.mxu1 }
 0x36a   : > { %9870 = vst [vmem:[#allocation24_spill] sm:$0xff] %v9303_v21  ;;  %v9308_v61 = vadd.f32 %v7096_v15, %v9152_v0  ;;  %v9310_v63 = vpop.f32.mrf.mxu0 }
 0x36b   : > { %9873 = vst [vmem:[#allocation77_spill] sm:$0xff] %v9310_v63  ;;  %v4331_v2 = vpop.f32.mrf.mxu1 }
 0x36c   : > { %9872 = vst [vmem:[#allocation64_spill] sm:$0xff] %v9308_v61  ;;  %v9313_v1 = vadd.f32 %v4331_v2, %v9155_v35  ;;  %v9315_v3 = vpop.f32.mrf.mxu0 }
 0x36d   : > { %9875 = vst [vmem:[#allocation25_spill] sm:$0xff] %v9315_v3  ;;  %v7135_v31 = vpop.f32.mrf.mxu1 }
 0x36e   : > { %9874 = vst [vmem:[#allocation9_spill] sm:$0xff] %v9313_v1  ;;  %v7169_v44 = vpop.f32.mrf.mxu0 }
 0x36f   : > { %v4805_v16 = vpop.f32.mrf.mxu1 }
 0x370   : > { %v5099_v59 = vpop.f32.mrf.mxu0 }
 0x371   : > { %v7136_v46 = vpop.f32.mrf.mxu1 }
 0x372   : > { %v7170_v21 = vpop.f32.mrf.mxu0 }
 0x373   : > { %v4808_v19 = vpop.f32.mrf.mxu1 }
 0x374   : > { %v9319_v0 = vpop.f32.mrf.mxu0 }
 0x375   : > { %v7139_v58 = vpop.f32.mrf.mxu1 }
 0x376   : > { %v9325_v35 = vpop.f32.mrf.mxu0 }
 0x377   : > { %v9317_v25 = vpop.f32.mrf.mxu1 }
 0x378   : > { %v9331_v1 = vpop.f32.mrf.mxu0 }
 0x379   : > { %v9321_v15 = vpop.f32.mrf.mxu1 }
 0x37a   : > { %v9337_v33 = vpop.f32.mrf.mxu0 }
 0x37b   : > { %v9323_v63 = vpop.f32.mrf.mxu1 }
 0x37c   : > { %v9343_v29 = vpop.f32.mrf.mxu0 }
 0x37d   : > { %v9327_v2 = vpop.f32.mrf.mxu1 }
 0x37e   : > { %v9349_v49 = vpop.f32.mrf.mxu0 }
 0x37f   : > { %v9329_v3 = vpop.f32.mrf.mxu1 }
 0x380   : > { %v9355_v17 = vpop.f32.mrf.mxu0 }
 0x381   : > { %v9333_v61 = vpop.f32.mrf.mxu1 }
 0x382   : > { %v9361_v12 = vpop.f32.mrf.mxu0 }
 0x383   : > { %v9335_v10 = vpop.f32.mrf.mxu1 }
 0x385   : > { %v9339_v52 = vpop.f32.mrf.mxu1 }
 0x387   : > { %v9341_v37 = vpop.f32.mrf.mxu1 }
 0x388   : > { %9876 = vst [vmem:[#allocation26_spill] sm:$0xff] %v9341_v37 }
 0x389   : > { %v9345_v39 = vpop.f32.mrf.mxu1 }
 0x38a   : > { %9877 = vst [vmem:[#allocation65_spill] sm:$0xff] %v9345_v39  ;;  %v9367_v39 = vpop.f32.mrf.mxu0 }
 0x38b   : > { %v9347_v8 = vpop.f32.mrf.mxu1 }
 0x38c   : > { %9878 = vst [vmem:[#allocation80_spill] sm:$0xff] %v9347_v8 }
 0x38d   : > { %v9351_v60 = vpop.f32.mrf.mxu1 }
 0x38e   : > { %9879 = vst [vmem:[#allocation27_spill] sm:$0xff] %v9351_v60  ;;  %v9373_v60 = vpop.f32.mrf.mxu0 }
 0x38f   : > { %v9353_v23 = vpop.f32.mrf.mxu1  ;;  %9887 = vst [vmem:[#allocation70_spill] sm:$0xff] %v9373_v60 }
 0x390   : > { %9880 = vst [vmem:[#allocation28_spill] sm:$0xff] %v9353_v23 }
 0x391   : > { %v9357_v24 = vpop.f32.mrf.mxu1 }
 0x392   : > { %9881 = vst [vmem:[#allocation30_spill] sm:$0xff] %v9357_v24  ;;  %v9379_v24 = vpop.f32.mrf.mxu0 }
 0x393   : > { %v9359_v32 = vpop.f32.mrf.mxu1  ;;  %9890 = vst [vmem:[#allocation33_spill] sm:$0xff] %v9379_v24 }
 0x394   : > { %9882 = vst [vmem:[#allocation67_spill] sm:$0xff] %v9359_v32 }
 0x395   : > { %v9363_v13 = vpop.f32.mrf.mxu1 }
 0x396   : > { %9883 = vst [vmem:[#allocation68_spill] sm:$0xff] %v9363_v13  ;;  %v9385_v13 = vpop.f32.mrf.mxu0 }
 0x397   : > { %v9365_v22 = vpop.f32.mrf.mxu1  ;;  %9893 = vst [vmem:[#allocation35_spill] sm:$0xff] %v9385_v13 }
 0x398   : > { %9884 = vst [vmem:[#allocation31_spill] sm:$0xff] %v9365_v22 }
 0x399   : > { %v9369_v8 = vpop.f32.mrf.mxu1 }
 0x39a   : > { %9885 = vst [vmem:[#allocation32_spill] sm:$0xff] %v9369_v8  ;;  %v4639_v8 = vadd.f32 %v9160_v11, %v9158_v55  ;;  %v4638_v55 = vadd.f32 %v9175_v27, %v9173_v45  ;;  %v4641_v45 = vadd.f32 %v9185_v42, %v9183_v38 }
 0x39b   : > { %v9371_v51 = vpop.f32.mrf.mxu1 }
 0x39c   : > { %9886 = vst [vmem:[#allocation37_spill] sm:$0xff] %v9371_v51  ;;  %v4934_v60 = vadd.f32 %v7135_v31, %v4639_v8  ;;  %v4644_v31 = vadd.f32 %v9190_v4, %v9188_v57  ;;  %v6283_v57 = vld [vmem:[%s7332_s6 + $0x39] sm:$0xff] }
 0x39d   : > { %v9375_v23 = vpop.f32.mrf.mxu1 }
 0x39e   : > { %9888 = vst [vmem:[#allocation10_spill] sm:$0xff] %v9375_v23  ;;  %v4637_v23 = vadd.f32 %v9165_v40, %v9163_v56  ;;  %v5228_v11 = vadd.f32 %v7169_v44, %v4934_v60  ;;  %v4643_v56 = vadd.f32 %v9180_v62, %v9178_v34 }
 0x39f   : > { %v9377_v37 = vpop.f32.mrf.mxu1 }
 0x3a0   : > { %9889 = vst [vmem:[#allocation11_spill] sm:$0xff] %v9377_v37  ;;  %v9395_v37 = vpop.f32.mrf.mxu0  ;;  %v4938_v27 = vadd.f32 %v7139_v58, %v4643_v56 }
 0x3a1   : > { %v9381_v32 = vpop.f32.mrf.mxu1 }
 0x3a2   : > { %9891 = vst [vmem:[#allocation34_spill] sm:$0xff] %v9381_v32  ;;  %v4932_v32 = vadd.f32 %v4805_v16, %v4637_v23  ;;  %v4933_v23 = vadd.f32 %v4808_v19, %v4638_v55  ;;  %v5232_v19 = vadd.f32 %v9325_v35, %v4938_v27  ;;  %v4939_v55 = vadd.f32 %v9321_v15, %v4644_v31 }
 0x3a3   : > { %v9383_v36 = vpop.f32.mrf.mxu1 }
 0x3a4   : > { %9892 = vst [vmem:[#allocation71_spill] sm:$0xff] %v9383_v36  ;;  %v4640_v36 = vadd.f32 %v9170_v41, %v9168_v20  ;;  %v9412_v20 = vld [vmem:[%s9677_s4] ss:$0 sm:$0xff]  ;;  %v5226_v41 = vadd.f32 %v5099_v59, %v4932_v32  ;;  %v4936_v32 = vadd.f32 %v9317_v25, %v4641_v45  ;;  %v5227_v38 = vadd.f32 %v9319_v0, %v4933_v23 }
 0x3a5   : > { %v9387_v22 = vpop.f32.mrf.mxu1  ;;  %v6280_v59 = vld [vmem:[%s7332_s6 + $0x19] sm:$0xff] }
 0x3a6   : > { %9894 = vst [vmem:[#allocation36_spill] sm:$0xff] %v9387_v22  ;;  %v9405_v22 = vpop.f32.mrf.mxu0  ;;  %v5230_v15 = vadd.f32 %v9331_v1, %v4936_v32  ;;  %v6286_v1 = vld [vmem:[%s7332_s6 + $0x61] sm:$0xff] }
 0x3a7   : > { %v9391_v51 = vpop.f32.mrf.mxu1 }
 0x3a8   : > { %9895 = vst [vmem:[#allocation38_spill] sm:$0xff] %v9391_v51  ;;  %v4935_v51 = vadd.f32 %v7136_v46, %v4640_v36  ;;  %v6282_v36 = vld [vmem:[%s7332_s6 + $0x31] sm:$0xff]  ;;  %v9417_v44 = vpop.f32.mrf.mxu0 }
 0x3a9   : > { %v9397_v24 = vpop.f32.mrf.mxu1 }
 0x3aa   : > { %v5229_v16 = vadd.f32 %v7170_v21, %v4935_v51  ;;  %v4642_v21 = vadd.f32 %v9195_v50, %v9193_v30  ;;  %v9437_v25 = vpop.f32.mrf.mxu0  ;;  %v4647_v50 = vadd.f32 %v9200_v48, %v9198_v47  ;;  %v5233_v47 = vadd.f32 %v9337_v33, %v4939_v55 }
 0x3ab   : > { %v9401_v13 = vpop.f32.mrf.mxu1 }
 0x3ac   : > { %v4937_v35 = vadd.f32 %v9323_v63, %v4642_v21  ;;  %v4942_v48 = vadd.f32 %v9327_v2, %v4647_v50  ;;  %v6284_v2 = vld [vmem:[%s7332_s6 + $0x49] sm:$0xff]  ;;  %v4649_v50 = vadd.f32 %v9225_v43, %v9223_v54 }
 0x3ad   : > { %v7203_v40 = vpop.f32.mrf.mxu1 }
 0x3ae   : > { %v5522_v8 = vadd.f32 %v7203_v40, %v5228_v11  ;;  %v6281_v40 = vld [vmem:[%s7332_s6 + $0x21] sm:$0xff] }
 0x3af   : > { %v5393_v60 = vpop.f32.mrf.mxu1 }
 0x3b0   : > { %v5561_v34 = vadd.f32 %v9412_v20, %v5522_v8  ;;  %v5520_v62 = vadd.f32 %v5393_v60, %v5226_v41  ;;  %v9453_v60 = vpop.f32.mrf.mxu0 }
 0x3b1   : > { %v7204_v46 = vpop.f32.mrf.mxu1 }
 0x3b2   : > { %v5625_v42 = vadd.f32 %v6282_v36, %v5561_v34  ;;  %v5559_v58 = vadd.f32 %v9412_v20, %v5520_v62  ;;  %v5523_v51 = vadd.f32 %v7204_v46, %v5229_v16  ;;  %v4645_v36 = vadd.f32 %v9205_v26, %v9203_v18 }
 0x3b3   : > { %v5396_v4 = vpop.f32.mrf.mxu1  ;;  %v4648_v18 = vadd.f32 %v9210_v7, %v9208_v28  ;;  %v5231_v26 = vadd.f32 %v9343_v29, %v4937_v35  ;;  %v5236_v28 = vadd.f32 %v9349_v49, %v4942_v48  ;;  %v6287_v29 = vld [vmem:[%s7332_s6 + $0x69] sm:$0xff] }
 0x3b4   : > { %v5657_v0 = vmax.f32 %v5625_v42, 0.0  ;;  %v5623_v11 = vadd.f32 %v6280_v59, %v5559_v58  ;;  %v5562_v56 = vadd.f32 %v9412_v20, %v5523_v51  ;;  %v5521_v30 = vadd.f32 %v5396_v4, %v5227_v38  ;;  %v9471_v51 = vpop.f32.mrf.mxu0 }
 0x3b5   : > { %v7207_v41 = vpop.f32.mrf.mxu1  ;;  %v4940_v33 = vadd.f32 %v9329_v3, %v4645_v36  ;;  %v4646_v58 = vadd.f32 %v9215_v6, %v9213_v14  ;;  %v4943_v7 = vadd.f32 %v9333_v61, %v4648_v18  ;;  %v4651_v14 = vadd.f32 %v9220_v5, %v9218_v53  ;;  %v6285_v61 = vld [vmem:[%s7332_s6 + $0x51] sm:$0xff]  ;;  %v6291_v18 = vld [vmem:[%s7332_s6 + $0x99] sm:$0xff] }
 0x3b6   : > { %5689 = vst.msk [vmem:[%s9434_s21 + $0x10] sm:$0xff] %vm325_vm1, %v5657_v0  ;;  %v5655_v23 = vmax.f32 %v5623_v11, 0.0  ;;  %v5626_v8 = vadd.f32 %v6283_v57, %v5562_v56  ;;  %v5560_v45 = vadd.f32 %v9412_v20, %v5521_v30  ;;  %v5526_v27 = vadd.f32 %v7207_v41, %v5232_v19 }
 0x3b7   : > { %v5409_v63 = vpop.f32.mrf.mxu1  ;;  %v5234_v6 = vadd.f32 %v9355_v17, %v4940_v33  ;;  %v4941_v49 = vadd.f32 %v9335_v10, %v4646_v58  ;;  %v5237_v53 = vadd.f32 %v9361_v12, %v4943_v7  ;;  %v4946_v5 = vadd.f32 %v9339_v52, %v4651_v14  ;;  %v6290_v17 = vld [vmem:[%s7332_s6 + $0x91] sm:$0xff]  ;;  %v9897_v12 = vld [vmem:[#allocation26_spill] sm:$0xff] }
 0x3b8   : > { %5687 = vst.msk [vmem:[%s9434_s21] sm:$0xff] %vm325_vm1, %v5655_v23  ;;  %v5658_v16 = vmax.f32 %v5626_v8, 0.0  ;;  %v5624_v34 = vadd.f32 %v6281_v40, %v5560_v45  ;;  %v5565_v62 = vadd.f32 %v9412_v20, %v5526_v27  ;;  %v5524_v31 = vadd.f32 %v5409_v63, %v5230_v15  ;;  %v9489_v15 = vpop.f32.mrf.mxu0  ;;  %v9896_v8 = vld [vmem:[#allocation3_spill] sm:$0xff]  ;;  %v6288_v45 = vld [vmem:[%s7332_s6 + $0x79] sm:$0xff] }
 0x3b9   : > { %v7208_v32 = vpop.f32.mrf.mxu1  ;;  %v4652_v54 = vadd.f32 %v9896_v8, %v9228_v9  ;;  %v5235_v43 = vadd.f32 %v9367_v39, %v4941_v49  ;;  %v4944_v52 = vadd.f32 %v9897_v12, %v4649_v50  ;;  %v9898_v63 = vld [vmem:[#allocation7_spill] sm:$0xff]  ;;  %v9906_v49 = vld [vmem:[#allocation5_spill] sm:$0xff] }
 0x3ba   : > { %5690 = vst.msk [vmem:[%s9434_s21 + $0x18] sm:$0xff] %vm325_vm1, %v5658_v16  ;;  %v5656_v59 = vmax.f32 %v5624_v34, 0.0  ;;  %v5629_v46 = vadd.f32 %v6286_v1, %v5565_v62  ;;  %v5563_v38 = vadd.f32 %v9412_v20, %v5524_v31  ;;  %v5527_v42 = vadd.f32 %v7208_v32, %v5233_v47  ;;  %v9899_v16 = vld [vmem:[#allocation60_spill] sm:$0xff]  ;;  %v9900_v62 = vld [vmem:[#allocation70_spill] sm:$0xff]  ;;  %v9901_v31 = vld [vmem:[#allocation65_spill] sm:$0xff]  ;;  %v9507_v33 = vpop.f32.mrf.mxu0 }
 0x3bb   : > { %v5412_v3 = vpop.f32.mrf.mxu1  ;;  %v4650_v34 = vadd.f32 %v9899_v16, %v9898_v63  ;;  %v5240_v9 = vadd.f32 %v9900_v62, %v4946_v5  ;;  %v4947_v39 = vadd.f32 %v9901_v31, %v4652_v54  ;;  %v6294_v50 = vld [vmem:[%s7332_s6 + $0xc1] sm:$0xff]  ;;  %v9914_v63 = vld [vmem:[#allocation8_spill] sm:$0xff] }
 0x3bc   : > { %5688 = vst.msk [vmem:[%s9434_s21 + $0x8] sm:$0xff] %vm325_vm1, %v5656_v59  ;;  %v5661_v21 = vmax.f32 %v5629_v46, 0.0  ;;  %v5627_v19 = vadd.f32 %v6284_v2, %v5563_v38  ;;  %v5566_v55 = vadd.f32 %v9412_v20, %v5527_v42  ;;  %v5525_v57 = vadd.f32 %v5412_v3, %v5231_v26  ;;  %v9902_v38 = vld [vmem:[#allocation56_spill] sm:$0xff]  ;;  %v9525_v5 = vpop.f32.mrf.mxu0  ;;  %v9915_v62 = vld [vmem:[#allocation30_spill] sm:$0xff] }
 0x3bd   : > { %v7211_v4 = vpop.f32.mrf.mxu1  ;;  %v9903_v42 = vld [vmem:[#allocation4_spill] sm:$0xff] }
 0x3be   : > { %5693 = vst.msk [vmem:[%s9434_s21 + $0x30] sm:$0xff] %vm325_vm1, %v5661_v21  ;;  %v5659_v0 = vmax.f32 %v5627_v19, 0.0  ;;  %v5630_v11 = vadd.f32 %v6287_v29, %v5566_v55  ;;  %v5564_v56 = vadd.f32 %v9412_v20, %v5525_v57  ;;  %v5530_v30 = vadd.f32 %v7211_v4, %v5236_v28  ;;  %v9904_v28 = vld [vmem:[#allocation33_spill] sm:$0xff]  ;;  %v9905_v29 = vld [vmem:[#allocation80_spill] sm:$0xff] }
 0x3bf   : > { %v5425_v10 = vpop.f32.mrf.mxu1  ;;  %v4655_v58 = vadd.f32 %v9903_v42, %v9902_v38  ;;  %v5238_v7 = vadd.f32 %v9904_v28, %v4944_v52  ;;  %v4945_v3 = vadd.f32 %v9905_v29, %v4650_v34  ;;  %v6289_v21 = vld [vmem:[%s7332_s6 + $0x81] sm:$0xff]  ;;  %v6292_v52 = vld [vmem:[%s7332_s6 + $0xa9] sm:$0xff]  ;;  %v6293_v28 = vld [vmem:[%s7332_s6 + $0xb1] sm:$0xff] }
 0x3c0   : > { %5691 = vst.msk [vmem:[%s9434_s21 + $0x20] sm:$0xff] %vm325_vm1, %v5659_v0  ;;  %v5662_v35 = vmax.f32 %v5630_v11, 0.0  ;;  %v5628_v40 = vadd.f32 %v6285_v61, %v5564_v56  ;;  %v5569_v41 = vadd.f32 %v9412_v20, %v5530_v30  ;;  %v5528_v23 = vadd.f32 %v5425_v10, %v5234_v6  ;;  %v9907_v61 = vld [vmem:[#allocation6_spill] sm:$0xff]  ;;  %v9908_v0 = vld [vmem:[#allocation35_spill] sm:$0xff] }
 0x3c1   : > { %v7212_v27 = vpop.f32.mrf.mxu1  ;;  %v4653_v4 = vadd.f32 %v9907_v61, %v9906_v49  ;;  %v5241_v11 = vadd.f32 %v9908_v0, %v4947_v39  ;;  %v9909_v56 = vld [vmem:[#allocation27_spill] sm:$0xff]  ;;  %v5239_v54 = vadd.f32 %v9395_v37, %v4945_v3  ;;  %v9543_v39 = vpop.f32.mrf.mxu0  ;;  %v9921_v49 = vld [vmem:[#allocation68_spill] sm:$0xff] }
 0x3c2   : > { %5694 = vst.msk [vmem:[%s9434_s21 + $0x38] sm:$0xff] %vm325_vm1, %v5662_v35  ;;  %v5660_v36 = vmax.f32 %v5628_v40, 0.0  ;;  %v5633_v47 = vadd.f32 %v6290_v17, %v5569_v41  ;;  %v5567_v48 = vadd.f32 %v9412_v20, %v5528_v23  ;;  %v5531_v1 = vadd.f32 %v7212_v27, %v5237_v53  ;;  %v9910_v41 = vld [vmem:[#allocation13_spill] sm:$0xff]  ;;  %v9911_v23 = vld [vmem:[#allocation63_spill] sm:$0xff] }
 0x3c3   : > { %v5428_v26 = vpop.f32.mrf.mxu1  ;;  %v4950_v30 = vadd.f32 %v9909_v56, %v4655_v58  ;;  %v4656_v8 = vadd.f32 %v9911_v23, %v9910_v41  ;;  %v9918_v42 = vld [vmem:[#allocation67_spill] sm:$0xff]  ;;  %v9561_v0 = vpop.f32.mrf.mxu0  ;;  %v6296_v41 = vld [vmem:[%s7332_s6 + $0xd9] sm:$0xff] }
 0x3c4   : > { %5692 = vst.msk [vmem:[%s9434_s21 + $0x28] sm:$0xff] %vm325_vm1, %v5660_v36  ;;  %v5665_v2 = vmax.f32 %v5633_v47, 0.0  ;;  %v5631_v32 = vadd.f32 %v6288_v45, %v5567_v48  ;;  %v5570_v59 = vadd.f32 %v9412_v20, %v5531_v1  ;;  %v5529_v46 = vadd.f32 %v5428_v26, %v5235_v43  ;;  %v9912_v43 = vld [vmem:[#allocation28_spill] sm:$0xff]  ;;  %v9913_v1 = vld [vmem:[#allocation57_spill] sm:$0xff] }
 0x3c5   : > { %v7215_v19 = vpop.f32.mrf.mxu1  ;;  %v4948_v12 = vadd.f32 %v9912_v43, %v4653_v4  ;;  %v4654_v16 = vadd.f32 %v9914_v63, %v9913_v1  ;;  %v5244_v34 = vadd.f32 %v9405_v22, %v4950_v30  ;;  %v4951_v37 = vadd.f32 %v9915_v62, %v4656_v8  ;;  %v6298_v61 = vld [vmem:[%s7332_s6 + $0xf1] sm:$0xff]  ;;  %v7194_v63 = vpop.f32.mrf.mxu0 }
 0x3c6   : > { %5697 = vst.msk [vmem:[%s9434_s21 + $0x50] sm:$0xff] %vm325_vm1, %v5665_v2  ;;  %v5663_v55 = vmax.f32 %v5631_v32, 0.0  ;;  %v5634_v57 = vadd.f32 %v6291_v18, %v5570_v59  ;;  %v5568_v14 = vadd.f32 %v9412_v20, %v5529_v46  ;;  %v5534_v6 = vadd.f32 %v7215_v19, %v5240_v9  ;;  %v6295_v9 = vld [vmem:[%s7332_s6 + $0xc9] sm:$0xff] }
 0x3c7   : > { %v5441_v53 = vpop.f32.mrf.mxu1  ;;  %v9916_v59 = vld [vmem:[#allocation14_spill] sm:$0xff]  ;;  %v9917_v46 = vld [vmem:[#allocation15_spill] sm:$0xff]  ;;  %v5242_v22 = vadd.f32 %v9417_v44, %v4948_v12  ;;  %v4949_v58 = vadd.f32 %v9918_v42, %v4654_v16 }
 0x3c8   : > { %5695 = vst.msk [vmem:[%s9434_s21 + $0x40] sm:$0xff] %vm325_vm1, %v5663_v55  ;;  %v5666_v17 = vmax.f32 %v5634_v57, 0.0  ;;  %v5632_v10 = vadd.f32 %v6289_v21, %v5568_v14  ;;  %v5573_v35 = vadd.f32 %v9412_v20, %v5534_v6  ;;  %v5532_v40 = vadd.f32 %v5441_v53, %v5238_v7  ;;  %v9919_v55 = vld [vmem:[#allocation21_spill] sm:$0xff]  ;;  %v9920_v57 = vld [vmem:[#allocation58_spill] sm:$0xff] }
 0x3c9   : > { %v7216_v45 = vpop.f32.mrf.mxu1  ;;  %v4659_v38 = vadd.f32 %v9917_v46, %v9916_v59  ;;  %v4657_v14 = vadd.f32 %v9920_v57, %v9919_v55  ;;  %v5245_v6 = vadd.f32 %v9437_v25, %v4951_v37  ;;  %v9922_v53 = vld [vmem:[#allocation66_spill] sm:$0xff]  ;;  %v5243_v25 = vadd.f32 %v9453_v60, %v4949_v58  ;;  %v9931_v58 = vld [vmem:[#allocation20_spill] sm:$0xff]  ;;  %v5198_v55 = vpop.f32.mrf.mxu0 }
 0x3ca   : > { %5698 = vst.msk [vmem:[%s9434_s21 + $0x58] sm:$0xff] %vm325_vm1, %v5666_v17  ;;  %v5664_v27 = vmax.f32 %v5632_v10, 0.0  ;;  %v5637_v36 = vadd.f32 %v6294_v50, %v5573_v35  ;;  %v5571_v47 = vadd.f32 %v9412_v20, %v5532_v40  ;;  %v5535_v48 = vadd.f32 %v7216_v45, %v5241_v11  ;;  %v9923_v17 = vld [vmem:[#allocation16_spill] sm:$0xff]  ;;  %v9924_v35 = vld [vmem:[#allocation31_spill] sm:$0xff]  ;;  %v9926_v45 = vld [vmem:[#allocation18_spill] sm:$0xff] }
 0x3cb   : > { %v5444_v31 = vpop.f32.mrf.mxu1  ;;  %v4954_v44 = vadd.f32 %v9921_v49, %v4659_v38  ;;  %v4660_v10 = vadd.f32 %v9923_v17, %v9922_v53  ;;  %v4952_v40 = vadd.f32 %v9924_v35, %v4657_v14  ;;  %v7197_v53 = vpop.f32.mrf.mxu0 }
 0x3cc   : > { %5696 = vst.msk [vmem:[%s9434_s21 + $0x48] sm:$0xff] %vm325_vm1, %v5664_v27  ;;  %v5669_v18 = vmax.f32 %v5637_v36, 0.0  ;;  %v5635_v26 = vadd.f32 %v6292_v52, %v5571_v47  ;;  %v5574_v2 = vadd.f32 %v9412_v20, %v5535_v48  ;;  %v5533_v32 = vadd.f32 %v5444_v31, %v5239_v54  ;;  %v9925_v52 = vld [vmem:[#allocation17_spill] sm:$0xff]  ;;  %v9927_v47 = vld [vmem:[#allocation32_spill] sm:$0xff]  ;;  %v9929_v31 = vld [vmem:[#allocation59_spill] sm:$0xff] }
 0x3cd   : > { %v7219_v7 = vpop.f32.mrf.mxu1  ;;  %v4658_v27 = vadd.f32 %v9926_v45, %v9925_v52  ;;  %v5248_v36 = vadd.f32 %v9471_v51, %v4954_v44  ;;  %v4955_v60 = vadd.f32 %v9927_v47, %v4660_v10  ;;  %v6299_v48 = vld [vmem:[%s7332_s6 + $0xf9] sm:$0xff]  ;;  %v9934_v44 = vld [vmem:[#allocation22_spill] sm:$0xff] }
 0x3ce   : > { %5701 = vst.msk [vmem:[%s9434_s21 + $0x70] sm:$0xff] %vm325_vm1, %v5669_v18  ;;  %v5667_v29 = vmax.f32 %v5635_v26, 0.0  ;;  %v5638_v3 = vadd.f32 %v6295_v9, %v5574_v2  ;;  %v5572_v21 = vadd.f32 %v9412_v20, %v5533_v32  ;;  %v5538_v19 = vadd.f32 %v7219_v7, %v5244_v34  ;;  %v9928_v9 = vld [vmem:[#allocation19_spill] sm:$0xff]  ;;  %v9930_v51 = vld [vmem:[#allocation37_spill] sm:$0xff]  ;;  %v9940_v47 = vld [vmem:[#allocation62_spill] sm:$0xff] }
 0x3cf   : > { %v5457_v4 = vpop.f32.mrf.mxu1  ;;  %v4663_v18 = vadd.f32 %v9929_v31, %v9928_v9  ;;  %v5246_v26 = vadd.f32 %v9489_v15, %v4952_v40  ;;  %v4953_v2 = vadd.f32 %v9930_v51, %v4658_v27  ;;  %v6297_v32 = vld [vmem:[%s7332_s6 + $0xe1] sm:$0xff]  ;;  %v9937_v40 = vld [vmem:[#allocation55_spill] sm:$0xff]  ;;  %v9943_v51 = vld [vmem:[#allocation24_spill] sm:$0xff] }
 0x3d0   : > { %5699 = vst.msk [vmem:[%s9434_s21 + $0x60] sm:$0xff] %vm325_vm1, %v5667_v29  ;;  %v5670_v11 = vmax.f32 %v5638_v3, 0.0  ;;  %v5636_v56 = vadd.f32 %v6293_v28, %v5572_v21  ;;  %v5577_v30 = vadd.f32 %v9412_v20, %v5538_v19  ;;  %v5536_v50 = vadd.f32 %v5457_v4, %v5242_v22  ;;  %v9932_v28 = vld [vmem:[#allocation69_spill] sm:$0xff]  ;;  %v9933_v3 = vld [vmem:[#allocation10_spill] sm:$0xff] }
 0x3d1   : > { %v7220_v23 = vpop.f32.mrf.mxu1  ;;  %v4661_v7 = vadd.f32 %v9932_v28, %v9931_v58  ;;  %v5249_v29 = vadd.f32 %v9507_v33, %v4955_v60  ;;  %v4958_v15 = vadd.f32 %v9933_v3, %v4663_v18  ;;  %v6302_v21 = vld [vmem:[%s7332_s6 + $0x121] sm:$0xff]  ;;  %v5247_v33 = vadd.f32 %v9525_v5, %v4953_v2  ;;  %v9941_v60 = vld [vmem:[#allocation23_spill] sm:$0xff] }
 0x3d2   : > { %5702 = vst.msk [vmem:[%s9434_s21 + $0x78] sm:$0xff] %vm325_vm1, %v5670_v11  ;;  %v5668_v8 = vmax.f32 %v5636_v56, 0.0  ;;  %v5641_v54 = vadd.f32 %v6298_v61, %v5577_v30  ;;  %v5575_v43 = vadd.f32 %v9412_v20, %v5536_v50  ;;  %v5539_v12 = vadd.f32 %v7220_v23, %v5245_v6  ;;  %v9935_v61 = vld [vmem:[#allocation61_spill] sm:$0xff]  ;;  %v9936_v11 = vld [vmem:[#allocation11_spill] sm:$0xff]  ;;  %v9939_v5 = vld [vmem:[#allocation34_spill] sm:$0xff] }
 0x3d3   : > { %v5460_v1 = vpop.f32.mrf.mxu1  ;;  %v4664_v4 = vadd.f32 %v9935_v61, %v9934_v44  ;;  %v4956_v56 = vadd.f32 %v9936_v11, %v4661_v7  ;;  %v6300_v30 = vld [vmem:[%s7332_s6 + $0x109] sm:$0xff]  ;;  %v9944_v2 = vld [vmem:[#allocation29_spill] sm:$0xff] }
 0x3d4   : > { %5700 = vst.msk [vmem:[%s9434_s21 + $0x68] sm:$0xff] %vm325_vm1, %v5668_v8  ;;  %v5673_v16 = vmax.f32 %v5641_v54, 0.0  ;;  %v5639_v34 = vadd.f32 %v6296_v41, %v5575_v43  ;;  %v5578_v62 = vadd.f32 %v9412_v20, %v5539_v12  ;;  %v5537_v37 = vadd.f32 %v5460_v1, %v5243_v25  ;;  %v9938_v41 = vld [vmem:[#allocation74_spill] sm:$0xff]  ;;  %v9947_v3 = vld [vmem:[#allocation77_spill] sm:$0xff] }
 0x3d5   : > { %v7223_v59 = vpop.f32.mrf.mxu1  ;;  %v4662_v23 = vadd.f32 %v9938_v41, %v9937_v40  ;;  %v5252_v8 = vadd.f32 %v9543_v39, %v4958_v15  ;;  %v4959_v54 = vadd.f32 %v9939_v5, %v4664_v4  ;;  %v6303_v43 = vld [vmem:[%s7332_s6 + $0x129] sm:$0xff]  ;;  %v5250_v1 = vadd.f32 %v9561_v0, %v4956_v56  ;;  %v9950_v11 = vld [vmem:[#allocation25_spill] sm:$0xff] }
 0x3d6   : > { %5705 = vst.msk [vmem:[%s9434_s21 + $0x90] sm:$0xff] %vm325_vm1, %v5673_v16  ;;  %v5671_v46 = vmax.f32 %v5639_v34, 0.0  ;;  %v5642_v38 = vadd.f32 %v6299_v48, %v5578_v62  ;;  %v5576_v22 = vadd.f32 %v9412_v20, %v5537_v37  ;;  %v5542_v42 = vadd.f32 %v7223_v59, %v5248_v36  ;;  %v9942_v16 = vld [vmem:[#allocation71_spill] sm:$0xff]  ;;  %v5211_v37 = vpop.f32.mrf.mxu0 }
 0x3d7   : > { %v5473_v19 = vpop.f32.mrf.mxu1  ;;  %v4667_v48 = vadd.f32 %v9941_v60, %v9940_v47  ;;  %v4957_v39 = vadd.f32 %v9942_v16, %v4662_v23  ;;  %v6301_v34 = vld [vmem:[%s7332_s6 + $0x111] sm:$0xff]  ;;  %v5253_v59 = vadd.f32 %v7194_v63, %v4959_v54  ;;  %v6304_v63 = vld [vmem:[%s7332_s6 + $0x139] sm:$0xff] }
 0x3d8   : > { %5703 = vst.msk [vmem:[%s9434_s21 + $0x80] sm:$0xff] %vm325_vm1, %v5671_v46  ;;  %v5674_v57 = vmax.f32 %v5642_v38, 0.0  ;;  %v5640_v14 = vadd.f32 %v6297_v32, %v5576_v22  ;;  %v5581_v6 = vadd.f32 %v9412_v20, %v5542_v42  ;;  %v5540_v49 = vadd.f32 %v5473_v19, %v5246_v26  ;;  %v9945_v46 = vld [vmem:[#allocation36_spill] sm:$0xff]  ;;  %v9948_v19 = vld [vmem:[#allocation38_spill] sm:$0xff] }
 0x3d9   : > { %v7224_v50 = vpop.f32.mrf.mxu1  ;;  %v4665_v32 = vadd.f32 %v9944_v2, %v9943_v51  ;;  %v4962_v0 = vadd.f32 %v9945_v46, %v4667_v48  ;;  %v6306_v38 = vld [vmem:[%s7332_s6 + $0x151] sm:$0xff] }
 0x3da   : > { %5706 = vst.msk [vmem:[%s9434_s21 + $0x98] sm:$0xff] %vm325_vm1, %v5674_v57  ;;  %v5672_v17 = vmax.f32 %v5640_v14, 0.0  ;;  %v5645_v10 = vadd.f32 %v6302_v21, %v5581_v6  ;;  %v5579_v25 = vadd.f32 %v9412_v20, %v5540_v49  ;;  %v5543_v35 = vadd.f32 %v7224_v50, %v5249_v29  ;;  %v9946_v29 = vld [vmem:[#allocation64_spill] sm:$0xff]  ;;  %v7198_v6 = vpop.f32.mrf.mxu0 }
 0x3db   : > { %v5476_v12 = vpop.f32.mrf.mxu1  ;;  %v4668_v15 = vadd.f32 %v9947_v3, %v9946_v29  ;;  %v5251_v21 = vadd.f32 %v5198_v55, %v4957_v39  ;;  %v4960_v57 = vadd.f32 %v9948_v19, %v4665_v32  ;;  %v6307_v50 = vld [vmem:[%s7332_s6 + $0x159] sm:$0xff]  ;;  %v6309_v32 = vld [vmem:[%s7332_s6 + $0x171] sm:$0xff] }
 0x3dc   : > { %5704 = vst.msk [vmem:[%s9434_s21 + $0x88] sm:$0xff] %vm325_vm1, %v5672_v17  ;;  %v5677_v52 = vmax.f32 %v5645_v10, 0.0  ;;  %v5643_v45 = vadd.f32 %v6300_v30, %v5579_v25  ;;  %v5582_v27 = vadd.f32 %v9412_v20, %v5543_v35  ;;  %v5541_v36 = vadd.f32 %v5476_v12, %v5247_v33  ;;  %v9949_v33 = vld [vmem:[#allocation9_spill] sm:$0xff] }
 0x3dd   : > { %v7227_v62 = vpop.f32.mrf.mxu1  ;;  %v4666_v56 = vadd.f32 %v9950_v11, %v9949_v33  ;;  %v5256_v30 = vadd.f32 %v7197_v53, %v4962_v0  ;;  %v4963_v55 = vadd.f32 %v9397_v24, %v4668_v15  ;;  %v5254_v41 = vadd.f32 %v5211_v37, %v4960_v57  ;;  %v5214_v53 = vpop.f32.mrf.mxu0 }
 0x3de   : > { %5709 = vst.msk [vmem:[%s9434_s21 + $0xb0] sm:$0xff] %vm325_vm1, %v5677_v52  ;;  %v5675_v9 = vmax.f32 %v5643_v45, 0.0  ;;  %v5646_v31 = vadd.f32 %v6303_v43, %v5582_v27  ;;  %v5580_v18 = vadd.f32 %v9412_v20, %v5541_v36  ;;  %v5546_v26 = vadd.f32 %v7227_v62, %v5252_v8  ;;  %v6305_v8 = vld [vmem:[%s7332_s6 + $0x141] sm:$0xff] }
 0x3df   : > { %v5489_v22 = vpop.f32.mrf.mxu1  ;;  %v4961_v23 = vadd.f32 %v9401_v13, %v4666_v56  ;;  %v5257_v52 = vadd.f32 %v7198_v6, %v4963_v55  ;;  %v6310_v45 = vld [vmem:[%s7332_s6 + $0x181] sm:$0xff] }
 0x3e0   : > { %5707 = vst.msk [vmem:[%s9434_s21 + $0xa0] sm:$0xff] %vm325_vm1, %v5675_v9  ;;  %v5678_v42 = vmax.f32 %v5646_v31, 0.0  ;;  %v5644_v58 = vadd.f32 %v6301_v34, %v5580_v18  ;;  %v5585_v28 = vadd.f32 %v9412_v20, %v5546_v26  ;;  %v5544_v7 = vadd.f32 %v5489_v22, %v5250_v1  ;;  %v6308_v1 = vld [vmem:[%s7332_s6 + $0x169] sm:$0xff] }
 0x3e1   : > { %v7228_v14 = vpop.f32.mrf.mxu1  ;;  %v5255_v48 = vadd.f32 %v5214_v53, %v4961_v23  ;;  %v6311_v9 = vld [vmem:[%s7332_s6 + $0x189] sm:$0xff] }
 0x3e2   : > { %5710 = vst.msk [vmem:[%s9434_s21 + $0xb8] sm:$0xff] %vm325_vm1, %v5678_v42  ;;  %v5676_v49 = vmax.f32 %v5644_v58, 0.0  ;;  %v5649_v44 = vadd.f32 %v6306_v38, %v5585_v28  ;;  %v5583_v61 = vadd.f32 %v9412_v20, %v5544_v7  ;;  %v5547_v4 = vadd.f32 %v7228_v14, %v5253_v59 }
 0x3e3   : > { %v5492_v17 = vpop.f32.mrf.mxu1 }
 0x3e4   : > { %5708 = vst.msk [vmem:[%s9434_s21 + $0xa8] sm:$0xff] %vm325_vm1, %v5676_v49  ;;  %v5681_v10 = vmax.f32 %v5649_v44, 0.0  ;;  %v5647_v25 = vadd.f32 %v6304_v63, %v5583_v61  ;;  %v5586_v35 = vadd.f32 %v9412_v20, %v5547_v4  ;;  %v5545_v40 = vadd.f32 %v5492_v17, %v5251_v21 }
 0x3e5   : > { %v7231_v5 = vpop.f32.mrf.mxu1 }
 0x3e6   : > { %5713 = vst.msk [vmem:[%s9434_s21 + $0xd0] sm:$0xff] %vm325_vm1, %v5681_v10  ;;  %v5679_v24 = vmax.f32 %v5647_v25, 0.0  ;;  %v5650_v54 = vadd.f32 %v6307_v50, %v5586_v35  ;;  %v5584_v43 = vadd.f32 %v9412_v20, %v5545_v40  ;;  %v5550_v12 = vadd.f32 %v7231_v5, %v5256_v30 }
 0x3e7   : > { %v5505_v27 = vpop.f32.mrf.mxu1 }
 0x3e8   : > { %5711 = vst.msk [vmem:[%s9434_s21 + $0xc0] sm:$0xff] %vm325_vm1, %v5679_v24  ;;  %v5682_v13 = vmax.f32 %v5650_v54, 0.0  ;;  %v5648_v36 = vadd.f32 %v6305_v8, %v5584_v43  ;;  %v5589_v47 = vadd.f32 %v9412_v20, %v5550_v12  ;;  %v5548_v60 = vadd.f32 %v5505_v27, %v5254_v41 }
 0x3e9   : > { %v7232_v16 = vpop.f32.mrf.mxu1 }
 0x3ea   : > { %5714 = vst.msk [vmem:[%s9434_s21 + $0xd8] sm:$0xff] %vm325_vm1, %v5682_v13  ;;  %v5680_v39 = vmax.f32 %v5648_v36, 0.0  ;;  %v5653_v34 = vadd.f32 %v6310_v45, %v5589_v47  ;;  %v5587_v62 = vadd.f32 %v9412_v20, %v5548_v60  ;;  %v5551_v37 = vadd.f32 %v7232_v16, %v5257_v52 }
 0x3eb   : > { %v5508_v31 = vpop.f32.mrf.mxu1 }
 0x3ec   : > { %5712 = vst.msk [vmem:[%s9434_s21 + $0xc8] sm:$0xff] %vm325_vm1, %v5680_v39  ;;  %v5685_v18 = vmax.f32 %v5653_v34, 0.0  ;;  %v5651_v26 = vadd.f32 %v6308_v1, %v5587_v62  ;;  %v5590_v51 = vadd.f32 %v9412_v20, %v5551_v37  ;;  %v5549_v2 = vadd.f32 %v5508_v31, %v5255_v48 }
 0x3ee   : > { %5717 = vst.msk [vmem:[%s9434_s21 + $0xf0] sm:$0xff] %vm325_vm1, %v5685_v18  ;;  %v5683_v59 = vmax.f32 %v5651_v26, 0.0  ;;  %v5654_v46 = vadd.f32 %v6311_v9, %v5590_v51  ;;  %v5588_v0 = vadd.f32 %v9412_v20, %v5549_v2 }
 0x3f0   : > { %5715 = vst.msk [vmem:[%s9434_s21 + $0xe0] sm:$0xff] %vm325_vm1, %v5683_v59  ;;  %v5686_v38 = vmax.f32 %v5654_v46, 0.0  ;;  %v5652_v22 = vadd.f32 %v6309_v32, %v5588_v0 }
 0x3f2   : > { %5718 = vst.msk [vmem:[%s9434_s21 + $0xf8] sm:$0xff] %vm325_vm1, %v5686_v38  ;;  %v5684_v42 = vmax.f32 %v5652_v22, 0.0 }
 0x3f4   : > { %5716 = vst.msk [vmem:[%s9434_s21 + $0xe8] sm:$0xff] %vm325_vm1, %v5684_v42 }
 0x3f5 PF: > { %s15_s18 = sadd.s32 1, %s7267_s18  }
 0x3f6   : > { %p12_p4 = scmp.ge.s32.totalorder %s15_s18, 4  }
 0x3f8   :  { %14 = sbr.rel (!%p12_p4) target bundleno = 1 (0x1), region = 90 }

</bundles_post_ra>
